<compile_context>
chip_gen: v5e
topology: v5e:2x2
jax: 0.10.0
libtpu: 0.0.40
codegen_flags: <defaults>
</compile_context>

<pallas_src>
import functools

import jax
import jax.numpy as jnp
from jax.experimental import pallas as pl
from jax.experimental.pallas import tpu as pltpu


def _round_up(x: int, m: int) -> int:
    return (x + m - 1) // m * m


# ----------------------------- Pallas kernel ------------------------------ #
def gru_norm_kernel(gi_hbm, whh_ref, bhn_ref, out_ref, gi_buf, sem):
    """GRU recurrence over T steps + final row-wise L2 normalization.

    gi_hbm : (T, Bp, 3*Hp) bf16  HBM-resident input-side gate pre-activations
                                 (x@W_ih + b_ih, with b_hr/b_hz folded in),
                                 gate order r|z|n, each gate an Hp lane block.
    whh_ref: (Hp, 3*Hp)    bf16  hidden weights, gates concatenated on lanes.
    bhn_ref: (1, Hp)       f32   b_hn only (must stay inside the r* term).
    out_ref: (Bp, Hp)      f32   L2-normalized final hidden state.
    gi_buf : (2, Bp, 3*Hp) bf16  VMEM double buffer (scratch).
    sem    : (2,)                DMA semaphores, one per buffer slot.
    """
    T = gi_hbm.shape[0]
    Bp, Hp = out_ref.shape

    w = whh_ref[...]                       # (Hp, 3Hp) bf16 -- loaded once
    bn = bhn_ref[...]                      # (1, Hp)   f32

    # Prime the double buffer with the t=0 slab.
    pltpu.make_async_copy(gi_hbm.at[0], gi_buf.at[0], sem.at[0]).start()

    def step(t, carry):
        h, h_bf = carry
        slot = t & 1
        nxt = 1 - slot
        # Wait for this step's slab, then immediately prefetch the next one.
        # (Next index is clamped; the redundant final prefetch is drained
        # after the loop so DMA semaphores stay balanced — no pl.when needed.)
        pltpu.make_async_copy(gi_hbm.at[t], gi_buf.at[slot], sem.at[slot]).wait()
        t_next = jnp.minimum(t + 1, T - 1)
        pltpu.make_async_copy(gi_hbm.at[t_next], gi_buf.at[nxt], sem.at[nxt]).start()

        gi = gi_buf[slot].astype(jnp.float32)          # (Bp, 3Hp) f32
        # One fused MXU push per step: (Bp, Hp) @ (Hp, 3Hp), f32 accumulate.
        gh = jnp.dot(h_bf, w, preferred_element_type=jnp.float32)
        # PyTorch GRU gate order / bias placement (b_hr, b_hz already folded
        # into gi outside the kernel):
        #   r = sigmoid(i_r + h_r); z = sigmoid(i_z + h_z)
        #   n = tanh(i_n + r * (W_hn h + b_hn)); h' = (1-z)*n + z*h
        r = jax.nn.sigmoid(gi[:, :Hp] + gh[:, :Hp])
        z = jax.nn.sigmoid(gi[:, Hp:2 * Hp] + gh[:, Hp:2 * Hp])
        n = jnp.tanh(gi[:, 2 * Hp:] + r * (gh[:, 2 * Hp:] + bn))
        h_new = (1.0 - z) * n + z * h
        # Produce the bf16 copy for the next step's dot here so the cast can
        # overlap the remaining gate math.
        return h_new, h_new.astype(w.dtype)

    h0 = jnp.zeros((Bp, Hp), jnp.float32)
    # Bounded unroll: keeps several steps visible to the scheduler without
    # exploding code size / vreg pressure at larger T.
    h, _ = jax.lax.fori_loop(0, T, step, (h0, h0.astype(w.dtype)),
                             unroll=min(T, 8))

    # Drain the extra (clamped) prefetch issued in the last iteration.
    pltpu.make_async_copy(gi_hbm.at[T - 1], gi_buf.at[T % 2], sem.at[T % 2]).wait()

    # x = h / ||h||_2 (row-wise). Padded lanes of h stay exactly zero, so the
    # reduction over Hp equals the reduction over the real H columns.
    inv = jax.lax.rsqrt(jnp.sum(h * h, axis=1, keepdims=True) + 1e-12)
    out_ref[...] = h * inv


def run_gru_pallas(gi_bf16, whh_bf16, bhn):
    """gi_bf16: (T, Bp, 3*Hp) bf16 (stays in HBM); whh_bf16: (Hp, 3*Hp) bf16;
    bhn: (1, Hp) f32."""
    T, Bp, three_hp = gi_bf16.shape
    Hp = three_hp // 3
    # Explicit VMEM budget (well under every generation's scoped default):
    #   2 gi slabs (bf16) + W_hh (bf16) + b_hn + out, plus generous margin.
    need = 2 * Bp * three_hp * 2 + Hp * three_hp * 2 + Hp * 4 + Bp * Hp * 4
    vmem_limit = max(4 * 1024 * 1024, 4 * need)
    return pl.pallas_call(
        gru_norm_kernel,
        out_shape=jax.ShapeDtypeStruct((Bp, Hp), jnp.float32),
        in_specs=[
            pl.BlockSpec(memory_space=pl.ANY),                   # gi in HBM
            pl.BlockSpec(memory_space=pltpu.MemorySpace.VMEM),   # W_hh
            pl.BlockSpec(memory_space=pltpu.MemorySpace.VMEM),   # b_hn
        ],
        out_specs=pl.BlockSpec(memory_space=pltpu.MemorySpace.VMEM),
        scratch_shapes=[
            pltpu.VMEM((2, Bp, three_hp), jnp.bfloat16),         # double buffer
            pltpu.SemaphoreType.DMA((2,)),
        ],
        compiler_params=pltpu.CompilerParams(vmem_limit_bytes=vmem_limit),
    )(gi_bf16, whh_bf16, bhn)


# ------------------------------ Module glue ------------------------------- #
def init_params(key, num_dim, cat_vocab, cat_emb_dim, hidden):
    din = num_dim + cat_emb_dim
    ks = jax.random.split(key, 6)
    bound = 1.0 / jnp.sqrt(hidden)
    return {
        # BatchNorm1d defaults: weight=1, bias=0 (training mode -> batch stats)
        "bn_weight": jnp.ones((num_dim,), jnp.float32),
        "bn_bias": jnp.zeros((num_dim,), jnp.float32),
        # nn.Embedding default init: N(0, 1)
        "emb": jax.random.normal(ks[0], (cat_vocab, cat_emb_dim), jnp.float32),
        # nn.GRU default init: U(-1/sqrt(H), 1/sqrt(H)); PyTorch layout (3H, Din)
        "w_ih": jax.random.uniform(ks[1], (3 * hidden, din), jnp.float32, -bound, bound),
        "w_hh": jax.random.uniform(ks[2], (3 * hidden, hidden), jnp.float32, -bound, bound),
        "b_ih": jax.random.uniform(ks[3], (3 * hidden,), jnp.float32, -bound, bound),
        "b_hh": jax.random.uniform(ks[4], (3 * hidden,), jnp.float32, -bound, bound),
    }


def prepare_gru_params(params, hidden):
    """One-time (hoisted) padded / gate-blocked weight re-layout.

    Produces lane-blocked, padded layouts:
      wih_bf16: (Din, 3*Hp) bf16    bih: (1, 3*Hp) f32 (b_ih + b_hr/b_hz fold)
      whh_bf16: (Hp, 3*Hp)  bf16    bhn: (1, Hp)   f32 (b_hn only)
    Padded columns/rows are exactly zero, so padded lanes of the hidden state
    stay zero throughout the recurrence.
    """
    H = hidden
    Hp = _round_up(H, 128)
    din = params["w_ih"].shape[1]
    w_ih, w_hh = params["w_ih"], params["w_hh"]
    b_ih, b_hh = params["b_ih"], params["b_hh"]

    wih_p = jnp.zeros((din, 3 * Hp), jnp.float32)
    whh_p = jnp.zeros((Hp, 3 * Hp), jnp.float32)
    bih_p = jnp.zeros((1, 3 * Hp), jnp.float32)
    bhn_p = jnp.zeros((1, Hp), jnp.float32)
    for g in range(3):  # PyTorch row blocks: g=0 -> r, g=1 -> z, g=2 -> n
        wih_p = wih_p.at[:, g * Hp:g * Hp + H].set(w_ih[g * H:(g + 1) * H, :].T)
        whh_p = whh_p.at[:H, g * Hp:g * Hp + H].set(w_hh[g * H:(g + 1) * H, :].T)
        bias = b_ih[g * H:(g + 1) * H]
        if g < 2:  # fold b_hr / b_hz into the input-side bias (valid: not scaled by r)
            bias = bias + b_hh[g * H:(g + 1) * H]
        bih_p = bih_p.at[0, g * Hp:g * Hp + H].set(bias)
    bhn_p = bhn_p.at[0, :H].set(b_hh[2 * H:3 * H])

    return {
        "wih_bf16": wih_p.astype(jnp.bfloat16),
        "bih": bih_p,
        "whh_bf16": whh_p.astype(jnp.bfloat16),
        "bhn": bhn_p,
    }


@functools.partial(jax.jit, static_argnames=("num_dim", "cat_emb_dim", "hidden"))
def encoder_forward(n, c, params, gru, *, num_dim, cat_emb_dim, hidden):
    B, T, _ = n.shape
    H = hidden
    din = num_dim + cat_emb_dim
    Hp = gru["whh_bf16"].shape[0]
    Bp = _round_up(B, 16)   # 16: keep bf16 tiles sublane-dense

    # --- BatchNorm1d (training mode: biased batch statistics over (B*T) rows)
    # TODO(synk): eval-mode running statistics are not implemented.
    n_flat = n.reshape(-1, num_dim)
    mean = jnp.mean(n_flat, axis=0)
    var = jnp.var(n_flat, axis=0)
    n_hat = (n_flat - mean) * jax.lax.rsqrt(var + 1e-5)
    n_hat = n_hat * params["bn_weight"] + params["bn_bias"]
    n_hat = n_hat.reshape(B, T, num_dim)

    # --- Embedding lookup (gather stays in XLA)
    c_emb = params["emb"][c.reshape(-1)].reshape(B, T, cat_emb_dim)

    # --- concat + transpose to time-major (T, B, Din), pad batch BEFORE the
    #     projection so gi comes out sublane-padded and lane-dense.
    x = jnp.concatenate([n_hat, c_emb], axis=2)
    x = jnp.transpose(x, (1, 0, 2)).astype(jnp.float32)
    x = jnp.pad(x, ((0, 0), (0, Bp - B), (0, 0)))          # (T, Bp, din)

    # --- Hoisted input projection: one big bf16 MXU matmul, f32 accumulate.
    gi = jnp.dot(x.reshape(T * Bp, din).astype(jnp.bfloat16), gru["wih_bf16"],
                 preferred_element_type=jnp.float32) + gru["bih"]
    gi = gi.reshape(T, Bp, 3 * Hp).astype(jnp.bfloat16)     # bf16 halves DMA bytes

    out_p = run_gru_pallas(gi, gru["whh_bf16"], gru["bhn"])
    return out_p[:B, :H]


# --------------------------- pure-JAX reference ---------------------------- #
def _gru_norm_ref(x_tbd, w_ih, w_hh, b_ih, b_hh, hidden):
    """f32 reference GRU (PyTorch semantics) + L2 normalization."""
    T, B, _ = x_tbd.shape
    H = hidden
    h = jnp.zeros((B, H), jnp.float32)
    for t in range(T):
        gi = x_tbd[t] @ w_ih.T + b_ih
        gh = h @ w_hh.T + b_hh
        r = jax.nn.sigmoid(gi[:, :H] + gh[:, :H])
        z = jax.nn.sigmoid(gi[:, H:2 * H] + gh[:, H:2 * H])
        n = jnp.tanh(gi[:, 2 * H:] + r * gh[:, 2 * H:])
        h = (1.0 - z) * n + z * h
    return h / jnp.linalg.norm(h, axis=1, keepdims=True)


# --------------------------------- main ------------------------------------ #
if __name__ == "__main__":
    # Shapes implied by the forward: n (B, T, num_dim) float, c (B, T) int
    B, T = 2, 8
    NUM_DIM = 4
    CAT_VOCAB = 10
    CAT_EMB = 4
    HIDDEN = 32

    key = jax.random.PRNGKey(0)
    kp, kn, kc = jax.random.split(key, 3)
    params = init_params(kp, NUM_DIM, CAT_VOCAB, CAT_EMB, HIDDEN)
    gru_prep = prepare_gru_params(params, HIDDEN)   # one-time re-layout (hoisted)

    n_in = jax.random.normal(kn, (B, T, NUM_DIM), jnp.float32)
    c_in = jax.random.randint(kc, (B, T), 0, CAT_VOCAB, jnp.int32)

    out = encoder_forward(n_in, c_in, params, gru_prep,
                          num_dim=NUM_DIM, cat_emb_dim=CAT_EMB, hidden=HIDDEN)
    out = jax.block_until_ready(out)

    assert out.shape == (B, HIDDEN), out.shape
    assert bool(jnp.all(jnp.isfinite(out)))
    # output rows are L2-normalized by construction
    row_norms = jnp.linalg.norm(out, axis=1)
    assert bool(jnp.allclose(row_norms, 1.0, atol=1e-3)), row_norms

    # Pure-JAX reference check (same preprocessing, f32 GRU).
    n_flat = n_in.reshape(-1, NUM_DIM)
    mean, var = jnp.mean(n_flat, axis=0), jnp.var(n_flat, axis=0)
    n_hat = ((n_flat - mean) * jax.lax.rsqrt(var + 1e-5)
             * params["bn_weight"] + params["bn_bias"]).reshape(B, T, NUM_DIM)
    c_emb = params["emb"][c_in.reshape(-1)].reshape(B, T, CAT_EMB)
    x_ref = jnp.transpose(jnp.concatenate([n_hat, c_emb], axis=2), (1, 0, 2))
    ref = _gru_norm_ref(x_ref, params["w_ih"], params["w_hh"],
                        params["b_ih"], params["b_hh"], HIDDEN)
    assert bool(jnp.allclose(out, ref, atol=5e-2)), jnp.max(jnp.abs(out - ref))

    print("KERNEL_OK")
</pallas_src>

<mosaic_0001>
module attributes {stable_mosaic.version = 11 : i64} {
  func.func @gru_norm_kernel(%arg0: memref<8x16x384xbf16, #tpu.memory_space<any>>, %arg1: memref<128x384xbf16, #tpu.memory_space<vmem>>, %arg2: memref<1x128xf32, #tpu.memory_space<vmem>>, %arg3: memref<16x128xf32, #tpu.memory_space<vmem>>, %arg4: memref<2x16x384xbf16, #tpu.memory_space<vmem>>, %arg5: memref<2x!tpu.dma_semaphore, #tpu.memory_space<semaphore_mem>>) attributes {dimension_semantics = [], scalar_prefetch = 0 : i64, scratch_operands = 2 : i64, tpu.core_type = #tpu.core_type<tc>} {
    %c0 = arith.constant 0 : index
    %c0_0 = arith.constant 0 : index
    %0 = vector.load %arg1[%c0, %c0_0] : memref<128x384xbf16, #tpu.memory_space<vmem>>, vector<128x384xbf16>
    %c0_1 = arith.constant 0 : index
    %c0_2 = arith.constant 0 : index
    %1 = vector.load %arg2[%c0_1, %c0_2] : memref<1x128xf32, #tpu.memory_space<vmem>>, vector<1x128xf32>
    %c0_i32 = arith.constant 0 : i32
    %c0_i32_3 = arith.constant 0 : i32
    %c0_i32_4 = arith.constant 0 : i32
    %c0_i32_5 = arith.constant 0 : i32
    %c0_i32_6 = arith.constant 0 : i32
    %2 = tpu.memref_slice %arg0[%c0_i32, %c0_i32_5, %c0_i32_6] : memref<8x16x384xbf16, #tpu.memory_space<any>> -> memref<1x16x384xbf16, #tpu.memory_space<any>>
    %3 = tpu.memref_squeeze %2 : memref<1x16x384xbf16, #tpu.memory_space<any>> -> memref<16x384xbf16, #tpu.memory_space<any>>
    %c0_i32_7 = arith.constant 0 : i32
    %c0_i32_8 = arith.constant 0 : i32
    %4 = tpu.memref_slice %arg4[%c0_i32_3, %c0_i32_7, %c0_i32_8] : memref<2x16x384xbf16, #tpu.memory_space<vmem>> -> memref<1x16x384xbf16, #tpu.memory_space<vmem>>
    %5 = tpu.memref_squeeze %4 : memref<1x16x384xbf16, #tpu.memory_space<vmem>> -> memref<16x384xbf16, #tpu.memory_space<vmem>>
    %6 = tpu.memref_slice %arg5[%c0_i32_4] : memref<2x!tpu.dma_semaphore, #tpu.memory_space<semaphore_mem>> -> memref<1x!tpu.dma_semaphore, #tpu.memory_space<semaphore_mem>>
    %7 = tpu.memref_squeeze %6 : memref<1x!tpu.dma_semaphore, #tpu.memory_space<semaphore_mem>> -> memref<!tpu.dma_semaphore, #tpu.memory_space<semaphore_mem>>
    tpu.enqueue_dma source(%3 : memref<16x384xbf16, #tpu.memory_space<any>>) target(%5 : memref<16x384xbf16, #tpu.memory_space<vmem>>) target_semaphore(%7 : memref<!tpu.dma_semaphore, #tpu.memory_space<semaphore_mem>>)
    %cst = arith.constant 0.000000e+00 : f32
    %8 = vector.broadcast %cst : f32 to vector<16x128xf32>
    %9 = arith.truncf %8 : vector<16x128xf32> to vector<16x128xbf16>
    %c0_i32_9 = arith.constant 0 : i32
    %c1_i32 = arith.constant 1 : i32
    %10 = arith.andi %c0_i32_9, %c1_i32 : i32
    %c1_i32_10 = arith.constant 1 : i32
    %11 = arith.subi %c1_i32_10, %10 : i32
    %c0_i32_11 = arith.constant 0 : i32
    %c0_i32_12 = arith.constant 0 : i32
    %12 = tpu.memref_slice %arg0[%c0_i32_9, %c0_i32_11, %c0_i32_12] : memref<8x16x384xbf16, #tpu.memory_space<any>> -> memref<1x16x384xbf16, #tpu.memory_space<any>>
    %13 = tpu.memref_squeeze %12 : memref<1x16x384xbf16, #tpu.memory_space<any>> -> memref<16x384xbf16, #tpu.memory_space<any>>
    %c0_i32_13 = arith.constant 0 : i32
    %c0_i32_14 = arith.constant 0 : i32
    %14 = tpu.memref_slice %arg4[%10, %c0_i32_13, %c0_i32_14] : memref<2x16x384xbf16, #tpu.memory_space<vmem>> -> memref<1x16x384xbf16, #tpu.memory_space<vmem>>
    %15 = tpu.memref_squeeze %14 : memref<1x16x384xbf16, #tpu.memory_space<vmem>> -> memref<16x384xbf16, #tpu.memory_space<vmem>>
    %16 = tpu.memref_slice %arg5[%10] : memref<2x!tpu.dma_semaphore, #tpu.memory_space<semaphore_mem>> -> memref<1x!tpu.dma_semaphore, #tpu.memory_space<semaphore_mem>>
    %17 = tpu.memref_squeeze %16 : memref<1x!tpu.dma_semaphore, #tpu.memory_space<semaphore_mem>> -> memref<!tpu.dma_semaphore, #tpu.memory_space<semaphore_mem>>
    tpu.wait_dma2 semaphore(%17 : memref<!tpu.dma_semaphore, #tpu.memory_space<semaphore_mem>>) src(%13 : memref<16x384xbf16, #tpu.memory_space<any>>) dst(%15 : memref<16x384xbf16, #tpu.memory_space<vmem>>)
    %c1_i32_15 = arith.constant 1 : i32
    %18 = arith.addi %c0_i32_9, %c1_i32_15 : i32
    %c7_i32 = arith.constant 7 : i32
    %19 = arith.minsi %18, %c7_i32 : i32
    %c0_i32_16 = arith.constant 0 : i32
    %c0_i32_17 = arith.constant 0 : i32
    %20 = tpu.memref_slice %arg0[%19, %c0_i32_16, %c0_i32_17] : memref<8x16x384xbf16, #tpu.memory_space<any>> -> memref<1x16x384xbf16, #tpu.memory_space<any>>
    %21 = tpu.memref_squeeze %20 : memref<1x16x384xbf16, #tpu.memory_space<any>> -> memref<16x384xbf16, #tpu.memory_space<any>>
    %c0_i32_18 = arith.constant 0 : i32
    %c0_i32_19 = arith.constant 0 : i32
    %22 = tpu.memref_slice %arg4[%11, %c0_i32_18, %c0_i32_19] : memref<2x16x384xbf16, #tpu.memory_space<vmem>> -> memref<1x16x384xbf16, #tpu.memory_space<vmem>>
    %23 = tpu.memref_squeeze %22 : memref<1x16x384xbf16, #tpu.memory_space<vmem>> -> memref<16x384xbf16, #tpu.memory_space<vmem>>
    %24 = tpu.memref_slice %arg5[%11] : memref<2x!tpu.dma_semaphore, #tpu.memory_space<semaphore_mem>> -> memref<1x!tpu.dma_semaphore, #tpu.memory_space<semaphore_mem>>
    %25 = tpu.memref_squeeze %24 : memref<1x!tpu.dma_semaphore, #tpu.memory_space<semaphore_mem>> -> memref<!tpu.dma_semaphore, #tpu.memory_space<semaphore_mem>>
    tpu.enqueue_dma source(%21 : memref<16x384xbf16, #tpu.memory_space<any>>) target(%23 : memref<16x384xbf16, #tpu.memory_space<vmem>>) target_semaphore(%25 : memref<!tpu.dma_semaphore, #tpu.memory_space<semaphore_mem>>)
    %26 = arith.index_cast %10 : i32 to index
    %c0_20 = arith.constant 0 : index
    %c0_21 = arith.constant 0 : index
    %27 = vector.load %arg4[%26, %c0_20, %c0_21] : memref<2x16x384xbf16, #tpu.memory_space<vmem>>, vector<1x16x384xbf16>
    %28 = vector.shape_cast %27 : vector<1x16x384xbf16> to vector<16x384xbf16>
    %29 = arith.extf %28 : vector<16x384xbf16> to vector<16x384xf32>
    %cst_22 = arith.constant dense<0.000000e+00> : vector<16x384xf32>
    %30 = tpu.matmul %9, %0, %cst_22 {dimension_numbers = #tpu.dot_dimension_numbers<[1], [0], [0], [1], [0, 0, 1, 1], [], []>} : vector<16x128xbf16>, vector<128x384xbf16>, vector<16x384xf32> -> vector<16x384xf32>
    %31 = vector.extract_strided_slice %29 {offsets = [0, 0], sizes = [16, 128], strides = [1, 1]} : vector<16x384xf32> to vector<16x128xf32>
    %32 = vector.extract_strided_slice %30 {offsets = [0, 0], sizes = [16, 128], strides = [1, 1]} : vector<16x384xf32> to vector<16x128xf32>
    %33 = arith.addf %31, %32 : vector<16x128xf32>
    %34 = arith.negf %33 : vector<16x128xf32>
    %35 = math.exp %34 : vector<16x128xf32>
    %cst_23 = arith.constant 1.000000e+00 : f32
    %36 = vector.broadcast %cst_23 : f32 to vector<16x128xf32>
    %37 = arith.addf %36, %35 : vector<16x128xf32>
    %38 = arith.divf %36, %37 : vector<16x128xf32>
    %39 = vector.extract_strided_slice %29 {offsets = [0, 128], sizes = [16, 128], strides = [1, 1]} : vector<16x384xf32> to vector<16x128xf32>
    %40 = vector.extract_strided_slice %30 {offsets = [0, 128], sizes = [16, 128], strides = [1, 1]} : vector<16x384xf32> to vector<16x128xf32>
    %41 = arith.addf %39, %40 : vector<16x128xf32>
    %42 = arith.negf %41 : vector<16x128xf32>
    %43 = math.exp %42 : vector<16x128xf32>
    %cst_24 = arith.constant 1.000000e+00 : f32
    %44 = vector.broadcast %cst_24 : f32 to vector<16x128xf32>
    %45 = arith.addf %44, %43 : vector<16x128xf32>
    %46 = arith.divf %44, %45 : vector<16x128xf32>
    %47 = vector.extract_strided_slice %29 {offsets = [0, 256], sizes = [16, 128], strides = [1, 1]} : vector<16x384xf32> to vector<16x128xf32>
    %48 = vector.extract_strided_slice %30 {offsets = [0, 256], sizes = [16, 128], strides = [1, 1]} : vector<16x384xf32> to vector<16x128xf32>
    %49 = vector.broadcast %1 : vector<1x128xf32> to vector<16x128xf32>
    %50 = arith.addf %48, %49 : vector<16x128xf32>
    %51 = arith.mulf %38, %50 : vector<16x128xf32>
    %52 = arith.addf %47, %51 : vector<16x128xf32>
    %53 = math.tanh %52 : vector<16x128xf32>
    %cst_25 = arith.constant 1.000000e+00 : f32
    %54 = vector.broadcast %cst_25 : f32 to vector<16x128xf32>
    %55 = arith.subf %54, %46 : vector<16x128xf32>
    %56 = arith.mulf %55, %53 : vector<16x128xf32>
    %57 = arith.mulf %46, %8 : vector<16x128xf32>
    %58 = arith.addf %56, %57 : vector<16x128xf32>
    %59 = arith.truncf %58 : vector<16x128xf32> to vector<16x128xbf16>
    %c1_i32_26 = arith.constant 1 : i32
    %c1_i32_27 = arith.constant 1 : i32
    %60 = arith.andi %c1_i32_26, %c1_i32_27 : i32
    %c1_i32_28 = arith.constant 1 : i32
    %61 = arith.subi %c1_i32_28, %60 : i32
    %c0_i32_29 = arith.constant 0 : i32
    %c0_i32_30 = arith.constant 0 : i32
    %62 = tpu.memref_slice %arg0[%c1_i32_26, %c0_i32_29, %c0_i32_30] : memref<8x16x384xbf16, #tpu.memory_space<any>> -> memref<1x16x384xbf16, #tpu.memory_space<any>>
    %63 = tpu.memref_squeeze %62 : memref<1x16x384xbf16, #tpu.memory_space<any>> -> memref<16x384xbf16, #tpu.memory_space<any>>
    %c0_i32_31 = arith.constant 0 : i32
    %c0_i32_32 = arith.constant 0 : i32
    %64 = tpu.memref_slice %arg4[%60, %c0_i32_31, %c0_i32_32] : memref<2x16x384xbf16, #tpu.memory_space<vmem>> -> memref<1x16x384xbf16, #tpu.memory_space<vmem>>
    %65 = tpu.memref_squeeze %64 : memref<1x16x384xbf16, #tpu.memory_space<vmem>> -> memref<16x384xbf16, #tpu.memory_space<vmem>>
    %66 = tpu.memref_slice %arg5[%60] : memref<2x!tpu.dma_semaphore, #tpu.memory_space<semaphore_mem>> -> memref<1x!tpu.dma_semaphore, #tpu.memory_space<semaphore_mem>>
    %67 = tpu.memref_squeeze %66 : memref<1x!tpu.dma_semaphore, #tpu.memory_space<semaphore_mem>> -> memref<!tpu.dma_semaphore, #tpu.memory_space<semaphore_mem>>
    tpu.wait_dma2 semaphore(%67 : memref<!tpu.dma_semaphore, #tpu.memory_space<semaphore_mem>>) src(%63 : memref<16x384xbf16, #tpu.memory_space<any>>) dst(%65 : memref<16x384xbf16, #tpu.memory_space<vmem>>)
    %c1_i32_33 = arith.constant 1 : i32
    %68 = arith.addi %c1_i32_26, %c1_i32_33 : i32
    %c7_i32_34 = arith.constant 7 : i32
    %69 = arith.minsi %68, %c7_i32_34 : i32
    %c0_i32_35 = arith.constant 0 : i32
    %c0_i32_36 = arith.constant 0 : i32
    %70 = tpu.memref_slice %arg0[%69, %c0_i32_35, %c0_i32_36] : memref<8x16x384xbf16, #tpu.memory_space<any>> -> memref<1x16x384xbf16, #tpu.memory_space<any>>
    %71 = tpu.memref_squeeze %70 : memref<1x16x384xbf16, #tpu.memory_space<any>> -> memref<16x384xbf16, #tpu.memory_space<any>>
    %c0_i32_37 = arith.constant 0 : i32
    %c0_i32_38 = arith.constant 0 : i32
    %72 = tpu.memref_slice %arg4[%61, %c0_i32_37, %c0_i32_38] : memref<2x16x384xbf16, #tpu.memory_space<vmem>> -> memref<1x16x384xbf16, #tpu.memory_space<vmem>>
    %73 = tpu.memref_squeeze %72 : memref<1x16x384xbf16, #tpu.memory_space<vmem>> -> memref<16x384xbf16, #tpu.memory_space<vmem>>
    %74 = tpu.memref_slice %arg5[%61] : memref<2x!tpu.dma_semaphore, #tpu.memory_space<semaphore_mem>> -> memref<1x!tpu.dma_semaphore, #tpu.memory_space<semaphore_mem>>
    %75 = tpu.memref_squeeze %74 : memref<1x!tpu.dma_semaphore, #tpu.memory_space<semaphore_mem>> -> memref<!tpu.dma_semaphore, #tpu.memory_space<semaphore_mem>>
    tpu.enqueue_dma source(%71 : memref<16x384xbf16, #tpu.memory_space<any>>) target(%73 : memref<16x384xbf16, #tpu.memory_space<vmem>>) target_semaphore(%75 : memref<!tpu.dma_semaphore, #tpu.memory_space<semaphore_mem>>)
    %76 = arith.index_cast %60 : i32 to index
    %c0_39 = arith.constant 0 : index
    %c0_40 = arith.constant 0 : index
    %77 = vector.load %arg4[%76, %c0_39, %c0_40] : memref<2x16x384xbf16, #tpu.memory_space<vmem>>, vector<1x16x384xbf16>
    %78 = vector.shape_cast %77 : vector<1x16x384xbf16> to vector<16x384xbf16>
    %79 = arith.extf %78 : vector<16x384xbf16> to vector<16x384xf32>
    %cst_41 = arith.constant dense<0.000000e+00> : vector<16x384xf32>
    %80 = tpu.matmul %59, %0, %cst_41 {dimension_numbers = #tpu.dot_dimension_numbers<[1], [0], [0], [1], [0, 0, 1, 1], [], []>} : vector<16x128xbf16>, vector<128x384xbf16>, vector<16x384xf32> -> vector<16x384xf32>
    %81 = vector.extract_strided_slice %79 {offsets = [0, 0], sizes = [16, 128], strides = [1, 1]} : vector<16x384xf32> to vector<16x128xf32>
    %82 = vector.extract_strided_slice %80 {offsets = [0, 0], sizes = [16, 128], strides = [1, 1]} : vector<16x384xf32> to vector<16x128xf32>
    %83 = arith.addf %81, %82 : vector<16x128xf32>
    %84 = arith.negf %83 : vector<16x128xf32>
    %85 = math.exp %84 : vector<16x128xf32>
    %cst_42 = arith.constant 1.000000e+00 : f32
    %86 = vector.broadcast %cst_42 : f32 to vector<16x128xf32>
    %87 = arith.addf %86, %85 : vector<16x128xf32>
    %88 = arith.divf %86, %87 : vector<16x128xf32>
    %89 = vector.extract_strided_slice %79 {offsets = [0, 128], sizes = [16, 128], strides = [1, 1]} : vector<16x384xf32> to vector<16x128xf32>
    %90 = vector.extract_strided_slice %80 {offsets = [0, 128], sizes = [16, 128], strides = [1, 1]} : vector<16x384xf32> to vector<16x128xf32>
    %91 = arith.addf %89, %90 : vector<16x128xf32>
    %92 = arith.negf %91 : vector<16x128xf32>
    %93 = math.exp %92 : vector<16x128xf32>
    %cst_43 = arith.constant 1.000000e+00 : f32
    %94 = vector.broadcast %cst_43 : f32 to vector<16x128xf32>
    %95 = arith.addf %94, %93 : vector<16x128xf32>
    %96 = arith.divf %94, %95 : vector<16x128xf32>
    %97 = vector.extract_strided_slice %79 {offsets = [0, 256], sizes = [16, 128], strides = [1, 1]} : vector<16x384xf32> to vector<16x128xf32>
    %98 = vector.extract_strided_slice %80 {offsets = [0, 256], sizes = [16, 128], strides = [1, 1]} : vector<16x384xf32> to vector<16x128xf32>
    %99 = vector.broadcast %1 : vector<1x128xf32> to vector<16x128xf32>
    %100 = arith.addf %98, %99 : vector<16x128xf32>
    %101 = arith.mulf %88, %100 : vector<16x128xf32>
    %102 = arith.addf %97, %101 : vector<16x128xf32>
    %103 = math.tanh %102 : vector<16x128xf32>
    %cst_44 = arith.constant 1.000000e+00 : f32
    %104 = vector.broadcast %cst_44 : f32 to vector<16x128xf32>
    %105 = arith.subf %104, %96 : vector<16x128xf32>
    %106 = arith.mulf %105, %103 : vector<16x128xf32>
    %107 = arith.mulf %96, %58 : vector<16x128xf32>
    %108 = arith.addf %106, %107 : vector<16x128xf32>
    %109 = arith.truncf %108 : vector<16x128xf32> to vector<16x128xbf16>
    %c2_i32 = arith.constant 2 : i32
    %c1_i32_45 = arith.constant 1 : i32
    %110 = arith.andi %c2_i32, %c1_i32_45 : i32
    %c1_i32_46 = arith.constant 1 : i32
    %111 = arith.subi %c1_i32_46, %110 : i32
    %c0_i32_47 = arith.constant 0 : i32
    %c0_i32_48 = arith.constant 0 : i32
    %112 = tpu.memref_slice %arg0[%c2_i32, %c0_i32_47, %c0_i32_48] : memref<8x16x384xbf16, #tpu.memory_space<any>> -> memref<1x16x384xbf16, #tpu.memory_space<any>>
    %113 = tpu.memref_squeeze %112 : memref<1x16x384xbf16, #tpu.memory_space<any>> -> memref<16x384xbf16, #tpu.memory_space<any>>
    %c0_i32_49 = arith.constant 0 : i32
    %c0_i32_50 = arith.constant 0 : i32
    %114 = tpu.memref_slice %arg4[%110, %c0_i32_49, %c0_i32_50] : memref<2x16x384xbf16, #tpu.memory_space<vmem>> -> memref<1x16x384xbf16, #tpu.memory_space<vmem>>
    %115 = tpu.memref_squeeze %114 : memref<1x16x384xbf16, #tpu.memory_space<vmem>> -> memref<16x384xbf16, #tpu.memory_space<vmem>>
    %116 = tpu.memref_slice %arg5[%110] : memref<2x!tpu.dma_semaphore, #tpu.memory_space<semaphore_mem>> -> memref<1x!tpu.dma_semaphore, #tpu.memory_space<semaphore_mem>>
    %117 = tpu.memref_squeeze %116 : memref<1x!tpu.dma_semaphore, #tpu.memory_space<semaphore_mem>> -> memref<!tpu.dma_semaphore, #tpu.memory_space<semaphore_mem>>
    tpu.wait_dma2 semaphore(%117 : memref<!tpu.dma_semaphore, #tpu.memory_space<semaphore_mem>>) src(%113 : memref<16x384xbf16, #tpu.memory_space<any>>) dst(%115 : memref<16x384xbf16, #tpu.memory_space<vmem>>)
    %c1_i32_51 = arith.constant 1 : i32
    %118 = arith.addi %c2_i32, %c1_i32_51 : i32
    %c7_i32_52 = arith.constant 7 : i32
    %119 = arith.minsi %118, %c7_i32_52 : i32
    %c0_i32_53 = arith.constant 0 : i32
    %c0_i32_54 = arith.constant 0 : i32
    %120 = tpu.memref_slice %arg0[%119, %c0_i32_53, %c0_i32_54] : memref<8x16x384xbf16, #tpu.memory_space<any>> -> memref<1x16x384xbf16, #tpu.memory_space<any>>
    %121 = tpu.memref_squeeze %120 : memref<1x16x384xbf16, #tpu.memory_space<any>> -> memref<16x384xbf16, #tpu.memory_space<any>>
    %c0_i32_55 = arith.constant 0 : i32
    %c0_i32_56 = arith.constant 0 : i32
    %122 = tpu.memref_slice %arg4[%111, %c0_i32_55, %c0_i32_56] : memref<2x16x384xbf16, #tpu.memory_space<vmem>> -> memref<1x16x384xbf16, #tpu.memory_space<vmem>>
    %123 = tpu.memref_squeeze %122 : memref<1x16x384xbf16, #tpu.memory_space<vmem>> -> memref<16x384xbf16, #tpu.memory_space<vmem>>
    %124 = tpu.memref_slice %arg5[%111] : memref<2x!tpu.dma_semaphore, #tpu.memory_space<semaphore_mem>> -> memref<1x!tpu.dma_semaphore, #tpu.memory_space<semaphore_mem>>
    %125 = tpu.memref_squeeze %124 : memref<1x!tpu.dma_semaphore, #tpu.memory_space<semaphore_mem>> -> memref<!tpu.dma_semaphore, #tpu.memory_space<semaphore_mem>>
    tpu.enqueue_dma source(%121 : memref<16x384xbf16, #tpu.memory_space<any>>) target(%123 : memref<16x384xbf16, #tpu.memory_space<vmem>>) target_semaphore(%125 : memref<!tpu.dma_semaphore, #tpu.memory_space<semaphore_mem>>)
    %126 = arith.index_cast %110 : i32 to index
    %c0_57 = arith.constant 0 : index
    %c0_58 = arith.constant 0 : index
    %127 = vector.load %arg4[%126, %c0_57, %c0_58] : memref<2x16x384xbf16, #tpu.memory_space<vmem>>, vector<1x16x384xbf16>
    %128 = vector.shape_cast %127 : vector<1x16x384xbf16> to vector<16x384xbf16>
    %129 = arith.extf %128 : vector<16x384xbf16> to vector<16x384xf32>
    %cst_59 = arith.constant dense<0.000000e+00> : vector<16x384xf32>
    %130 = tpu.matmul %109, %0, %cst_59 {dimension_numbers = #tpu.dot_dimension_numbers<[1], [0], [0], [1], [0, 0, 1, 1], [], []>} : vector<16x128xbf16>, vector<128x384xbf16>, vector<16x384xf32> -> vector<16x384xf32>
    %131 = vector.extract_strided_slice %129 {offsets = [0, 0], sizes = [16, 128], strides = [1, 1]} : vector<16x384xf32> to vector<16x128xf32>
    %132 = vector.extract_strided_slice %130 {offsets = [0, 0], sizes = [16, 128], strides = [1, 1]} : vector<16x384xf32> to vector<16x128xf32>
    %133 = arith.addf %131, %132 : vector<16x128xf32>
    %134 = arith.negf %133 : vector<16x128xf32>
    %135 = math.exp %134 : vector<16x128xf32>
    %cst_60 = arith.constant 1.000000e+00 : f32
    %136 = vector.broadcast %cst_60 : f32 to vector<16x128xf32>
    %137 = arith.addf %136, %135 : vector<16x128xf32>
    %138 = arith.divf %136, %137 : vector<16x128xf32>
    %139 = vector.extract_strided_slice %129 {offsets = [0, 128], sizes = [16, 128], strides = [1, 1]} : vector<16x384xf32> to vector<16x128xf32>
    %140 = vector.extract_strided_slice %130 {offsets = [0, 128], sizes = [16, 128], strides = [1, 1]} : vector<16x384xf32> to vector<16x128xf32>
    %141 = arith.addf %139, %140 : vector<16x128xf32>
    %142 = arith.negf %141 : vector<16x128xf32>
    %143 = math.exp %142 : vector<16x128xf32>
    %cst_61 = arith.constant 1.000000e+00 : f32
    %144 = vector.broadcast %cst_61 : f32 to vector<16x128xf32>
    %145 = arith.addf %144, %143 : vector<16x128xf32>
    %146 = arith.divf %144, %145 : vector<16x128xf32>
    %147 = vector.extract_strided_slice %129 {offsets = [0, 256], sizes = [16, 128], strides = [1, 1]} : vector<16x384xf32> to vector<16x128xf32>
    %148 = vector.extract_strided_slice %130 {offsets = [0, 256], sizes = [16, 128], strides = [1, 1]} : vector<16x384xf32> to vector<16x128xf32>
    %149 = vector.broadcast %1 : vector<1x128xf32> to vector<16x128xf32>
    %150 = arith.addf %148, %149 : vector<16x128xf32>
    %151 = arith.mulf %138, %150 : vector<16x128xf32>
    %152 = arith.addf %147, %151 : vector<16x128xf32>
    %153 = math.tanh %152 : vector<16x128xf32>
    %cst_62 = arith.constant 1.000000e+00 : f32
    %154 = vector.broadcast %cst_62 : f32 to vector<16x128xf32>
    %155 = arith.subf %154, %146 : vector<16x128xf32>
    %156 = arith.mulf %155, %153 : vector<16x128xf32>
    %157 = arith.mulf %146, %108 : vector<16x128xf32>
    %158 = arith.addf %156, %157 : vector<16x128xf32>
    %159 = arith.truncf %158 : vector<16x128xf32> to vector<16x128xbf16>
    %c3_i32 = arith.constant 3 : i32
    %c1_i32_63 = arith.constant 1 : i32
    %160 = arith.andi %c3_i32, %c1_i32_63 : i32
    %c1_i32_64 = arith.constant 1 : i32
    %161 = arith.subi %c1_i32_64, %160 : i32
    %c0_i32_65 = arith.constant 0 : i32
    %c0_i32_66 = arith.constant 0 : i32
    %162 = tpu.memref_slice %arg0[%c3_i32, %c0_i32_65, %c0_i32_66] : memref<8x16x384xbf16, #tpu.memory_space<any>> -> memref<1x16x384xbf16, #tpu.memory_space<any>>
    %163 = tpu.memref_squeeze %162 : memref<1x16x384xbf16, #tpu.memory_space<any>> -> memref<16x384xbf16, #tpu.memory_space<any>>
    %c0_i32_67 = arith.constant 0 : i32
    %c0_i32_68 = arith.constant 0 : i32
    %164 = tpu.memref_slice %arg4[%160, %c0_i32_67, %c0_i32_68] : memref<2x16x384xbf16, #tpu.memory_space<vmem>> -> memref<1x16x384xbf16, #tpu.memory_space<vmem>>
    %165 = tpu.memref_squeeze %164 : memref<1x16x384xbf16, #tpu.memory_space<vmem>> -> memref<16x384xbf16, #tpu.memory_space<vmem>>
    %166 = tpu.memref_slice %arg5[%160] : memref<2x!tpu.dma_semaphore, #tpu.memory_space<semaphore_mem>> -> memref<1x!tpu.dma_semaphore, #tpu.memory_space<semaphore_mem>>
    %167 = tpu.memref_squeeze %166 : memref<1x!tpu.dma_semaphore, #tpu.memory_space<semaphore_mem>> -> memref<!tpu.dma_semaphore, #tpu.memory_space<semaphore_mem>>
    tpu.wait_dma2 semaphore(%167 : memref<!tpu.dma_semaphore, #tpu.memory_space<semaphore_mem>>) src(%163 : memref<16x384xbf16, #tpu.memory_space<any>>) dst(%165 : memref<16x384xbf16, #tpu.memory_space<vmem>>)
    %c1_i32_69 = arith.constant 1 : i32
    %168 = arith.addi %c3_i32, %c1_i32_69 : i32
    %c7_i32_70 = arith.constant 7 : i32
    %169 = arith.minsi %168, %c7_i32_70 : i32
    %c0_i32_71 = arith.constant 0 : i32
    %c0_i32_72 = arith.constant 0 : i32
    %170 = tpu.memref_slice %arg0[%169, %c0_i32_71, %c0_i32_72] : memref<8x16x384xbf16, #tpu.memory_space<any>> -> memref<1x16x384xbf16, #tpu.memory_space<any>>
    %171 = tpu.memref_squeeze %170 : memref<1x16x384xbf16, #tpu.memory_space<any>> -> memref<16x384xbf16, #tpu.memory_space<any>>
    %c0_i32_73 = arith.constant 0 : i32
    %c0_i32_74 = arith.constant 0 : i32
    %172 = tpu.memref_slice %arg4[%161, %c0_i32_73, %c0_i32_74] : memref<2x16x384xbf16, #tpu.memory_space<vmem>> -> memref<1x16x384xbf16, #tpu.memory_space<vmem>>
    %173 = tpu.memref_squeeze %172 : memref<1x16x384xbf16, #tpu.memory_space<vmem>> -> memref<16x384xbf16, #tpu.memory_space<vmem>>
    %174 = tpu.memref_slice %arg5[%161] : memref<2x!tpu.dma_semaphore, #tpu.memory_space<semaphore_mem>> -> memref<1x!tpu.dma_semaphore, #tpu.memory_space<semaphore_mem>>
    %175 = tpu.memref_squeeze %174 : memref<1x!tpu.dma_semaphore, #tpu.memory_space<semaphore_mem>> -> memref<!tpu.dma_semaphore, #tpu.memory_space<semaphore_mem>>
    tpu.enqueue_dma source(%171 : memref<16x384xbf16, #tpu.memory_space<any>>) target(%173 : memref<16x384xbf16, #tpu.memory_space<vmem>>) target_semaphore(%175 : memref<!tpu.dma_semaphore, #tpu.memory_space<semaphore_mem>>)
    %176 = arith.index_cast %160 : i32 to index
    %c0_75 = arith.constant 0 : index
    %c0_76 = arith.constant 0 : index
    %177 = vector.load %arg4[%176, %c0_75, %c0_76] : memref<2x16x384xbf16, #tpu.memory_space<vmem>>, vector<1x16x384xbf16>
    %178 = vector.shape_cast %177 : vector<1x16x384xbf16> to vector<16x384xbf16>
    %179 = arith.extf %178 : vector<16x384xbf16> to vector<16x384xf32>
    %cst_77 = arith.constant dense<0.000000e+00> : vector<16x384xf32>
    %180 = tpu.matmul %159, %0, %cst_77 {dimension_numbers = #tpu.dot_dimension_numbers<[1], [0], [0], [1], [0, 0, 1, 1], [], []>} : vector<16x128xbf16>, vector<128x384xbf16>, vector<16x384xf32> -> vector<16x384xf32>
    %181 = vector.extract_strided_slice %179 {offsets = [0, 0], sizes = [16, 128], strides = [1, 1]} : vector<16x384xf32> to vector<16x128xf32>
    %182 = vector.extract_strided_slice %180 {offsets = [0, 0], sizes = [16, 128], strides = [1, 1]} : vector<16x384xf32> to vector<16x128xf32>
    %183 = arith.addf %181, %182 : vector<16x128xf32>
    %184 = arith.negf %183 : vector<16x128xf32>
    %185 = math.exp %184 : vector<16x128xf32>
    %cst_78 = arith.constant 1.000000e+00 : f32
    %186 = vector.broadcast %cst_78 : f32 to vector<16x128xf32>
    %187 = arith.addf %186, %185 : vector<16x128xf32>
    %188 = arith.divf %186, %187 : vector<16x128xf32>
    %189 = vector.extract_strided_slice %179 {offsets = [0, 128], sizes = [16, 128], strides = [1, 1]} : vector<16x384xf32> to vector<16x128xf32>
    %190 = vector.extract_strided_slice %180 {offsets = [0, 128], sizes = [16, 128], strides = [1, 1]} : vector<16x384xf32> to vector<16x128xf32>
    %191 = arith.addf %189, %190 : vector<16x128xf32>
    %192 = arith.negf %191 : vector<16x128xf32>
    %193 = math.exp %192 : vector<16x128xf32>
    %cst_79 = arith.constant 1.000000e+00 : f32
    %194 = vector.broadcast %cst_79 : f32 to vector<16x128xf32>
    %195 = arith.addf %194, %193 : vector<16x128xf32>
    %196 = arith.divf %194, %195 : vector<16x128xf32>
    %197 = vector.extract_strided_slice %179 {offsets = [0, 256], sizes = [16, 128], strides = [1, 1]} : vector<16x384xf32> to vector<16x128xf32>
    %198 = vector.extract_strided_slice %180 {offsets = [0, 256], sizes = [16, 128], strides = [1, 1]} : vector<16x384xf32> to vector<16x128xf32>
    %199 = vector.broadcast %1 : vector<1x128xf32> to vector<16x128xf32>
    %200 = arith.addf %198, %199 : vector<16x128xf32>
    %201 = arith.mulf %188, %200 : vector<16x128xf32>
    %202 = arith.addf %197, %201 : vector<16x128xf32>
    %203 = math.tanh %202 : vector<16x128xf32>
    %cst_80 = arith.constant 1.000000e+00 : f32
    %204 = vector.broadcast %cst_80 : f32 to vector<16x128xf32>
    %205 = arith.subf %204, %196 : vector<16x128xf32>
    %206 = arith.mulf %205, %203 : vector<16x128xf32>
    %207 = arith.mulf %196, %158 : vector<16x128xf32>
    %208 = arith.addf %206, %207 : vector<16x128xf32>
    %209 = arith.truncf %208 : vector<16x128xf32> to vector<16x128xbf16>
    %c4_i32 = arith.constant 4 : i32
    %c1_i32_81 = arith.constant 1 : i32
    %210 = arith.andi %c4_i32, %c1_i32_81 : i32
    %c1_i32_82 = arith.constant 1 : i32
    %211 = arith.subi %c1_i32_82, %210 : i32
    %c0_i32_83 = arith.constant 0 : i32
    %c0_i32_84 = arith.constant 0 : i32
    %212 = tpu.memref_slice %arg0[%c4_i32, %c0_i32_83, %c0_i32_84] : memref<8x16x384xbf16, #tpu.memory_space<any>> -> memref<1x16x384xbf16, #tpu.memory_space<any>>
    %213 = tpu.memref_squeeze %212 : memref<1x16x384xbf16, #tpu.memory_space<any>> -> memref<16x384xbf16, #tpu.memory_space<any>>
    %c0_i32_85 = arith.constant 0 : i32
    %c0_i32_86 = arith.constant 0 : i32
    %214 = tpu.memref_slice %arg4[%210, %c0_i32_85, %c0_i32_86] : memref<2x16x384xbf16, #tpu.memory_space<vmem>> -> memref<1x16x384xbf16, #tpu.memory_space<vmem>>
    %215 = tpu.memref_squeeze %214 : memref<1x16x384xbf16, #tpu.memory_space<vmem>> -> memref<16x384xbf16, #tpu.memory_space<vmem>>
    %216 = tpu.memref_slice %arg5[%210] : memref<2x!tpu.dma_semaphore, #tpu.memory_space<semaphore_mem>> -> memref<1x!tpu.dma_semaphore, #tpu.memory_space<semaphore_mem>>
    %217 = tpu.memref_squeeze %216 : memref<1x!tpu.dma_semaphore, #tpu.memory_space<semaphore_mem>> -> memref<!tpu.dma_semaphore, #tpu.memory_space<semaphore_mem>>
    tpu.wait_dma2 semaphore(%217 : memref<!tpu.dma_semaphore, #tpu.memory_space<semaphore_mem>>) src(%213 : memref<16x384xbf16, #tpu.memory_space<any>>) dst(%215 : memref<16x384xbf16, #tpu.memory_space<vmem>>)
    %c1_i32_87 = arith.constant 1 : i32
    %218 = arith.addi %c4_i32, %c1_i32_87 : i32
    %c7_i32_88 = arith.constant 7 : i32
    %219 = arith.minsi %218, %c7_i32_88 : i32
    %c0_i32_89 = arith.constant 0 : i32
    %c0_i32_90 = arith.constant 0 : i32
    %220 = tpu.memref_slice %arg0[%219, %c0_i32_89, %c0_i32_90] : memref<8x16x384xbf16, #tpu.memory_space<any>> -> memref<1x16x384xbf16, #tpu.memory_space<any>>
    %221 = tpu.memref_squeeze %220 : memref<1x16x384xbf16, #tpu.memory_space<any>> -> memref<16x384xbf16, #tpu.memory_space<any>>
    %c0_i32_91 = arith.constant 0 : i32
    %c0_i32_92 = arith.constant 0 : i32
    %222 = tpu.memref_slice %arg4[%211, %c0_i32_91, %c0_i32_92] : memref<2x16x384xbf16, #tpu.memory_space<vmem>> -> memref<1x16x384xbf16, #tpu.memory_space<vmem>>
    %223 = tpu.memref_squeeze %222 : memref<1x16x384xbf16, #tpu.memory_space<vmem>> -> memref<16x384xbf16, #tpu.memory_space<vmem>>
    %224 = tpu.memref_slice %arg5[%211] : memref<2x!tpu.dma_semaphore, #tpu.memory_space<semaphore_mem>> -> memref<1x!tpu.dma_semaphore, #tpu.memory_space<semaphore_mem>>
    %225 = tpu.memref_squeeze %224 : memref<1x!tpu.dma_semaphore, #tpu.memory_space<semaphore_mem>> -> memref<!tpu.dma_semaphore, #tpu.memory_space<semaphore_mem>>
    tpu.enqueue_dma source(%221 : memref<16x384xbf16, #tpu.memory_space<any>>) target(%223 : memref<16x384xbf16, #tpu.memory_space<vmem>>) target_semaphore(%225 : memref<!tpu.dma_semaphore, #tpu.memory_space<semaphore_mem>>)
    %226 = arith.index_cast %210 : i32 to index
    %c0_93 = arith.constant 0 : index
    %c0_94 = arith.constant 0 : index
    %227 = vector.load %arg4[%226, %c0_93, %c0_94] : memref<2x16x384xbf16, #tpu.memory_space<vmem>>, vector<1x16x384xbf16>
    %228 = vector.shape_cast %227 : vector<1x16x384xbf16> to vector<16x384xbf16>
    %229 = arith.extf %228 : vector<16x384xbf16> to vector<16x384xf32>
    %cst_95 = arith.constant dense<0.000000e+00> : vector<16x384xf32>
    %230 = tpu.matmul %209, %0, %cst_95 {dimension_numbers = #tpu.dot_dimension_numbers<[1], [0], [0], [1], [0, 0, 1, 1], [], []>} : vector<16x128xbf16>, vector<128x384xbf16>, vector<16x384xf32> -> vector<16x384xf32>
    %231 = vector.extract_strided_slice %229 {offsets = [0, 0], sizes = [16, 128], strides = [1, 1]} : vector<16x384xf32> to vector<16x128xf32>
    %232 = vector.extract_strided_slice %230 {offsets = [0, 0], sizes = [16, 128], strides = [1, 1]} : vector<16x384xf32> to vector<16x128xf32>
    %233 = arith.addf %231, %232 : vector<16x128xf32>
    %234 = arith.negf %233 : vector<16x128xf32>
    %235 = math.exp %234 : vector<16x128xf32>
    %cst_96 = arith.constant 1.000000e+00 : f32
    %236 = vector.broadcast %cst_96 : f32 to vector<16x128xf32>
    %237 = arith.addf %236, %235 : vector<16x128xf32>
    %238 = arith.divf %236, %237 : vector<16x128xf32>
    %239 = vector.extract_strided_slice %229 {offsets = [0, 128], sizes = [16, 128], strides = [1, 1]} : vector<16x384xf32> to vector<16x128xf32>
    %240 = vector.extract_strided_slice %230 {offsets = [0, 128], sizes = [16, 128], strides = [1, 1]} : vector<16x384xf32> to vector<16x128xf32>
    %241 = arith.addf %239, %240 : vector<16x128xf32>
    %242 = arith.negf %241 : vector<16x128xf32>
    %243 = math.exp %242 : vector<16x128xf32>
    %cst_97 = arith.constant 1.000000e+00 : f32
    %244 = vector.broadcast %cst_97 : f32 to vector<16x128xf32>
    %245 = arith.addf %244, %243 : vector<16x128xf32>
    %246 = arith.divf %244, %245 : vector<16x128xf32>
    %247 = vector.extract_strided_slice %229 {offsets = [0, 256], sizes = [16, 128], strides = [1, 1]} : vector<16x384xf32> to vector<16x128xf32>
    %248 = vector.extract_strided_slice %230 {offsets = [0, 256], sizes = [16, 128], strides = [1, 1]} : vector<16x384xf32> to vector<16x128xf32>
    %249 = vector.broadcast %1 : vector<1x128xf32> to vector<16x128xf32>
    %250 = arith.addf %248, %249 : vector<16x128xf32>
    %251 = arith.mulf %238, %250 : vector<16x128xf32>
    %252 = arith.addf %247, %251 : vector<16x128xf32>
    %253 = math.tanh %252 : vector<16x128xf32>
    %cst_98 = arith.constant 1.000000e+00 : f32
    %254 = vector.broadcast %cst_98 : f32 to vector<16x128xf32>
    %255 = arith.subf %254, %246 : vector<16x128xf32>
    %256 = arith.mulf %255, %253 : vector<16x128xf32>
    %257 = arith.mulf %246, %208 : vector<16x128xf32>
    %258 = arith.addf %256, %257 : vector<16x128xf32>
    %259 = arith.truncf %258 : vector<16x128xf32> to vector<16x128xbf16>
    %c5_i32 = arith.constant 5 : i32
    %c1_i32_99 = arith.constant 1 : i32
    %260 = arith.andi %c5_i32, %c1_i32_99 : i32
    %c1_i32_100 = arith.constant 1 : i32
    %261 = arith.subi %c1_i32_100, %260 : i32
    %c0_i32_101 = arith.constant 0 : i32
    %c0_i32_102 = arith.constant 0 : i32
    %262 = tpu.memref_slice %arg0[%c5_i32, %c0_i32_101, %c0_i32_102] : memref<8x16x384xbf16, #tpu.memory_space<any>> -> memref<1x16x384xbf16, #tpu.memory_space<any>>
    %263 = tpu.memref_squeeze %262 : memref<1x16x384xbf16, #tpu.memory_space<any>> -> memref<16x384xbf16, #tpu.memory_space<any>>
    %c0_i32_103 = arith.constant 0 : i32
    %c0_i32_104 = arith.constant 0 : i32
    %264 = tpu.memref_slice %arg4[%260, %c0_i32_103, %c0_i32_104] : memref<2x16x384xbf16, #tpu.memory_space<vmem>> -> memref<1x16x384xbf16, #tpu.memory_space<vmem>>
    %265 = tpu.memref_squeeze %264 : memref<1x16x384xbf16, #tpu.memory_space<vmem>> -> memref<16x384xbf16, #tpu.memory_space<vmem>>
    %266 = tpu.memref_slice %arg5[%260] : memref<2x!tpu.dma_semaphore, #tpu.memory_space<semaphore_mem>> -> memref<1x!tpu.dma_semaphore, #tpu.memory_space<semaphore_mem>>
    %267 = tpu.memref_squeeze %266 : memref<1x!tpu.dma_semaphore, #tpu.memory_space<semaphore_mem>> -> memref<!tpu.dma_semaphore, #tpu.memory_space<semaphore_mem>>
    tpu.wait_dma2 semaphore(%267 : memref<!tpu.dma_semaphore, #tpu.memory_space<semaphore_mem>>) src(%263 : memref<16x384xbf16, #tpu.memory_space<any>>) dst(%265 : memref<16x384xbf16, #tpu.memory_space<vmem>>)
    %c1_i32_105 = arith.constant 1 : i32
    %268 = arith.addi %c5_i32, %c1_i32_105 : i32
    %c7_i32_106 = arith.constant 7 : i32
    %269 = arith.minsi %268, %c7_i32_106 : i32
    %c0_i32_107 = arith.constant 0 : i32
    %c0_i32_108 = arith.constant 0 : i32
    %270 = tpu.memref_slice %arg0[%269, %c0_i32_107, %c0_i32_108] : memref<8x16x384xbf16, #tpu.memory_space<any>> -> memref<1x16x384xbf16, #tpu.memory_space<any>>
    %271 = tpu.memref_squeeze %270 : memref<1x16x384xbf16, #tpu.memory_space<any>> -> memref<16x384xbf16, #tpu.memory_space<any>>
    %c0_i32_109 = arith.constant 0 : i32
    %c0_i32_110 = arith.constant 0 : i32
    %272 = tpu.memref_slice %arg4[%261, %c0_i32_109, %c0_i32_110] : memref<2x16x384xbf16, #tpu.memory_space<vmem>> -> memref<1x16x384xbf16, #tpu.memory_space<vmem>>
    %273 = tpu.memref_squeeze %272 : memref<1x16x384xbf16, #tpu.memory_space<vmem>> -> memref<16x384xbf16, #tpu.memory_space<vmem>>
    %274 = tpu.memref_slice %arg5[%261] : memref<2x!tpu.dma_semaphore, #tpu.memory_space<semaphore_mem>> -> memref<1x!tpu.dma_semaphore, #tpu.memory_space<semaphore_mem>>
    %275 = tpu.memref_squeeze %274 : memref<1x!tpu.dma_semaphore, #tpu.memory_space<semaphore_mem>> -> memref<!tpu.dma_semaphore, #tpu.memory_space<semaphore_mem>>
    tpu.enqueue_dma source(%271 : memref<16x384xbf16, #tpu.memory_space<any>>) target(%273 : memref<16x384xbf16, #tpu.memory_space<vmem>>) target_semaphore(%275 : memref<!tpu.dma_semaphore, #tpu.memory_space<semaphore_mem>>)
    %276 = arith.index_cast %260 : i32 to index
    %c0_111 = arith.constant 0 : index
    %c0_112 = arith.constant 0 : index
    %277 = vector.load %arg4[%276, %c0_111, %c0_112] : memref<2x16x384xbf16, #tpu.memory_space<vmem>>, vector<1x16x384xbf16>
    %278 = vector.shape_cast %277 : vector<1x16x384xbf16> to vector<16x384xbf16>
    %279 = arith.extf %278 : vector<16x384xbf16> to vector<16x384xf32>
    %cst_113 = arith.constant dense<0.000000e+00> : vector<16x384xf32>
    %280 = tpu.matmul %259, %0, %cst_113 {dimension_numbers = #tpu.dot_dimension_numbers<[1], [0], [0], [1], [0, 0, 1, 1], [], []>} : vector<16x128xbf16>, vector<128x384xbf16>, vector<16x384xf32> -> vector<16x384xf32>
    %281 = vector.extract_strided_slice %279 {offsets = [0, 0], sizes = [16, 128], strides = [1, 1]} : vector<16x384xf32> to vector<16x128xf32>
    %282 = vector.extract_strided_slice %280 {offsets = [0, 0], sizes = [16, 128], strides = [1, 1]} : vector<16x384xf32> to vector<16x128xf32>
    %283 = arith.addf %281, %282 : vector<16x128xf32>
    %284 = arith.negf %283 : vector<16x128xf32>
    %285 = math.exp %284 : vector<16x128xf32>
    %cst_114 = arith.constant 1.000000e+00 : f32
    %286 = vector.broadcast %cst_114 : f32 to vector<16x128xf32>
    %287 = arith.addf %286, %285 : vector<16x128xf32>
    %288 = arith.divf %286, %287 : vector<16x128xf32>
    %289 = vector.extract_strided_slice %279 {offsets = [0, 128], sizes = [16, 128], strides = [1, 1]} : vector<16x384xf32> to vector<16x128xf32>
    %290 = vector.extract_strided_slice %280 {offsets = [0, 128], sizes = [16, 128], strides = [1, 1]} : vector<16x384xf32> to vector<16x128xf32>
    %291 = arith.addf %289, %290 : vector<16x128xf32>
    %292 = arith.negf %291 : vector<16x128xf32>
    %293 = math.exp %292 : vector<16x128xf32>
    %cst_115 = arith.constant 1.000000e+00 : f32
    %294 = vector.broadcast %cst_115 : f32 to vector<16x128xf32>
    %295 = arith.addf %294, %293 : vector<16x128xf32>
    %296 = arith.divf %294, %295 : vector<16x128xf32>
    %297 = vector.extract_strided_slice %279 {offsets = [0, 256], sizes = [16, 128], strides = [1, 1]} : vector<16x384xf32> to vector<16x128xf32>
    %298 = vector.extract_strided_slice %280 {offsets = [0, 256], sizes = [16, 128], strides = [1, 1]} : vector<16x384xf32> to vector<16x128xf32>
    %299 = vector.broadcast %1 : vector<1x128xf32> to vector<16x128xf32>
    %300 = arith.addf %298, %299 : vector<16x128xf32>
    %301 = arith.mulf %288, %300 : vector<16x128xf32>
    %302 = arith.addf %297, %301 : vector<16x128xf32>
    %303 = math.tanh %302 : vector<16x128xf32>
    %cst_116 = arith.constant 1.000000e+00 : f32
    %304 = vector.broadcast %cst_116 : f32 to vector<16x128xf32>
    %305 = arith.subf %304, %296 : vector<16x128xf32>
    %306 = arith.mulf %305, %303 : vector<16x128xf32>
    %307 = arith.mulf %296, %258 : vector<16x128xf32>
    %308 = arith.addf %306, %307 : vector<16x128xf32>
    %309 = arith.truncf %308 : vector<16x128xf32> to vector<16x128xbf16>
    %c6_i32 = arith.constant 6 : i32
    %c1_i32_117 = arith.constant 1 : i32
    %310 = arith.andi %c6_i32, %c1_i32_117 : i32
    %c1_i32_118 = arith.constant 1 : i32
    %311 = arith.subi %c1_i32_118, %310 : i32
    %c0_i32_119 = arith.constant 0 : i32
    %c0_i32_120 = arith.constant 0 : i32
    %312 = tpu.memref_slice %arg0[%c6_i32, %c0_i32_119, %c0_i32_120] : memref<8x16x384xbf16, #tpu.memory_space<any>> -> memref<1x16x384xbf16, #tpu.memory_space<any>>
    %313 = tpu.memref_squeeze %312 : memref<1x16x384xbf16, #tpu.memory_space<any>> -> memref<16x384xbf16, #tpu.memory_space<any>>
    %c0_i32_121 = arith.constant 0 : i32
    %c0_i32_122 = arith.constant 0 : i32
    %314 = tpu.memref_slice %arg4[%310, %c0_i32_121, %c0_i32_122] : memref<2x16x384xbf16, #tpu.memory_space<vmem>> -> memref<1x16x384xbf16, #tpu.memory_space<vmem>>
    %315 = tpu.memref_squeeze %314 : memref<1x16x384xbf16, #tpu.memory_space<vmem>> -> memref<16x384xbf16, #tpu.memory_space<vmem>>
    %316 = tpu.memref_slice %arg5[%310] : memref<2x!tpu.dma_semaphore, #tpu.memory_space<semaphore_mem>> -> memref<1x!tpu.dma_semaphore, #tpu.memory_space<semaphore_mem>>
    %317 = tpu.memref_squeeze %316 : memref<1x!tpu.dma_semaphore, #tpu.memory_space<semaphore_mem>> -> memref<!tpu.dma_semaphore, #tpu.memory_space<semaphore_mem>>
    tpu.wait_dma2 semaphore(%317 : memref<!tpu.dma_semaphore, #tpu.memory_space<semaphore_mem>>) src(%313 : memref<16x384xbf16, #tpu.memory_space<any>>) dst(%315 : memref<16x384xbf16, #tpu.memory_space<vmem>>)
    %c1_i32_123 = arith.constant 1 : i32
    %318 = arith.addi %c6_i32, %c1_i32_123 : i32
    %c7_i32_124 = arith.constant 7 : i32
    %319 = arith.minsi %318, %c7_i32_124 : i32
    %c0_i32_125 = arith.constant 0 : i32
    %c0_i32_126 = arith.constant 0 : i32
    %320 = tpu.memref_slice %arg0[%319, %c0_i32_125, %c0_i32_126] : memref<8x16x384xbf16, #tpu.memory_space<any>> -> memref<1x16x384xbf16, #tpu.memory_space<any>>
    %321 = tpu.memref_squeeze %320 : memref<1x16x384xbf16, #tpu.memory_space<any>> -> memref<16x384xbf16, #tpu.memory_space<any>>
    %c0_i32_127 = arith.constant 0 : i32
    %c0_i32_128 = arith.constant 0 : i32
    %322 = tpu.memref_slice %arg4[%311, %c0_i32_127, %c0_i32_128] : memref<2x16x384xbf16, #tpu.memory_space<vmem>> -> memref<1x16x384xbf16, #tpu.memory_space<vmem>>
    %323 = tpu.memref_squeeze %322 : memref<1x16x384xbf16, #tpu.memory_space<vmem>> -> memref<16x384xbf16, #tpu.memory_space<vmem>>
    %324 = tpu.memref_slice %arg5[%311] : memref<2x!tpu.dma_semaphore, #tpu.memory_space<semaphore_mem>> -> memref<1x!tpu.dma_semaphore, #tpu.memory_space<semaphore_mem>>
    %325 = tpu.memref_squeeze %324 : memref<1x!tpu.dma_semaphore, #tpu.memory_space<semaphore_mem>> -> memref<!tpu.dma_semaphore, #tpu.memory_space<semaphore_mem>>
    tpu.enqueue_dma source(%321 : memref<16x384xbf16, #tpu.memory_space<any>>) target(%323 : memref<16x384xbf16, #tpu.memory_space<vmem>>) target_semaphore(%325 : memref<!tpu.dma_semaphore, #tpu.memory_space<semaphore_mem>>)
    %326 = arith.index_cast %310 : i32 to index
    %c0_129 = arith.constant 0 : index
    %c0_130 = arith.constant 0 : index
    %327 = vector.load %arg4[%326, %c0_129, %c0_130] : memref<2x16x384xbf16, #tpu.memory_space<vmem>>, vector<1x16x384xbf16>
    %328 = vector.shape_cast %327 : vector<1x16x384xbf16> to vector<16x384xbf16>
    %329 = arith.extf %328 : vector<16x384xbf16> to vector<16x384xf32>
    %cst_131 = arith.constant dense<0.000000e+00> : vector<16x384xf32>
    %330 = tpu.matmul %309, %0, %cst_131 {dimension_numbers = #tpu.dot_dimension_numbers<[1], [0], [0], [1], [0, 0, 1, 1], [], []>} : vector<16x128xbf16>, vector<128x384xbf16>, vector<16x384xf32> -> vector<16x384xf32>
    %331 = vector.extract_strided_slice %329 {offsets = [0, 0], sizes = [16, 128], strides = [1, 1]} : vector<16x384xf32> to vector<16x128xf32>
    %332 = vector.extract_strided_slice %330 {offsets = [0, 0], sizes = [16, 128], strides = [1, 1]} : vector<16x384xf32> to vector<16x128xf32>
    %333 = arith.addf %331, %332 : vector<16x128xf32>
    %334 = arith.negf %333 : vector<16x128xf32>
    %335 = math.exp %334 : vector<16x128xf32>
    %cst_132 = arith.constant 1.000000e+00 : f32
    %336 = vector.broadcast %cst_132 : f32 to vector<16x128xf32>
    %337 = arith.addf %336, %335 : vector<16x128xf32>
    %338 = arith.divf %336, %337 : vector<16x128xf32>
    %339 = vector.extract_strided_slice %329 {offsets = [0, 128], sizes = [16, 128], strides = [1, 1]} : vector<16x384xf32> to vector<16x128xf32>
    %340 = vector.extract_strided_slice %330 {offsets = [0, 128], sizes = [16, 128], strides = [1, 1]} : vector<16x384xf32> to vector<16x128xf32>
    %341 = arith.addf %339, %340 : vector<16x128xf32>
    %342 = arith.negf %341 : vector<16x128xf32>
    %343 = math.exp %342 : vector<16x128xf32>
    %cst_133 = arith.constant 1.000000e+00 : f32
    %344 = vector.broadcast %cst_133 : f32 to vector<16x128xf32>
    %345 = arith.addf %344, %343 : vector<16x128xf32>
    %346 = arith.divf %344, %345 : vector<16x128xf32>
    %347 = vector.extract_strided_slice %329 {offsets = [0, 256], sizes = [16, 128], strides = [1, 1]} : vector<16x384xf32> to vector<16x128xf32>
    %348 = vector.extract_strided_slice %330 {offsets = [0, 256], sizes = [16, 128], strides = [1, 1]} : vector<16x384xf32> to vector<16x128xf32>
    %349 = vector.broadcast %1 : vector<1x128xf32> to vector<16x128xf32>
    %350 = arith.addf %348, %349 : vector<16x128xf32>
    %351 = arith.mulf %338, %350 : vector<16x128xf32>
    %352 = arith.addf %347, %351 : vector<16x128xf32>
    %353 = math.tanh %352 : vector<16x128xf32>
    %cst_134 = arith.constant 1.000000e+00 : f32
    %354 = vector.broadcast %cst_134 : f32 to vector<16x128xf32>
    %355 = arith.subf %354, %346 : vector<16x128xf32>
    %356 = arith.mulf %355, %353 : vector<16x128xf32>
    %357 = arith.mulf %346, %308 : vector<16x128xf32>
    %358 = arith.addf %356, %357 : vector<16x128xf32>
    %359 = arith.truncf %358 : vector<16x128xf32> to vector<16x128xbf16>
    %c7_i32_135 = arith.constant 7 : i32
    %c1_i32_136 = arith.constant 1 : i32
    %360 = arith.andi %c7_i32_135, %c1_i32_136 : i32
    %c1_i32_137 = arith.constant 1 : i32
    %361 = arith.subi %c1_i32_137, %360 : i32
    %c0_i32_138 = arith.constant 0 : i32
    %c0_i32_139 = arith.constant 0 : i32
    %362 = tpu.memref_slice %arg0[%c7_i32_135, %c0_i32_138, %c0_i32_139] : memref<8x16x384xbf16, #tpu.memory_space<any>> -> memref<1x16x384xbf16, #tpu.memory_space<any>>
    %363 = tpu.memref_squeeze %362 : memref<1x16x384xbf16, #tpu.memory_space<any>> -> memref<16x384xbf16, #tpu.memory_space<any>>
    %c0_i32_140 = arith.constant 0 : i32
    %c0_i32_141 = arith.constant 0 : i32
    %364 = tpu.memref_slice %arg4[%360, %c0_i32_140, %c0_i32_141] : memref<2x16x384xbf16, #tpu.memory_space<vmem>> -> memref<1x16x384xbf16, #tpu.memory_space<vmem>>
    %365 = tpu.memref_squeeze %364 : memref<1x16x384xbf16, #tpu.memory_space<vmem>> -> memref<16x384xbf16, #tpu.memory_space<vmem>>
    %366 = tpu.memref_slice %arg5[%360] : memref<2x!tpu.dma_semaphore, #tpu.memory_space<semaphore_mem>> -> memref<1x!tpu.dma_semaphore, #tpu.memory_space<semaphore_mem>>
    %367 = tpu.memref_squeeze %366 : memref<1x!tpu.dma_semaphore, #tpu.memory_space<semaphore_mem>> -> memref<!tpu.dma_semaphore, #tpu.memory_space<semaphore_mem>>
    tpu.wait_dma2 semaphore(%367 : memref<!tpu.dma_semaphore, #tpu.memory_space<semaphore_mem>>) src(%363 : memref<16x384xbf16, #tpu.memory_space<any>>) dst(%365 : memref<16x384xbf16, #tpu.memory_space<vmem>>)
    %c1_i32_142 = arith.constant 1 : i32
    %368 = arith.addi %c7_i32_135, %c1_i32_142 : i32
    %c7_i32_143 = arith.constant 7 : i32
    %369 = arith.minsi %368, %c7_i32_143 : i32
    %c0_i32_144 = arith.constant 0 : i32
    %c0_i32_145 = arith.constant 0 : i32
    %370 = tpu.memref_slice %arg0[%369, %c0_i32_144, %c0_i32_145] : memref<8x16x384xbf16, #tpu.memory_space<any>> -> memref<1x16x384xbf16, #tpu.memory_space<any>>
    %371 = tpu.memref_squeeze %370 : memref<1x16x384xbf16, #tpu.memory_space<any>> -> memref<16x384xbf16, #tpu.memory_space<any>>
    %c0_i32_146 = arith.constant 0 : i32
    %c0_i32_147 = arith.constant 0 : i32
    %372 = tpu.memref_slice %arg4[%361, %c0_i32_146, %c0_i32_147] : memref<2x16x384xbf16, #tpu.memory_space<vmem>> -> memref<1x16x384xbf16, #tpu.memory_space<vmem>>
    %373 = tpu.memref_squeeze %372 : memref<1x16x384xbf16, #tpu.memory_space<vmem>> -> memref<16x384xbf16, #tpu.memory_space<vmem>>
    %374 = tpu.memref_slice %arg5[%361] : memref<2x!tpu.dma_semaphore, #tpu.memory_space<semaphore_mem>> -> memref<1x!tpu.dma_semaphore, #tpu.memory_space<semaphore_mem>>
    %375 = tpu.memref_squeeze %374 : memref<1x!tpu.dma_semaphore, #tpu.memory_space<semaphore_mem>> -> memref<!tpu.dma_semaphore, #tpu.memory_space<semaphore_mem>>
    tpu.enqueue_dma source(%371 : memref<16x384xbf16, #tpu.memory_space<any>>) target(%373 : memref<16x384xbf16, #tpu.memory_space<vmem>>) target_semaphore(%375 : memref<!tpu.dma_semaphore, #tpu.memory_space<semaphore_mem>>)
    %376 = arith.index_cast %360 : i32 to index
    %c0_148 = arith.constant 0 : index
    %c0_149 = arith.constant 0 : index
    %377 = vector.load %arg4[%376, %c0_148, %c0_149] : memref<2x16x384xbf16, #tpu.memory_space<vmem>>, vector<1x16x384xbf16>
    %378 = vector.shape_cast %377 : vector<1x16x384xbf16> to vector<16x384xbf16>
    %379 = arith.extf %378 : vector<16x384xbf16> to vector<16x384xf32>
    %cst_150 = arith.constant dense<0.000000e+00> : vector<16x384xf32>
    %380 = tpu.matmul %359, %0, %cst_150 {dimension_numbers = #tpu.dot_dimension_numbers<[1], [0], [0], [1], [0, 0, 1, 1], [], []>} : vector<16x128xbf16>, vector<128x384xbf16>, vector<16x384xf32> -> vector<16x384xf32>
    %381 = vector.extract_strided_slice %379 {offsets = [0, 0], sizes = [16, 128], strides = [1, 1]} : vector<16x384xf32> to vector<16x128xf32>
    %382 = vector.extract_strided_slice %380 {offsets = [0, 0], sizes = [16, 128], strides = [1, 1]} : vector<16x384xf32> to vector<16x128xf32>
    %383 = arith.addf %381, %382 : vector<16x128xf32>
    %384 = arith.negf %383 : vector<16x128xf32>
    %385 = math.exp %384 : vector<16x128xf32>
    %cst_151 = arith.constant 1.000000e+00 : f32
    %386 = vector.broadcast %cst_151 : f32 to vector<16x128xf32>
    %387 = arith.addf %386, %385 : vector<16x128xf32>
    %388 = arith.divf %386, %387 : vector<16x128xf32>
    %389 = vector.extract_strided_slice %379 {offsets = [0, 128], sizes = [16, 128], strides = [1, 1]} : vector<16x384xf32> to vector<16x128xf32>
    %390 = vector.extract_strided_slice %380 {offsets = [0, 128], sizes = [16, 128], strides = [1, 1]} : vector<16x384xf32> to vector<16x128xf32>
    %391 = arith.addf %389, %390 : vector<16x128xf32>
    %392 = arith.negf %391 : vector<16x128xf32>
    %393 = math.exp %392 : vector<16x128xf32>
    %cst_152 = arith.constant 1.000000e+00 : f32
    %394 = vector.broadcast %cst_152 : f32 to vector<16x128xf32>
    %395 = arith.addf %394, %393 : vector<16x128xf32>
    %396 = arith.divf %394, %395 : vector<16x128xf32>
    %397 = vector.extract_strided_slice %379 {offsets = [0, 256], sizes = [16, 128], strides = [1, 1]} : vector<16x384xf32> to vector<16x128xf32>
    %398 = vector.extract_strided_slice %380 {offsets = [0, 256], sizes = [16, 128], strides = [1, 1]} : vector<16x384xf32> to vector<16x128xf32>
    %399 = vector.broadcast %1 : vector<1x128xf32> to vector<16x128xf32>
    %400 = arith.addf %398, %399 : vector<16x128xf32>
    %401 = arith.mulf %388, %400 : vector<16x128xf32>
    %402 = arith.addf %397, %401 : vector<16x128xf32>
    %403 = math.tanh %402 : vector<16x128xf32>
    %cst_153 = arith.constant 1.000000e+00 : f32
    %404 = vector.broadcast %cst_153 : f32 to vector<16x128xf32>
    %405 = arith.subf %404, %396 : vector<16x128xf32>
    %406 = arith.mulf %405, %403 : vector<16x128xf32>
    %407 = arith.mulf %396, %358 : vector<16x128xf32>
    %408 = arith.addf %406, %407 : vector<16x128xf32>
    %409 = arith.truncf %408 : vector<16x128xf32> to vector<16x128xbf16>
    %c8_i32 = arith.constant 8 : i32
    %c7_i32_154 = arith.constant 7 : i32
    %c0_i32_155 = arith.constant 0 : i32
    %c0_i32_156 = arith.constant 0 : i32
    %c0_i32_157 = arith.constant 0 : i32
    %c0_i32_158 = arith.constant 0 : i32
    %410 = tpu.memref_slice %arg0[%c7_i32_154, %c0_i32_157, %c0_i32_158] : memref<8x16x384xbf16, #tpu.memory_space<any>> -> memref<1x16x384xbf16, #tpu.memory_space<any>>
    %411 = tpu.memref_squeeze %410 : memref<1x16x384xbf16, #tpu.memory_space<any>> -> memref<16x384xbf16, #tpu.memory_space<any>>
    %c0_i32_159 = arith.constant 0 : i32
    %c0_i32_160 = arith.constant 0 : i32
    %412 = tpu.memref_slice %arg4[%c0_i32_155, %c0_i32_159, %c0_i32_160] : memref<2x16x384xbf16, #tpu.memory_space<vmem>> -> memref<1x16x384xbf16, #tpu.memory_space<vmem>>
    %413 = tpu.memref_squeeze %412 : memref<1x16x384xbf16, #tpu.memory_space<vmem>> -> memref<16x384xbf16, #tpu.memory_space<vmem>>
    %414 = tpu.memref_slice %arg5[%c0_i32_156] : memref<2x!tpu.dma_semaphore, #tpu.memory_space<semaphore_mem>> -> memref<1x!tpu.dma_semaphore, #tpu.memory_space<semaphore_mem>>
    %415 = tpu.memref_squeeze %414 : memref<1x!tpu.dma_semaphore, #tpu.memory_space<semaphore_mem>> -> memref<!tpu.dma_semaphore, #tpu.memory_space<semaphore_mem>>
    tpu.wait_dma2 semaphore(%415 : memref<!tpu.dma_semaphore, #tpu.memory_space<semaphore_mem>>) src(%411 : memref<16x384xbf16, #tpu.memory_space<any>>) dst(%413 : memref<16x384xbf16, #tpu.memory_space<vmem>>)
    %416 = arith.mulf %408, %408 : vector<16x128xf32>
    %cst_161 = arith.constant dense<0.000000e+00> : vector<16xf32>
    %417 = vector.multi_reduction <add>, %416, %cst_161 [1] : vector<16x128xf32> to vector<16xf32>
    %418 = vector.shape_cast %417 : vector<16xf32> to vector<16x1xf32>
    %cst_162 = arith.constant 9.99999996E-13 : f32
    %419 = vector.broadcast %cst_162 : f32 to vector<16x1xf32>
    %420 = arith.addf %418, %419 : vector<16x1xf32>
    %421 = math.rsqrt %420 : vector<16x1xf32>
    %422 = vector.broadcast %421 : vector<16x1xf32> to vector<16x128xf32>
    %423 = arith.mulf %408, %422 : vector<16x128xf32>
    %c0_163 = arith.constant 0 : index
    %c0_164 = arith.constant 0 : index
    %424 = vector.load %arg3[%c0_163, %c0_164] : memref<16x128xf32, #tpu.memory_space<vmem>>, vector<16x128xf32>
    tpu.vector_store %arg3[%c0_163, %c0_164], %423 {strides = array<i32>} : memref<16x128xf32, #tpu.memory_space<vmem>>, vector<16x128xf32>,
    return
  }
}

</mosaic_0001>

<bundles_post_ra>
// kernel: encoder_forward.1
= control target key start
LH: loop header
LB: loop body
LE: loop exit
PB: predicated region body
PF: predicated region fallthrough
CT: control target
= control target key end

     0   :  { %s2859_s1 = inlined_call_operand.vmem [shape: bf16[128,384], index: 1, kind: input, shape index: {}]   ;;  %s2860_s3 = inlined_call_operand.vmem [shape: f32[16,128], index: 3, kind: output, shape index: {}]   ;;  %s2861_s0 = inlined_call_operand.vmem [shape: bf16[8,16,384], index: 0, kind: input, shape index: {}]   ;;  %s2862_s2 = inlined_call_operand.vmem [shape: f32[1,128], index: 2, kind: input, shape index: {}]  }
   0x1   :  { %v2065_v0 = vld [vmem:[%s2859_s1 + $0x4] sm:$0xf]  ;;  %v2070_v1 = vld [vmem:[%s2859_s1] sm:$0xf]  ;;  %v2075_v2 = vld [vmem:[%s2859_s1 + $0x8] sm:$0xf] }
   0x2   :  { %v2080_v3 = vld [vmem:[%s2859_s1 + $0xc] sm:$0xf0]  ;;  %v2085_v4 = vld [vmem:[%s2859_s1 + $0x8] sm:$0xf0]  ;;  %v2090_v5 = vld [vmem:[%s2859_s1 + $0x10] sm:$0xf0] }
   0x3   :  { %v2095_v6 = vld [vmem:[%s2859_s1 + $0x1c] sm:$0xf]  ;;  %v2100_v7 = vld [vmem:[%s2859_s1 + $0x18] sm:$0xf]  ;;  %v2105_v8 = vld [vmem:[%s2859_s1 + $0x20] sm:$0xf] }
   0x4   :  { %v2110_v9 = vld [vmem:[%s2859_s1 + $0x24] sm:$0xf0]  ;;  %v2115_v10 = vld [vmem:[%s2859_s1 + $0x20] sm:$0xf0]  ;;  %v2120_v11 = vld [vmem:[%s2859_s1 + $0x28] sm:$0xf0] }
   0x5   :  { %v2125_v12 = vld [vmem:[%s2859_s1 + $0x34] sm:$0xf]  ;;  %v2130_v13 = vld [vmem:[%s2859_s1 + $0x30] sm:$0xf]  ;;  %v2135_v14 = vld [vmem:[%s2859_s1 + $0x38] sm:$0xf] }
   0x6   :  { %v2140_v15 = vld [vmem:[%s2859_s1 + $0x3c] sm:$0xf0]  ;;  %v2145_v16 = vld [vmem:[%s2859_s1 + $0x38] sm:$0xf0]  ;;  %v2150_v17 = vld [vmem:[%s2859_s1 + $0x40] sm:$0xf0] }
   0x7   :  { %v2155_v18 = vld [vmem:[%s2859_s1 + $0x4c] sm:$0xf]  ;;  %v2160_v19 = vld [vmem:[%s2859_s1 + $0x48] sm:$0xf]  ;;  %v2165_v20 = vld [vmem:[%s2859_s1 + $0x50] sm:$0xf] }
   0x8   :  { %v2170_v21 = vld [vmem:[%s2859_s1 + $0x54] sm:$0xf0]  ;;  %v2175_v22 = vld [vmem:[%s2859_s1 + $0x50] sm:$0xf0]  ;;  %v2180_v23 = vld [vmem:[%s2859_s1 + $0x58] sm:$0xf0] }
   0x9   :  { %v1846_v24 = vld [vmem:[%s2859_s1 + $0x64] sm:$0xf]  ;;  %v1733_v25 = vld [vmem:[%s2859_s1 + $0x60] sm:$0xf]  ;;  %v1741_v26 = vld [vmem:[%s2859_s1 + $0x68] sm:$0xf] }
   0xa   :  { %v1735_v27 = vld [vmem:[%s2859_s1 + $0x6c] sm:$0xf0]  ;;  %v1847_v28 = vld [vmem:[%s2859_s1 + $0x68] sm:$0xf0]  ;;  %v1848_v29 = vld [vmem:[%s2859_s1 + $0x70] sm:$0xf0] }
   0xb   :  { %v1849_v30 = vld [vmem:[%s2859_s1 + $0x7c] sm:$0xf]  ;;  %v1745_v31 = vld [vmem:[%s2859_s1 + $0x78] sm:$0xf]  ;;  %v1753_v32 = vld [vmem:[%s2859_s1 + $0x80] sm:$0xf] }
   0xc   :  { %v1747_v33 = vld [vmem:[%s2859_s1 + $0x84] sm:$0xf0]  ;;  %v1850_v34 = vld [vmem:[%s2859_s1 + $0x80] sm:$0xf0]  ;;  %v1851_v35 = vld [vmem:[%s2859_s1 + $0x88] sm:$0xf0] }
   0xd   :  { %v1852_v36 = vld [vmem:[%s2859_s1 + $0x94] sm:$0xf]  ;;  %v1757_v37 = vld [vmem:[%s2859_s1 + $0x90] sm:$0xf]  ;;  %v1765_v38 = vld [vmem:[%s2859_s1 + $0x98] sm:$0xf] }
   0xe   :  { %v1759_v39 = vld [vmem:[%s2859_s1 + $0x9c] sm:$0xf0]  ;;  %v1853_v40 = vld [vmem:[%s2859_s1 + $0x98] sm:$0xf0]  ;;  %v1854_v41 = vld [vmem:[%s2859_s1 + $0xa0] sm:$0xf0] }
   0xf   :  { %v1855_v42 = vld [vmem:[%s2859_s1 + $0xac] sm:$0xf]  ;;  %v1769_v43 = vld [vmem:[%s2859_s1 + $0xa8] sm:$0xf]  ;;  %v1777_v44 = vld [vmem:[%s2859_s1 + $0xb0] sm:$0xf] }
  0x10   :  { %v1771_v45 = vld [vmem:[%s2859_s1 + $0xb4] sm:$0xf0]  ;;  %v1856_v46 = vld [vmem:[%s2859_s1 + $0xb0] sm:$0xf0]  ;;  %v1857_v47 = vld [vmem:[%s2859_s1 + $0xb8] sm:$0xf0] }
  0x11   :  { %v2257_v48 = vld [vmem:[%s2862_s2] sm:$0x1]  ;;  %v58_v50 = vld [vmem:[%s2861_s0 + $0x8] sm:$0xff]  ;;  %v60_v51 = vld [vmem:[%s2861_s0 + $0x10] sm:$0xff] }
  0x12   :  { %v56_v49 = vld [vmem:[%s2861_s0] sm:$0xff]  ;;  %59 = vst [vmem:[#allocation2 + $0x8] sm:$0xff] %v58_v50 }
  0x13   :  { %57 = vst [vmem:[#allocation2] sm:$0xff] %v56_v49 }
  0x14   :  { %61 = vst [vmem:[#allocation2 + $0x10] sm:$0xff] %v60_v51 }
  0x15   :  { %67 = vsyncadd [#allocation3], 384 }
  0x16   :  { %2023 = dma.done.wait [#allocation3], 384 }
  0x17   :  { %2024 = vsyncadd [#allocation3], 4294966912  ;;  %v1680_v52 = vld [vmem:[%s2861_s0 + $0x18] sm:$0xff]  ;;  %v1681_v53 = vld [vmem:[%s2861_s0 + $0x20] sm:$0xff] }
  0x18   :  { %v1682_v54 = vld [vmem:[%s2861_s0 + $0x28] sm:$0xff]  ;;  %86 = vst [vmem:[#allocation2 + $0x18] sm:$0xff] %v1680_v52 }
  0x19   :  { %88 = vst [vmem:[#allocation2 + $0x20] sm:$0xff] %v1681_v53 }
  0x1a   :  { %90 = vst [vmem:[#allocation2 + $0x28] sm:$0xff] %v1682_v54 }
  0x1b   :  { %96 = vsyncadd [#allocation3 + $0x1], 384  ;;  %v2277_v55 = vor.u32 %v1856_v46, %v1769_v43  ;;  %v2279_v56 = vor.u32 %v1855_v42, %v1771_v45  ;;  %v2283_v57 = vor.u32 %v1853_v40, %v1757_v37  ;;  %v2285_v58 = vor.u32 %v1852_v36, %v1759_v39 }
  0x1c   :  { %v2287_v59 = vor.u32 %v1857_v47, %v1777_v44  ;;  %v2290_v60 = vor.u32 %v1854_v41, %v1765_v38  ;;  %v2294_v61 = vor.u32 %v1850_v34, %v1745_v31  ;;  %v2296_v62 = vor.u32 %v1849_v30, %v1747_v33 }
  0x1d   :  { %235 = vmatpush.bf16.msra.mxu0 %v2277_v55  ;;  %249 = vmatpush.bf16.msra.mxu1 %v2279_v56  ;;  %v2299_v63 = vor.u32 %v1851_v35, %v1753_v32  ;;  %v2303_v36 = vor.u32 %v1847_v28, %v1733_v25  ;;  %v2305_v37 = vor.u32 %v1846_v24, %v1735_v27  ;;  %v2383_v49 = vperm.slane %v2257_v48, 0 }
  0x1e   :  { %263 = vmatpush.bf16.msra.mxu2 %v2287_v59  ;;  %v2308_v38 = vor.u32 %v1848_v29, %v1741_v26  ;;  %v2314_v30 = vor.u32 %v2175_v22, %v2160_v19  ;;  %v2318_v31 = vor.u32 %v2155_v18, %v2170_v21  ;;  %v2323_v24 = vor.u32 %v2180_v23, %v2165_v20 }
  0x1f   :  { %v2329_v25 = vor.u32 %v2145_v16, %v2130_v13  ;;  %v2333_v19 = vor.u32 %v2125_v12, %v2140_v15  ;;  %v2338_v18 = vor.u32 %v2150_v17, %v2135_v14  ;;  %v2344_v20 = vor.u32 %v2115_v10, %v2100_v7  ;;  %v99_v15 = vld [vmem:[#allocation2 + $0xc] sm:$0xff] }
  0x20   :  { %v2348_v13 = vor.u32 %v2095_v6, %v2110_v9  ;;  %v2353_v12 = vor.u32 %v2120_v11, %v2105_v8  ;;  %v2359_v14 = vor.u32 %v2085_v4, %v2070_v1  ;;  %v2363_v7 = vor.u32 %v2065_v0, %v2080_v3  ;;  %v97_v1 = vld [vmem:[#allocation2] sm:$0xff] }
  0x21   :  { %236 = vmatpush.bf16.msra.mxu0 %v2283_v57  ;;  %250 = vmatpush.bf16.msra.mxu1 %v2285_v58  ;;  %v2368_v6 = vor.u32 %v2090_v5, %v2075_v2  ;;  %v2041_v8 = vmov 0   ;;  %v101_v4 = vunpack.c.l.bf16 %v97_v1  ;;  %v102_v0 = vunpack.c.h.bf16 %v97_v1 }
  0x22   :  { %264 = vmatpush.bf16.msra.mxu2 %v2290_v60  ;;  %v104_v16 = vunpack.c.l.bf16 %v99_v15  ;;  %v105_v17 = vunpack.c.h.bf16 %v99_v15  ;;  %v100_v15 = vld [vmem:[#allocation2 + $0x14] sm:$0xf] }
  0x25   :  { %237 = vmatpush.bf16.msra.mxu0 %v2294_v61  ;;  %251 = vmatpush.bf16.msra.mxu1 %v2296_v62 }
  0x26   :  { %265 = vmatpush.bf16.msra.mxu2 %v2299_v63 }
  0x29   :  { %238 = vmatpush.bf16.msra.mxu0 %v2303_v36  ;;  %252 = vmatpush.bf16.msra.mxu1 %v2305_v37 }
  0x2a   :  { %266 = vmatpush.bf16.msra.mxu2 %v2308_v38 }
  0x2d   :  { %239 = vmatpush.bf16.msra.mxu0 %v2314_v30  ;;  %253 = vmatpush.bf16.msra.mxu1 %v2318_v31 }
  0x2e   :  { %267 = vmatpush.bf16.msra.mxu2 %v2323_v24 }
  0x31   :  { %240 = vmatpush.bf16.msra.mxu0 %v2329_v25  ;;  %254 = vmatpush.bf16.msra.mxu1 %v2333_v19 }
  0x32   :  { %268 = vmatpush.bf16.msra.mxu2 %v2338_v18 }
  0x35   :  { %241 = vmatpush.bf16.msra.mxu0 %v2344_v20  ;;  %255 = vmatpush.bf16.msra.mxu1 %v2348_v13 }
  0x36   :  { %269 = vmatpush.bf16.msra.mxu2 %v2353_v12 }
  0x39   :  { %242 = vmatpush.bf16.msra.mxu0 %v2359_v14  ;;  %256 = vmatpush.bf16.msra.mxu1 %v2363_v7 }
  0x3a   :  { %270 = vmatpush.bf16.msra.mxu2 %v2368_v6 }
  0x3c   :  { %243 = vmatmul.bf16.vlgmr.msra.gmra.mxu0 %v2041_v8  ;;  %257 = vmatmul.bf16.vlgmr.msra.gmra.mxu1 %v2041_v8 }
  0x3d   :  { %271 = vmatmul.bf16.vlgmr.msra.gmra.mxu2 %v2041_v8  ;;  %v98_v8 = vld [vmem:[#allocation2 + $0x8] sm:$0xf] }
  0xb9   :  { %v244_v3 = vpop.f32.mrf.mxu0  ;;  %v258_v9 = vpop.f32.mrf.mxu1 }
  0xba   :  { %v277_v10 = vadd.f32 %v244_v3, %v101_v4  ;;  %v317_v11 = vadd.f32 %v258_v9, %v102_v0 }
  0xbc   :  { %v1779_v2 = vmul.f32 -1.442695, %v277_v10  ;;  %v1781_v5 = vmul.f32 -1.442695, %v317_v11  ;;  %v103_v10 = vunpack.c.l.bf16 %v98_v8 }
  0xbe   :  { %1859 = vpow2.f32 %v1779_v2 }
  0xbf   :  { %1861 = vpow2.f32 %v1781_v5 }
  0xc0   :  { %v272_v47 = vpop.f32.mrf.mxu2 }
  0xc1   :  { %v246_v21 = vpop.f32.mrf.mxu0  ;;  %v260_v22 = vpop.f32.mrf.mxu1  ;;  %v360_v4 = vadd.f32 %v2383_v49, %v272_v47 }
  0xc2   :  { %v278_v23 = vadd.f32 %v246_v21, %v104_v16  ;;  %v318_v26 = vadd.f32 %v260_v22, %v105_v17 }
  0xc4   :  { %v1860_v27 = vpop.eup %1859  ;;  %v1780_v28 = vmul.f32 -1.442695, %v278_v23  ;;  %v1782_v33 = vmul.f32 -1.442695, %v318_v26 }
  0xc5   :  { %v1862_v29 = vpop.eup %1861  ;;  %v285_v32 = vadd.f32 1.0, %v1860_v27  ;;  %v106_v27 = vunpack.c.l.bf16 %v100_v15 }
  0xc6   :  { %v2373_v34 = vadd.f32 1.0, %v1862_v29  ;;  %1863 = vpow2.f32 %v1780_v28 }
  0xc7   :  { %1865 = vrcp.f32 %v285_v32  ;;  %v298_v50 = vand.u32 2147483648, %v285_v32  ;;  %v296_v52 = vand.u32 2147483647, %v285_v32  ;;  %vm292_vm1 = vweird.f32 %v285_v32 }
  0xc8   :  { %1867 = vrcp.f32 %v2373_v34  ;;  %v274_v28 = vpop.f32.mrf.mxu2  ;;  %vm332_vm5 = vweird.f32 %v2373_v34 }
  0xc9   :  { %1869 = vpow2.f32 %v1782_v33  ;;  %v299_v0 = vor.u32 1.1754944e-38, %v298_v50  ;;  %vm297_vm3 = vcmp.eq.f32.partialorder %v296_v52, 8.507059e+37 }
  0xcc   :  { %v1864_v35 = vpop.eup %1863 }
  0xcd   :  { %v1866_v39 = vpop.eup %1865  ;;  %v286_v40 = vadd.f32 1.0, %v1864_v35 }
  0xce   :  { %v2376_v41 = vpop.eup %1867  ;;  %v288_v42 = vmul.f32 %v1866_v39, %v285_v32  ;;  %vm293_vm0 = vweird.f32 %v1866_v39 }
  0xcf   :  { %v1870_v43 = vpop.eup %1869  ;;  %1871 = vrcp.f32 %v286_v40  ;;  %v328_v46 = vmul.f32 %v2376_v41, %v2373_v34  ;;  %vm294_vm2 = vmor %vm292_vm1, %vm293_vm0  ;;  %v313_v21 = vand.u32 2147483648, %v286_v40  ;;  %v311_v23 = vand.u32 2147483647, %v286_v40 }
  0xd0   :  { %v2378_v44 = vadd.f32 1.0, %v1870_v43  ;;  %v289_v45 = vsub.f32 1.0, %v288_v42  ;;  %vm307_vm6 = vweird.f32 %v286_v40  ;;  %vm333_vm7 = vweird.f32 %v2376_v41 }
  0xd1   :  { %v329_v54 = vsub.f32 1.0, %v328_v46  ;;  %v338_v42 = vand.u32 2147483648, %v2373_v34  ;;  %vm312_vm9 = vcmp.eq.f32.partialorder %v311_v23, 8.507059e+37  ;;  %v336_v46 = vand.u32 2147483647, %v2373_v34  ;;  %vm334_vm11 = vmor %vm332_vm5, %vm333_vm7 }
  0xd2   :  { %1873 = vrcp.f32 %v2378_v44  ;;  %v290_v51 = vmul.f32 %v1866_v39, %v289_v45  ;;  %v361_v45 = vadd.f32 %v2383_v49, %v274_v28  ;;  %vm347_vm12 = vweird.f32 %v2378_v44 }
  0xd3   :  { %v330_v5 = vmul.f32 %v2376_v41, %v329_v54  ;;  %v351_v52 = vand.u32 2147483647, %v2378_v44  ;;  %v339_v54 = vor.u32 1.1754944e-38, %v338_v42  ;;  %vm337_vm14 = vcmp.eq.f32.partialorder %v336_v46, 8.507059e+37 }
  0xd4   :  { %v291_v1 = vadd.f32 %v1866_v39, %v290_v51 }
  0xd5   :  { %v1872_v53 = vpop.eup %1871  ;;  %v331_v33 = vadd.f32 %v2376_v41, %v330_v5  ;;  %vm352_vm15 = vcmp.eq.f32.partialorder %v351_v52, 8.507059e+37 }
  0xd6   :  { %v303_v3 = vmul.f32 %v1872_v53, %v286_v40  ;;  %v295_v9 = vsel %vm294_vm2, %v1866_v39, %v291_v1  ;;  %vm308_vm4 = vweird.f32 %v1872_v53  ;;  %v314_v39 = vor.u32 1.1754944e-38, %v313_v21 }
  0xd7   :  { %v300_v11 = vsel %vm297_vm3, %v299_v0, %v295_v9  ;;  %vm309_vm8 = vmor %vm307_vm6, %vm308_vm4  ;;  %v353_v40 = vand.u32 2147483648, %v2378_v44 }
  0xd8   :  { %v1874_v48 = vpop.eup %1873  ;;  %v304_v2 = vsub.f32 1.0, %v303_v3  ;;  %v362_v17 = vmul.f32 %v360_v4, %v300_v11 }
  0xd9   :  { %v343_v16 = vmul.f32 %v1874_v48, %v2378_v44  ;;  %vm348_vm10 = vweird.f32 %v1874_v48  ;;  %v354_v4 = vor.u32 1.1754944e-38, %v353_v40 }
  0xda   :  { %v305_v22 = vmul.f32 %v1872_v53, %v304_v2  ;;  %v364_v29 = vadd.f32 %v362_v17, %v103_v10  ;;  %vm349_vm13 = vmor %vm347_vm12, %vm348_vm10 }
  0xdb   :  { %v344_v26 = vsub.f32 1.0, %v343_v16 }
  0xdc   :  { %v306_v32 = vadd.f32 %v1872_v53, %v305_v22  ;;  %1875 = vtanh.f32 %v364_v29 }
  0xdd   :  { %v345_v35 = vmul.f32 %v1874_v48, %v344_v26 }
  0xde   :  { %v310_v43 = vsel %vm309_vm8, %v1872_v53, %v306_v32  ;;  %v335_v53 = vsel %vm334_vm11, %v2376_v41, %v331_v33 }
  0xdf   :  { %v346_v47 = vadd.f32 %v1874_v48, %v345_v35  ;;  %v315_v50 = vsel %vm312_vm9, %v314_v39, %v310_v43  ;;  %v340_v0 = vsel %vm337_vm14, %v339_v54, %v335_v53 }
  0xe0   :  { %v363_v51 = vmul.f32 %v361_v45, %v315_v50  ;;  %v368_v9 = vsub.f32 1.0, %v340_v0  ;;  %v372_v2 = vmul.f32 0.0, %v340_v0 }
  0xe1   :  { %v350_v1 = vsel %vm349_vm13, %v1874_v48, %v346_v47 }
  0xe2   :  { %v365_v8 = vadd.f32 %v363_v51, %v106_v27  ;;  %v1876_v34 = vpop.eup %1875  ;;  %v355_v3 = vsel %vm352_vm15, %v354_v4, %v350_v1 }
  0xe3   :  { %v370_v10 = vmul.f32 %v1876_v34, %v368_v9  ;;  %v369_v11 = vsub.f32 1.0, %v355_v3  ;;  %v373_v44 = vmul.f32 0.0, %v355_v3 }
  0xe4   :  { %1877 = vtanh.f32 %v365_v8 }
  0xe5   :  { %v2401_v16 = vadd.f32 %v372_v2, %v370_v10 }
  0xea   :  { %v1878_v15 = vpop.eup %1877 }
  0xeb   :  { %v371_v5 = vmul.f32 %v1878_v15, %v369_v11 }
  0xed   :  { %v2403_v41 = vadd.f32 %v373_v44, %v371_v5 }
  0xef   :  { %v376_v48 = vpack.c.bf16 %v2403_v41, %v2401_v16 }
  0xf0   :  { %2025 = dma.done.wait [#allocation3 + $0x1], 384 }
  0xf1   :  { %2026 = vsyncadd [#allocation3 + $0x1], 4294966912  ;;  %v1783_v17 = vld [vmem:[%s2861_s0 + $0x30] sm:$0xff]  ;;  %v1784_v21 = vld [vmem:[%s2861_s0 + $0x38] sm:$0xff] }
  0xf2   :  { %v1785_v22 = vld [vmem:[%s2861_s0 + $0x40] sm:$0xff]  ;;  %391 = vst [vmem:[#allocation2] sm:$0xff] %v1783_v17 }
  0xf3   :  { %393 = vst [vmem:[#allocation2 + $0x8] sm:$0xff] %v1784_v21 }
  0xf4   :  { %395 = vst [vmem:[#allocation2 + $0x10] sm:$0xff] %v1785_v22 }
  0xf5   :  { %401 = vsyncadd [#allocation3], 384  ;;  %412 = vmatpush.bf16.msra.mxu3 %v2277_v55  ;;  %426 = vmatpush.bf16.msrb.mxu0 %v2279_v56  ;;  %v402_v23 = vld [vmem:[#allocation2 + $0x18] sm:$0xff]  ;;  %v404_v29 = vld [vmem:[#allocation2 + $0x24] sm:$0xff] }
  0xf6   :  { %440 = vmatpush.bf16.msrb.mxu1 %v2287_v59  ;;  %v407_v26 = vunpack.c.h.bf16 %v402_v23  ;;  %v406_v32 = vunpack.c.l.bf16 %v402_v23  ;;  %v410_v35 = vunpack.c.h.bf16 %v404_v29  ;;  %v409_v50 = vunpack.c.l.bf16 %v404_v29  ;;  %v403_v29 = vld [vmem:[#allocation2 + $0x20] sm:$0xf] }
  0xf9   :  { %413 = vmatpush.bf16.msra.mxu3 %v2283_v57  ;;  %427 = vmatpush.bf16.msrb.mxu0 %v2285_v58 }
  0xfa   :  { %441 = vmatpush.bf16.msrb.mxu1 %v2290_v60 }
  0xfd   :  { %414 = vmatpush.bf16.msra.mxu3 %v2294_v61  ;;  %428 = vmatpush.bf16.msrb.mxu0 %v2296_v62 }
  0xfe   :  { %442 = vmatpush.bf16.msrb.mxu1 %v2299_v63 }
 0x101   :  { %415 = vmatpush.bf16.msra.mxu3 %v2303_v36  ;;  %429 = vmatpush.bf16.msrb.mxu0 %v2305_v37 }
 0x102   :  { %443 = vmatpush.bf16.msrb.mxu1 %v2308_v38 }
 0x105   :  { %416 = vmatpush.bf16.msra.mxu3 %v2314_v30  ;;  %430 = vmatpush.bf16.msrb.mxu0 %v2318_v31 }
 0x106   :  { %444 = vmatpush.bf16.msrb.mxu1 %v2323_v24 }
 0x109   :  { %417 = vmatpush.bf16.msra.mxu3 %v2329_v25  ;;  %431 = vmatpush.bf16.msrb.mxu0 %v2333_v19 }
 0x10a   :  { %445 = vmatpush.bf16.msrb.mxu1 %v2338_v18 }
 0x10d   :  { %418 = vmatpush.bf16.msra.mxu3 %v2344_v20  ;;  %432 = vmatpush.bf16.msrb.mxu0 %v2348_v13 }
 0x10e   :  { %446 = vmatpush.bf16.msrb.mxu1 %v2353_v12 }
 0x111   :  { %419 = vmatpush.bf16.msra.mxu3 %v2359_v14  ;;  %433 = vmatpush.bf16.msrb.mxu0 %v2363_v7 }
 0x112   :  { %447 = vmatpush.bf16.msrb.mxu1 %v2368_v6 }
 0x114   :  { %420 = vmatmul.bf16.vlgmr.msra.gmra.mxu3 %v376_v48  ;;  %434 = vmatmul.bf16.vlgmr.msrb.gmra.mxu0 %v376_v48 }
 0x115   :  { %448 = vmatmul.bf16.vlgmr.msrb.gmra.mxu1 %v376_v48 }
 0x191   :  { %v435_v27 = vpop.f32.mrf.mxu0 }
 0x192   :  { %v494_v28 = vadd.f32 %v435_v27, %v407_v26  ;;  %v449_v44 = vpop.f32.mrf.mxu1 }
 0x193   :  { %v534_v26 = vadd.f32 %v449_v44, %v2383_v49 }
 0x194   :  { %v1788_v33 = vmul.f32 -1.442695, %v494_v28 }
 0x196   :  { %1879 = vpow2.f32 %v1788_v33 }
 0x197   :  { %v421_v39 = vpop.f32.mrf.mxu3 }
 0x198   :  { %v454_v42 = vadd.f32 %v421_v39, %v406_v32 }
 0x199   :  { %v437_v43 = vpop.f32.mrf.mxu0 }
 0x19a   :  { %v1786_v45 = vmul.f32 -1.442695, %v454_v42  ;;  %v495_v46 = vadd.f32 %v437_v43, %v410_v35  ;;  %v408_v43 = vunpack.c.l.bf16 %v403_v29 }
 0x19c   :  { %1881 = vpow2.f32 %v1786_v45  ;;  %v1789_v47 = vmul.f32 -1.442695, %v495_v46  ;;  %v1880_v40 = vpop.eup %1879 }
 0x19d   :  { %v2440_v54 = vadd.f32 1.0, %v1880_v40 }
 0x19e   :  { %1883 = vpow2.f32 %v1789_v47 }
 0x19f   :  { %v423_v51 = vpop.f32.mrf.mxu3  ;;  %vm509_vm5 = vweird.f32 %v2440_v54 }
 0x1a0   :  { %v455_v52 = vadd.f32 %v423_v51, %v409_v50 }
 0x1a2   :  { %v1882_v53 = vpop.eup %1881  ;;  %v1787_v8 = vmul.f32 -1.442695, %v455_v52 }
 0x1a3   :  { %v462_v1 = vadd.f32 1.0, %v1882_v53  ;;  %v405_v53 = vld [vmem:[#allocation2 + $0x2c] sm:$0xf] }
 0x1a4   :  { %v1884_v4 = vpop.eup %1883  ;;  %1885 = vpow2.f32 %v1787_v8  ;;  %v451_v8 = vpop.f32.mrf.mxu1  ;;  %v411_v44 = vunpack.c.l.bf16 %v405_v53 }
 0x1a5   :  { %1887 = vrcp.f32 %v462_v1  ;;  %v2442_v0 = vadd.f32 1.0, %v1884_v4  ;;  %v475_v48 = vand.u32 2147483648, %v462_v1  ;;  %v473_v21 = vand.u32 2147483647, %v462_v1 }
 0x1a6   :  { %1889 = vrcp.f32 %v2440_v54  ;;  %vm469_vm1 = vweird.f32 %v462_v1 }
 0x1a7   :  { %1891 = vrcp.f32 %v2442_v0  ;;  %v476_v32 = vor.u32 1.1754944e-38, %v475_v48  ;;  %vm474_vm3 = vcmp.eq.f32.partialorder %v473_v21, 8.507059e+37  ;;  %vm524_vm11 = vweird.f32 %v2442_v0 }
 0x1aa   :  { %v1886_v34 = vpop.eup %1885 }
 0x1ab   :  { %v1888_v3 = vpop.eup %1887  ;;  %v463_v9 = vadd.f32 1.0, %v1886_v34 }
 0x1ac   :  { %v2446_v10 = vpop.eup %1889  ;;  %v465_v11 = vmul.f32 %v1888_v3, %v462_v1  ;;  %vm470_vm0 = vweird.f32 %v1888_v3  ;;  %v515_v1 = vand.u32 2147483648, %v2440_v54 }
 0x1ad   :  { %1893 = vrcp.f32 %v463_v9  ;;  %v2448_v15 = vpop.eup %1891  ;;  %v505_v5 = vmul.f32 %v2446_v10, %v2440_v54  ;;  %vm471_vm2 = vmor %vm469_vm1, %vm470_vm0  ;;  %v490_v50 = vand.u32 2147483648, %v463_v9  ;;  %v488_v51 = vand.u32 2147483647, %v463_v9 }
 0x1ae   :  { %v466_v2 = vsub.f32 1.0, %v465_v11  ;;  %v520_v22 = vmul.f32 %v2448_v15, %v2442_v0  ;;  %vm510_vm6 = vweird.f32 %v2446_v10  ;;  %vm484_vm7 = vweird.f32 %v463_v9 }
 0x1af   :  { %v506_v28 = vsub.f32 1.0, %v505_v5  ;;  %v513_v11 = vand.u32 2147483647, %v2440_v54  ;;  %vm2462_vm9 = vmor %vm509_vm5, %vm510_vm6  ;;  %vm489_vm10 = vcmp.eq.f32.partialorder %v488_v51, 8.507059e+37  ;;  %vm525_vm12 = vweird.f32 %v2448_v15 }
 0x1b0   :  { %v467_v17 = vmul.f32 %v1888_v3, %v466_v2  ;;  %v521_v39 = vsub.f32 1.0, %v520_v22  ;;  %v491_v2 = vor.u32 1.1754944e-38, %v490_v50  ;;  %v516_v22 = vor.u32 1.1754944e-38, %v515_v1  ;;  %vm526_vm14 = vmor %vm524_vm11, %vm525_vm12 }
 0x1b1   :  { %v507_v47 = vmul.f32 %v2446_v10, %v506_v28  ;;  %v530_v54 = vand.u32 2147483648, %v2442_v0  ;;  %vm514_vm13 = vcmp.eq.f32.partialorder %v513_v11, 8.507059e+37 }
 0x1b2   :  { %v468_v23 = vadd.f32 %v1888_v3, %v467_v17  ;;  %v522_v52 = vmul.f32 %v2448_v15, %v521_v39  ;;  %v535_v17 = vadd.f32 %v451_v8, %v2383_v49 }
 0x1b3   :  { %v1894_v27 = vpop.eup %1893 }
 0x1b4   :  { %v472_v33 = vsel %vm471_vm2, %v1888_v3, %v468_v23  ;;  %v480_v35 = vmul.f32 %v1894_v27, %v463_v9  ;;  %vm485_vm4 = vweird.f32 %v1894_v27  ;;  %v508_v3 = vadd.f32 %v2446_v10, %v507_v47 }
 0x1b5   :  { %v477_v42 = vsel %vm474_vm3, %v476_v32, %v472_v33  ;;  %vm486_vm8 = vmor %vm484_vm7, %vm485_vm4  ;;  %v523_v21 = vadd.f32 %v2448_v15, %v522_v52  ;;  %v531_v32 = vor.u32 1.1754944e-38, %v530_v54 }
 0x1b6   :  { %v536_v45 = vmul.f32 %v534_v26, %v477_v42  ;;  %v481_v46 = vsub.f32 1.0, %v480_v35  ;;  %v528_v26 = vand.u32 2147483647, %v2442_v0 }
 0x1b7   :  { %v527_v29 = vsel %vm526_vm14, %v2448_v15, %v523_v21 }
 0x1b8   :  { %v482_v40 = vmul.f32 %v1894_v27, %v481_v46  ;;  %v538_v4 = vadd.f32 %v536_v45, %v408_v43  ;;  %vm529_vm15 = vcmp.eq.f32.partialorder %v528_v26, 8.507059e+37 }
 0x1b9   :  { %v532_v39 = vsel %vm529_vm15, %v531_v32, %v527_v29 }
 0x1ba   :  { %v483_v34 = vadd.f32 %v1894_v27, %v482_v40  ;;  %1895 = vtanh.f32 %v538_v4  ;;  %v543_v45 = vsub.f32 1.0, %v532_v39  ;;  %v547_v50 = vmul.f32 %v532_v39, %v2403_v41 }
 0x1bc   :  { %v487_v48 = vsel %vm486_vm8, %v1894_v27, %v483_v34  ;;  %v512_v27 = vsel %vm2462_vm9, %v2446_v10, %v508_v3 }
 0x1bd   :  { %v492_v9 = vsel %vm489_vm10, %v491_v2, %v487_v48  ;;  %v517_v33 = vsel %vm514_vm13, %v516_v22, %v512_v27 }
 0x1be   :  { %v537_v23 = vmul.f32 %v535_v17, %v492_v9  ;;  %v542_v42 = vsub.f32 1.0, %v517_v33  ;;  %v546_v0 = vmul.f32 %v517_v33, %v2401_v16 }
 0x1c0   :  { %v539_v28 = vadd.f32 %v537_v23, %v411_v44  ;;  %v1896_v35 = vpop.eup %1895 }
 0x1c1   :  { %v544_v43 = vmul.f32 %v1896_v35, %v542_v42 }
 0x1c2   :  { %1897 = vtanh.f32 %v539_v28 }
 0x1c3   :  { %v2478_v10 = vadd.f32 %v546_v0, %v544_v43 }
 0x1c8   :  { %v1898_v46 = vpop.eup %1897 }
 0x1c9   :  { %v545_v47 = vmul.f32 %v1898_v46, %v543_v45 }
 0x1cb   :  { %v2480_v40 = vadd.f32 %v547_v50, %v545_v47 }
 0x1cd   :  { %v550_v15 = vpack.c.bf16 %v2480_v40, %v2478_v10 }
 0x1ce   :  { %2027 = dma.done.wait [#allocation3], 384 }
 0x1cf   :  { %2028 = vsyncadd [#allocation3], 4294966912  ;;  %v1790_v51 = vld [vmem:[%s2861_s0 + $0x48] sm:$0xff]  ;;  %v1791_v16 = vld [vmem:[%s2861_s0 + $0x50] sm:$0xff] }
 0x1d0   :  { %v1792_v41 = vld [vmem:[%s2861_s0 + $0x58] sm:$0xff]  ;;  %565 = vst [vmem:[#allocation2 + $0x18] sm:$0xff] %v1790_v51 }
 0x1d1   :  { %567 = vst [vmem:[#allocation2 + $0x20] sm:$0xff] %v1791_v16 }
 0x1d2   :  { %569 = vst [vmem:[#allocation2 + $0x28] sm:$0xff] %v1792_v41 }
 0x1d3   :  { %575 = vsyncadd [#allocation3 + $0x1], 384  ;;  %586 = vmatpush.bf16.msrb.mxu2 %v2277_v55  ;;  %600 = vmatpush.bf16.msrb.mxu3 %v2279_v56  ;;  %v576_v52 = vld [vmem:[#allocation2] sm:$0xff]  ;;  %v578_v11 = vld [vmem:[#allocation2 + $0xc] sm:$0xff] }
 0x1d4   :  { %614 = vmatpush.bf16.msra.mxu0 %v2287_v59  ;;  %v580_v53 = vunpack.c.l.bf16 %v576_v52  ;;  %v581_v8 = vunpack.c.h.bf16 %v576_v52  ;;  %v583_v44 = vunpack.c.l.bf16 %v578_v11  ;;  %v584_v48 = vunpack.c.h.bf16 %v578_v11  ;;  %v577_v52 = vld [vmem:[#allocation2 + $0x8] sm:$0xf] }
 0x1d5   :  { %v582_v11 = vunpack.c.l.bf16 %v577_v52 }
 0x1d7   :  { %587 = vmatpush.bf16.msrb.mxu2 %v2283_v57  ;;  %601 = vmatpush.bf16.msrb.mxu3 %v2285_v58 }
 0x1d8   :  { %615 = vmatpush.bf16.msra.mxu0 %v2290_v60 }
 0x1db   :  { %588 = vmatpush.bf16.msrb.mxu2 %v2294_v61  ;;  %602 = vmatpush.bf16.msrb.mxu3 %v2296_v62 }
 0x1dc   :  { %616 = vmatpush.bf16.msra.mxu0 %v2299_v63 }
 0x1df   :  { %589 = vmatpush.bf16.msrb.mxu2 %v2303_v36  ;;  %603 = vmatpush.bf16.msrb.mxu3 %v2305_v37 }
 0x1e0   :  { %617 = vmatpush.bf16.msra.mxu0 %v2308_v38 }
 0x1e3   :  { %590 = vmatpush.bf16.msrb.mxu2 %v2314_v30  ;;  %604 = vmatpush.bf16.msrb.mxu3 %v2318_v31 }
 0x1e4   :  { %618 = vmatpush.bf16.msra.mxu0 %v2323_v24 }
 0x1e7   :  { %591 = vmatpush.bf16.msrb.mxu2 %v2329_v25  ;;  %605 = vmatpush.bf16.msrb.mxu3 %v2333_v19 }
 0x1e8   :  { %619 = vmatpush.bf16.msra.mxu0 %v2338_v18 }
 0x1eb   :  { %592 = vmatpush.bf16.msrb.mxu2 %v2344_v20  ;;  %606 = vmatpush.bf16.msrb.mxu3 %v2348_v13 }
 0x1ec   :  { %620 = vmatpush.bf16.msra.mxu0 %v2353_v12 }
 0x1ef   :  { %593 = vmatpush.bf16.msrb.mxu2 %v2359_v14  ;;  %607 = vmatpush.bf16.msrb.mxu3 %v2363_v7 }
 0x1f0   :  { %621 = vmatpush.bf16.msra.mxu0 %v2368_v6 }
 0x1f2   :  { %594 = vmatmul.bf16.vlgmr.msrb.gmra.mxu2 %v550_v15  ;;  %608 = vmatmul.bf16.vlgmr.msrb.gmra.mxu3 %v550_v15 }
 0x1f3   :  { %622 = vmatmul.bf16.vlgmr.msra.gmra.mxu0 %v550_v15 }
 0x270   :  { %v623_v42 = vpop.f32.mrf.mxu0 }
 0x275   :  { %v595_v1 = vpop.f32.mrf.mxu2  ;;  %v609_v4 = vpop.f32.mrf.mxu3 }
 0x276   :  { %v628_v34 = vadd.f32 %v595_v1, %v580_v53  ;;  %v668_v3 = vadd.f32 %v609_v4, %v581_v8  ;;  %v708_v8 = vadd.f32 %v623_v42, %v2383_v49 }
 0x278   :  { %v1793_v2 = vmul.f32 -1.442695, %v628_v34  ;;  %v1795_v5 = vmul.f32 -1.442695, %v668_v3 }
 0x27a   :  { %1899 = vpow2.f32 %v1793_v2 }
 0x27b   :  { %1901 = vpow2.f32 %v1795_v5  ;;  %v625_v5 = vpop.f32.mrf.mxu0 }
 0x27d   :  { %v597_v17 = vpop.f32.mrf.mxu2  ;;  %v611_v21 = vpop.f32.mrf.mxu3 }
 0x27e   :  { %v629_v9 = vadd.f32 %v597_v17, %v583_v44  ;;  %v669_v22 = vadd.f32 %v611_v21, %v584_v48 }
 0x280   :  { %v1900_v54 = vpop.eup %1899  ;;  %v1794_v23 = vmul.f32 -1.442695, %v629_v9  ;;  %v1796_v28 = vmul.f32 -1.442695, %v669_v22 }
 0x281   :  { %v1902_v26 = vpop.eup %1901  ;;  %v636_v27 = vadd.f32 1.0, %v1900_v54 }
 0x282   :  { %v2517_v29 = vadd.f32 1.0, %v1902_v26  ;;  %1903 = vpow2.f32 %v1794_v23  ;;  %v579_v26 = vld [vmem:[#allocation2 + $0x14] sm:$0xf] }
 0x283   :  { %1905 = vrcp.f32 %v636_v27  ;;  %v649_v50 = vand.u32 2147483648, %v636_v27  ;;  %v647_v51 = vand.u32 2147483647, %v636_v27  ;;  %vm643_vm1 = vweird.f32 %v636_v27 }
 0x284   :  { %1907 = vrcp.f32 %v2517_v29  ;;  %vm683_vm5 = vweird.f32 %v2517_v29 }
 0x285   :  { %1909 = vpow2.f32 %v1796_v28  ;;  %v650_v1 = vor.u32 1.1754944e-38, %v649_v50  ;;  %vm648_vm3 = vcmp.eq.f32.partialorder %v647_v51, 8.507059e+37  ;;  %v687_v50 = vand.u32 2147483647, %v2517_v29 }
 0x287   :  { %vm688_vm14 = vcmp.eq.f32.partialorder %v687_v50, 8.507059e+37 }
 0x288   :  { %v1904_v32 = vpop.eup %1903 }
 0x289   :  { %v1906_v33 = vpop.eup %1905  ;;  %v637_v35 = vadd.f32 1.0, %v1904_v32 }
 0x28a   :  { %v2520_v39 = vpop.eup %1907  ;;  %v639_v43 = vmul.f32 %v1906_v33, %v636_v27  ;;  %vm644_vm0 = vweird.f32 %v1906_v33  ;;  %v709_v27 = vadd.f32 %v625_v5, %v2383_v49 }
 0x28b   :  { %v1910_v45 = vpop.eup %1909  ;;  %1911 = vrcp.f32 %v637_v35  ;;  %v679_v47 = vmul.f32 %v2520_v39, %v2517_v29  ;;  %vm645_vm2 = vmor %vm643_vm1, %vm644_vm0  ;;  %v664_v9 = vand.u32 2147483648, %v637_v35  ;;  %v662_v54 = vand.u32 2147483647, %v637_v35 }
 0x28c   :  { %v2522_v46 = vadd.f32 1.0, %v1910_v45  ;;  %v640_v0 = vsub.f32 1.0, %v639_v43  ;;  %vm658_vm6 = vweird.f32 %v637_v35  ;;  %vm684_vm7 = vweird.f32 %v2520_v39 }
 0x28d   :  { %v680_v41 = vsub.f32 1.0, %v679_v47  ;;  %v665_v43 = vor.u32 1.1754944e-38, %v664_v9  ;;  %v689_v45 = vand.u32 2147483648, %v2517_v29  ;;  %vm663_vm9 = vcmp.eq.f32.partialorder %v662_v54, 8.507059e+37  ;;  %vm685_vm11 = vmor %vm683_vm5, %vm684_vm7 }
 0x28e   :  { %1913 = vrcp.f32 %v2522_v46  ;;  %v641_v15 = vmul.f32 %v1906_v33, %v640_v0  ;;  %v585_v0 = vunpack.c.l.bf16 %v579_v26  ;;  %vm698_vm12 = vweird.f32 %v2522_v46 }
 0x28f   :  { %v681_v48 = vmul.f32 %v2520_v39, %v680_v41  ;;  %v702_v52 = vand.u32 2147483647, %v2522_v46 }
 0x290   :  { %v642_v53 = vadd.f32 %v1906_v33, %v641_v15 }
 0x291   :  { %v1912_v16 = vpop.eup %1911  ;;  %vm703_vm15 = vcmp.eq.f32.partialorder %v702_v52, 8.507059e+37 }
 0x292   :  { %v654_v4 = vmul.f32 %v1912_v16, %v637_v35  ;;  %v646_v34 = vsel %vm645_vm2, %v1906_v33, %v642_v53  ;;  %vm659_vm4 = vweird.f32 %v1912_v16  ;;  %v682_v33 = vadd.f32 %v2520_v39, %v681_v48 }
 0x293   :  { %v651_v2 = vsel %vm648_vm3, %v650_v1, %v646_v34  ;;  %vm660_vm8 = vmor %vm658_vm6, %vm659_vm4  ;;  %v704_v35 = vand.u32 2147483648, %v2522_v46 }
 0x294   :  { %v1914_v3 = vpop.eup %1913  ;;  %v655_v44 = vsub.f32 1.0, %v654_v4  ;;  %v710_v21 = vmul.f32 %v708_v8, %v651_v2  ;;  %v686_v53 = vsel %vm685_vm11, %v2520_v39, %v682_v33 }
 0x295   :  { %v694_v17 = vmul.f32 %v1914_v3, %v2522_v46  ;;  %vm699_vm10 = vweird.f32 %v1914_v3  ;;  %v705_v4 = vor.u32 1.1754944e-38, %v704_v35 }
 0x296   :  { %v656_v22 = vmul.f32 %v1912_v16, %v655_v44  ;;  %v712_v28 = vadd.f32 %v710_v21, %v582_v11  ;;  %vm700_vm13 = vmor %vm698_vm12, %vm699_vm10 }
 0x297   :  { %v695_v23 = vsub.f32 1.0, %v694_v17 }
 0x298   :  { %v657_v32 = vadd.f32 %v1912_v16, %v656_v22  ;;  %1915 = vtanh.f32 %v712_v28 }
 0x299   :  { %v696_v42 = vmul.f32 %v1914_v3, %v695_v23 }
 0x29a   :  { %v661_v47 = vsel %vm660_vm8, %v1912_v16, %v657_v32  ;;  %v690_v16 = vor.u32 1.1754944e-38, %v689_v45 }
 0x29b   :  { %v697_v15 = vadd.f32 %v1914_v3, %v696_v42  ;;  %v666_v51 = vsel %vm663_vm9, %v665_v43, %v661_v47 }
 0x29c   :  { %v711_v41 = vmul.f32 %v709_v27, %v666_v51  ;;  %v691_v34 = vsel %vm688_vm14, %v690_v16, %v686_v53 }
 0x29d   :  { %v701_v1 = vsel %vm700_vm13, %v1914_v3, %v697_v15  ;;  %v716_v2 = vsub.f32 1.0, %v691_v34  ;;  %v720_v17 = vmul.f32 %v691_v34, %v2478_v10 }
 0x29e   :  { %v713_v8 = vadd.f32 %v711_v41, %v585_v0  ;;  %v1916_v29 = vpop.eup %1915  ;;  %v706_v11 = vsel %vm703_vm15, %v705_v4, %v701_v1 }
 0x29f   :  { %v718_v5 = vmul.f32 %v1916_v29, %v716_v2  ;;  %v717_v44 = vsub.f32 1.0, %v706_v11  ;;  %v721_v39 = vmul.f32 %v706_v11, %v2480_v40 }
 0x2a0   :  { %1917 = vtanh.f32 %v713_v8 }
 0x2a1   :  { %v2544_v21 = vadd.f32 %v720_v17, %v718_v5 }
 0x2a6   :  { %v1918_v48 = vpop.eup %1917 }
 0x2a7   :  { %v719_v46 = vmul.f32 %v1918_v48, %v717_v44 }
 0x2a9   :  { %v2546_v9 = vadd.f32 %v721_v39, %v719_v46 }
 0x2ab   :  { %v724_v3 = vpack.c.bf16 %v2546_v9, %v2544_v21 }
 0x2ac   :  { %2029 = dma.done.wait [#allocation3 + $0x1], 384 }
 0x2ad   :  { %2030 = vsyncadd [#allocation3 + $0x1], 4294966912  ;;  %v1797_v22 = vld [vmem:[%s2861_s0 + $0x60] sm:$0xff]  ;;  %v1798_v10 = vld [vmem:[%s2861_s0 + $0x68] sm:$0xff] }
 0x2ae   :  { %v1799_v40 = vld [vmem:[%s2861_s0 + $0x70] sm:$0xff]  ;;  %739 = vst [vmem:[#allocation2] sm:$0xff] %v1797_v22 }
 0x2af   :  { %741 = vst [vmem:[#allocation2 + $0x8] sm:$0xff] %v1798_v10 }
 0x2b0   :  { %743 = vst [vmem:[#allocation2 + $0x10] sm:$0xff] %v1799_v40 }
 0x2b1   :  { %749 = vsyncadd [#allocation3], 384  ;;  %760 = vmatpush.bf16.msra.mxu1 %v2277_v55  ;;  %774 = vmatpush.bf16.msra.mxu2 %v2279_v56  ;;  %v750_v54 = vld [vmem:[#allocation2 + $0x18] sm:$0xff]  ;;  %v752_v28 = vld [vmem:[#allocation2 + $0x24] sm:$0xff] }
 0x2b2   :  { %788 = vmatpush.bf16.msra.mxu3 %v2287_v59  ;;  %v754_v23 = vunpack.c.l.bf16 %v750_v54  ;;  %v755_v33 = vunpack.c.h.bf16 %v750_v54  ;;  %v757_v42 = vunpack.c.l.bf16 %v752_v28  ;;  %v758_v35 = vunpack.c.h.bf16 %v752_v28 }
 0x2b5   :  { %761 = vmatpush.bf16.msra.mxu1 %v2283_v57  ;;  %775 = vmatpush.bf16.msra.mxu2 %v2285_v58 }
 0x2b6   :  { %789 = vmatpush.bf16.msra.mxu3 %v2290_v60 }
 0x2b9   :  { %762 = vmatpush.bf16.msra.mxu1 %v2294_v61  ;;  %776 = vmatpush.bf16.msra.mxu2 %v2296_v62 }
 0x2ba   :  { %790 = vmatpush.bf16.msra.mxu3 %v2299_v63 }
 0x2bd   :  { %763 = vmatpush.bf16.msra.mxu1 %v2303_v36  ;;  %777 = vmatpush.bf16.msra.mxu2 %v2305_v37 }
 0x2be   :  { %791 = vmatpush.bf16.msra.mxu3 %v2308_v38 }
 0x2c1   :  { %764 = vmatpush.bf16.msra.mxu1 %v2314_v30  ;;  %778 = vmatpush.bf16.msra.mxu2 %v2318_v31 }
 0x2c2   :  { %792 = vmatpush.bf16.msra.mxu3 %v2323_v24 }
 0x2c5   :  { %765 = vmatpush.bf16.msra.mxu1 %v2329_v25  ;;  %779 = vmatpush.bf16.msra.mxu2 %v2333_v19 }
 0x2c6   :  { %793 = vmatpush.bf16.msra.mxu3 %v2338_v18 }
 0x2c9   :  { %766 = vmatpush.bf16.msra.mxu1 %v2344_v20  ;;  %780 = vmatpush.bf16.msra.mxu2 %v2348_v13 }
 0x2ca   :  { %794 = vmatpush.bf16.msra.mxu3 %v2353_v12 }
 0x2cd   :  { %767 = vmatpush.bf16.msra.mxu1 %v2359_v14  ;;  %781 = vmatpush.bf16.msra.mxu2 %v2363_v7 }
 0x2ce   :  { %795 = vmatpush.bf16.msra.mxu3 %v2368_v6 }
 0x2d0   :  { %768 = vmatmul.bf16.vlgmr.msra.gmra.mxu1 %v724_v3  ;;  %782 = vmatmul.bf16.vlgmr.msra.gmra.mxu2 %v724_v3 }
 0x2d1   :  { %796 = vmatmul.bf16.vlgmr.msra.gmra.mxu3 %v724_v3 }
 0x34d   :  { %v769_v26 = vpop.f32.mrf.mxu1 }
 0x34e   :  { %v802_v27 = vadd.f32 %v769_v26, %v754_v23 }
 0x350   :  { %v1800_v32 = vmul.f32 -1.442695, %v802_v27  ;;  %v751_v27 = vld [vmem:[#allocation2 + $0x20] sm:$0xf] }
 0x352   :  { %1919 = vpow2.f32 %v1800_v32 }
 0x353   :  { %v783_v43 = vpop.f32.mrf.mxu2 }
 0x354   :  { %v842_v45 = vadd.f32 %v783_v43, %v755_v33  ;;  %v797_v2 = vpop.f32.mrf.mxu3 }
 0x355   :  { %v771_v0 = vpop.f32.mrf.mxu1  ;;  %v882_v54 = vadd.f32 %v797_v2, %v2383_v49 }
 0x356   :  { %v1802_v47 = vmul.f32 -1.442695, %v842_v45  ;;  %v803_v50 = vadd.f32 %v771_v0, %v757_v42  ;;  %v756_v42 = vunpack.c.l.bf16 %v751_v27  ;;  %v753_v45 = vld [vmem:[#allocation2 + $0x2c] sm:$0xf] }
 0x358   :  { %v1920_v15 = vpop.eup %1919  ;;  %1921 = vpow2.f32 %v1802_v47  ;;  %v1801_v51 = vmul.f32 -1.442695, %v803_v50 }
 0x359   :  { %v810_v41 = vadd.f32 1.0, %v1920_v15 }
 0x35a   :  { %1923 = vpow2.f32 %v1801_v51 }
 0x35b   :  { %1925 = vrcp.f32 %v810_v41  ;;  %v785_v52 = vpop.f32.mrf.mxu2  ;;  %v823_v44 = vand.u32 2147483648, %v810_v41  ;;  %v821_v46 = vand.u32 2147483647, %v810_v41  ;;  %vm817_vm1 = vweird.f32 %v810_v41 }
 0x35c   :  { %v843_v53 = vadd.f32 %v785_v52, %v758_v35  ;;  %v799_v50 = vpop.f32.mrf.mxu3 }
 0x35d   :  { %v824_v40 = vor.u32 1.1754944e-38, %v823_v44  ;;  %vm822_vm3 = vcmp.eq.f32.partialorder %v821_v46, 8.507059e+37 }
 0x35e   :  { %v1922_v16 = vpop.eup %1921  ;;  %v1803_v8 = vmul.f32 -1.442695, %v843_v53  ;;  %v759_v53 = vunpack.c.l.bf16 %v753_v45 }
 0x35f   :  { %v2583_v1 = vadd.f32 1.0, %v1922_v16 }
 0x360   :  { %v1924_v4 = vpop.eup %1923  ;;  %1927 = vpow2.f32 %v1803_v8 }
 0x361   :  { %v1926_v34 = vpop.eup %1925  ;;  %1929 = vrcp.f32 %v2583_v1  ;;  %v811_v29 = vadd.f32 1.0, %v1924_v4  ;;  %v883_v4 = vadd.f32 %v799_v50, %v2383_v49  ;;  %vm857_vm8 = vweird.f32 %v2583_v1 }
 0x362   :  { %v813_v11 = vmul.f32 %v1926_v34, %v810_v41  ;;  %vm818_vm0 = vweird.f32 %v1926_v34 }
 0x363   :  { %1931 = vrcp.f32 %v811_v29  ;;  %vm819_vm2 = vmor %vm817_vm1, %vm818_vm0  ;;  %v838_v15 = vand.u32 2147483648, %v811_v29  ;;  %v836_v41 = vand.u32 2147483647, %v811_v29  ;;  %vm832_vm5 = vweird.f32 %v811_v29 }
 0x364   :  { %v814_v5 = vsub.f32 1.0, %v813_v11 }
 0x365   :  { %v839_v2 = vor.u32 1.1754944e-38, %v838_v15  ;;  %vm837_vm9 = vcmp.eq.f32.partialorder %v836_v41, 8.507059e+37 }
 0x366   :  { %v1928_v48 = vpop.eup %1927  ;;  %v815_v17 = vmul.f32 %v1926_v34, %v814_v5  ;;  %v863_v5 = vand.u32 2147483648, %v2583_v1 }
 0x367   :  { %v1930_v39 = vpop.eup %1929  ;;  %v851_v3 = vadd.f32 1.0, %v1928_v48  ;;  %v861_v48 = vand.u32 2147483647, %v2583_v1 }
 0x368   :  { %v853_v22 = vmul.f32 %v1930_v39, %v2583_v1  ;;  %v816_v10 = vadd.f32 %v1926_v34, %v815_v17  ;;  %vm858_vm6 = vweird.f32 %v1930_v39 }
 0x369   :  { %1933 = vrcp.f32 %v851_v3  ;;  %v1932_v23 = vpop.eup %1931  ;;  %vm859_vm11 = vmor %vm857_vm8, %vm858_vm6  ;;  %vm872_vm12 = vweird.f32 %v851_v3  ;;  %vm862_vm14 = vcmp.eq.f32.partialorder %v861_v48, 8.507059e+37 }
 0x36a   :  { %v854_v26 = vsub.f32 1.0, %v853_v22  ;;  %v820_v28 = vsel %vm819_vm2, %v1926_v34, %v816_v10  ;;  %v828_v33 = vmul.f32 %v1932_v23, %v811_v29  ;;  %vm833_vm4 = vweird.f32 %v1932_v23 }
 0x36b   :  { %v825_v32 = vsel %vm822_vm3, %v824_v40, %v820_v28  ;;  %vm834_vm7 = vmor %vm832_vm5, %vm833_vm4  ;;  %v878_v29 = vand.u32 2147483648, %v851_v3  ;;  %v876_v40 = vand.u32 2147483647, %v851_v3 }
 0x36c   :  { %v884_v43 = vmul.f32 %v882_v54, %v825_v32  ;;  %v829_v0 = vsub.f32 1.0, %v828_v33  ;;  %v855_v47 = vmul.f32 %v1930_v39, %v854_v26  ;;  %v864_v26 = vor.u32 1.1754944e-38, %v863_v5 }
 0x36d   :  { %vm877_vm15 = vcmp.eq.f32.partialorder %v876_v40, 8.507059e+37 }
 0x36e   :  { %v830_v35 = vmul.f32 %v1932_v23, %v829_v0  ;;  %v886_v16 = vadd.f32 %v884_v43, %v756_v42  ;;  %v856_v34 = vadd.f32 %v1930_v39, %v855_v47 }
 0x36f   :  { %v1934_v51 = vpop.eup %1933 }
 0x370   :  { %v868_v52 = vmul.f32 %v1934_v51, %v851_v3  ;;  %v831_v8 = vadd.f32 %v1932_v23, %v830_v35  ;;  %vm873_vm10 = vweird.f32 %v1934_v51  ;;  %1935 = vtanh.f32 %v886_v16 }
 0x371   :  { %v860_v54 = vsel %vm859_vm11, %v1930_v39, %v856_v34  ;;  %vm874_vm13 = vmor %vm872_vm12, %vm873_vm10 }
 0x372   :  { %v869_v11 = vsub.f32 1.0, %v868_v52  ;;  %v835_v44 = vsel %vm834_vm7, %v1932_v23, %v831_v8  ;;  %v879_v23 = vor.u32 1.1754944e-38, %v878_v29  ;;  %v865_v32 = vsel %vm862_vm14, %v864_v26, %v860_v54 }
 0x373   :  { %v840_v46 = vsel %vm837_vm9, %v839_v2, %v835_v44  ;;  %v890_v42 = vsub.f32 1.0, %v865_v32  ;;  %v894_v47 = vmul.f32 %v865_v32, %v2544_v21 }
 0x374   :  { %v870_v17 = vmul.f32 %v1934_v51, %v869_v11  ;;  %v885_v22 = vmul.f32 %v883_v4, %v840_v46 }
 0x376   :  { %v871_v10 = vadd.f32 %v1934_v51, %v870_v17  ;;  %v887_v27 = vadd.f32 %v885_v22, %v759_v53  ;;  %v1936_v1 = vpop.eup %1935 }
 0x377   :  { %v892_v43 = vmul.f32 %v1936_v1, %v890_v42 }
 0x378   :  { %v875_v28 = vsel %vm874_vm13, %v1934_v51, %v871_v10  ;;  %1937 = vtanh.f32 %v887_v27 }
 0x379   :  { %v880_v33 = vsel %vm877_vm15, %v879_v23, %v875_v28  ;;  %v2594_v3 = vadd.f32 %v894_v47, %v892_v43 }
 0x37a   :  { %v891_v45 = vsub.f32 1.0, %v880_v33  ;;  %v895_v39 = vmul.f32 %v880_v33, %v2546_v9 }
 0x37e   :  { %v1938_v0 = vpop.eup %1937 }
 0x37f   :  { %v893_v50 = vmul.f32 %v1938_v0, %v891_v45 }
 0x381   :  { %v2596_v15 = vadd.f32 %v895_v39, %v893_v50 }
 0x383   :  { %v898_v51 = vpack.c.bf16 %v2596_v15, %v2594_v3 }
 0x384   :  { %2031 = dma.done.wait [#allocation3], 384 }
 0x385   :  { %2032 = vsyncadd [#allocation3], 4294966912  ;;  %v1804_v35 = vld [vmem:[%s2861_s0 + $0x78] sm:$0xff]  ;;  %v1805_v21 = vld [vmem:[%s2861_s0 + $0x80] sm:$0xff] }
 0x386   :  { %v1806_v9 = vld [vmem:[%s2861_s0 + $0x88] sm:$0xff]  ;;  %913 = vst [vmem:[#allocation2 + $0x18] sm:$0xff] %v1804_v35 }
 0x387   :  { %915 = vst [vmem:[#allocation2 + $0x20] sm:$0xff] %v1805_v21 }
 0x388   :  { %917 = vst [vmem:[#allocation2 + $0x28] sm:$0xff] %v1806_v9 }
 0x389   :  { %923 = vsyncadd [#allocation3 + $0x1], 384  ;;  %934 = vmatpush.bf16.msrb.mxu0 %v2277_v55  ;;  %948 = vmatpush.bf16.msrb.mxu1 %v2279_v56  ;;  %v924_v41 = vld [vmem:[#allocation2] sm:$0xff]  ;;  %v926_v11 = vld [vmem:[#allocation2 + $0xc] sm:$0xff] }
 0x38a   :  { %962 = vmatpush.bf16.msrb.mxu2 %v2287_v59  ;;  %v928_v52 = vunpack.c.l.bf16 %v924_v41  ;;  %v929_v53 = vunpack.c.h.bf16 %v924_v41  ;;  %v931_v44 = vunpack.c.l.bf16 %v926_v11  ;;  %v932_v48 = vunpack.c.h.bf16 %v926_v11  ;;  %v925_v41 = vld [vmem:[#allocation2 + $0x8] sm:$0xf] }
 0x38b   :  { %v930_v11 = vunpack.c.l.bf16 %v925_v41 }
 0x38d   :  { %935 = vmatpush.bf16.msrb.mxu0 %v2283_v57  ;;  %949 = vmatpush.bf16.msrb.mxu1 %v2285_v58 }
 0x38e   :  { %963 = vmatpush.bf16.msrb.mxu2 %v2290_v60 }
 0x391   :  { %936 = vmatpush.bf16.msrb.mxu0 %v2294_v61  ;;  %950 = vmatpush.bf16.msrb.mxu1 %v2296_v62 }
 0x392   :  { %964 = vmatpush.bf16.msrb.mxu2 %v2299_v63 }
 0x395   :  { %937 = vmatpush.bf16.msrb.mxu0 %v2303_v36  ;;  %951 = vmatpush.bf16.msrb.mxu1 %v2305_v37 }
 0x396   :  { %965 = vmatpush.bf16.msrb.mxu2 %v2308_v38 }
 0x399   :  { %938 = vmatpush.bf16.msrb.mxu0 %v2314_v30  ;;  %952 = vmatpush.bf16.msrb.mxu1 %v2318_v31 }
 0x39a   :  { %966 = vmatpush.bf16.msrb.mxu2 %v2323_v24 }
 0x39d   :  { %939 = vmatpush.bf16.msrb.mxu0 %v2329_v25  ;;  %953 = vmatpush.bf16.msrb.mxu1 %v2333_v19 }
 0x39e   :  { %967 = vmatpush.bf16.msrb.mxu2 %v2338_v18 }
 0x3a1   :  { %940 = vmatpush.bf16.msrb.mxu0 %v2344_v20  ;;  %954 = vmatpush.bf16.msrb.mxu1 %v2348_v13 }
 0x3a2   :  { %968 = vmatpush.bf16.msrb.mxu2 %v2353_v12 }
 0x3a5   :  { %941 = vmatpush.bf16.msrb.mxu0 %v2359_v14  ;;  %955 = vmatpush.bf16.msrb.mxu1 %v2363_v7 }
 0x3a6   :  { %969 = vmatpush.bf16.msrb.mxu2 %v2368_v6 }
 0x3a8   :  { %942 = vmatmul.bf16.vlgmr.msrb.gmra.mxu0 %v898_v51  ;;  %956 = vmatmul.bf16.vlgmr.msrb.gmra.mxu1 %v898_v51 }
 0x3a9   :  { %970 = vmatmul.bf16.vlgmr.msrb.gmra.mxu2 %v898_v51 }
 0x425   :  { %v943_v16 = vpop.f32.mrf.mxu0  ;;  %v957_v8 = vpop.f32.mrf.mxu1 }
 0x426   :  { %v976_v4 = vadd.f32 %v943_v16, %v928_v52  ;;  %v1016_v34 = vadd.f32 %v957_v8, %v929_v53 }
 0x428   :  { %v1807_v2 = vmul.f32 -1.442695, %v976_v4  ;;  %v1809_v5 = vmul.f32 -1.442695, %v1016_v34 }
 0x42a   :  { %1939 = vpow2.f32 %v1807_v2 }
 0x42b   :  { %1941 = vpow2.f32 %v1809_v5  ;;  %v927_v5 = vld [vmem:[#allocation2 + $0x14] sm:$0xf] }
 0x42c   :  { %v971_v50 = vpop.f32.mrf.mxu2 }
 0x42d   :  { %v945_v17 = vpop.f32.mrf.mxu0  ;;  %v959_v46 = vpop.f32.mrf.mxu1  ;;  %v1056_v53 = vadd.f32 %v971_v50, %v2383_v49 }
 0x42e   :  { %v977_v29 = vadd.f32 %v945_v17, %v931_v44  ;;  %v1017_v22 = vadd.f32 %v959_v46, %v932_v48 }
 0x430   :  { %v1940_v10 = vpop.eup %1939  ;;  %v1808_v40 = vmul.f32 -1.442695, %v977_v29  ;;  %v1810_v27 = vmul.f32 -1.442695, %v1017_v22 }
 0x431   :  { %v1942_v54 = vpop.eup %1941  ;;  %v984_v26 = vadd.f32 1.0, %v1940_v10 }
 0x432   :  { %v2633_v28 = vadd.f32 1.0, %v1942_v54  ;;  %1943 = vpow2.f32 %v1808_v40  ;;  %v933_v54 = vunpack.c.l.bf16 %v927_v5 }
 0x433   :  { %1945 = vrcp.f32 %v984_v26  ;;  %v997_v39 = vand.u32 2147483648, %v984_v26  ;;  %v995_v35 = vand.u32 2147483647, %v984_v26  ;;  %vm991_vm1 = vweird.f32 %v984_v26 }
 0x434   :  { %1947 = vrcp.f32 %v2633_v28  ;;  %vm1031_vm5 = vweird.f32 %v2633_v28 }
 0x435   :  { %1949 = vpow2.f32 %v1810_v27  ;;  %v998_v16 = vor.u32 1.1754944e-38, %v997_v39  ;;  %vm996_vm3 = vcmp.eq.f32.partialorder %v995_v35, 8.507059e+37  ;;  %v1035_v39 = vand.u32 2147483647, %v2633_v28 }
 0x437   :  { %vm1036_vm14 = vcmp.eq.f32.partialorder %v1035_v39, 8.507059e+37 }
 0x438   :  { %v1944_v23 = vpop.eup %1943 }
 0x439   :  { %v1946_v32 = vpop.eup %1945  ;;  %v985_v1 = vadd.f32 1.0, %v1944_v23 }
 0x43a   :  { %v2636_v33 = vpop.eup %1947  ;;  %v987_v42 = vmul.f32 %v1946_v32, %v984_v26  ;;  %vm992_vm0 = vweird.f32 %v1946_v32  ;;  %v973_v26 = vpop.f32.mrf.mxu2 }
 0x43b   :  { %v1950_v43 = vpop.eup %1949  ;;  %1951 = vrcp.f32 %v985_v1  ;;  %v1027_v47 = vmul.f32 %v2636_v33, %v2633_v28  ;;  %vm993_vm2 = vmor %vm991_vm1, %vm992_vm0  ;;  %v1012_v29 = vand.u32 2147483648, %v985_v1  ;;  %v1010_v10 = vand.u32 2147483647, %v985_v1 }
 0x43c   :  { %v2638_v45 = vadd.f32 1.0, %v1950_v43  ;;  %v988_v0 = vsub.f32 1.0, %v987_v42  ;;  %vm1006_vm6 = vweird.f32 %v985_v1  ;;  %vm1032_vm7 = vweird.f32 %v2636_v33 }
 0x43d   :  { %v1028_v9 = vsub.f32 1.0, %v1027_v47  ;;  %v1013_v43 = vor.u32 1.1754944e-38, %v1012_v29  ;;  %vm1011_vm9 = vcmp.eq.f32.partialorder %v1010_v10, 8.507059e+37  ;;  %v1057_v50 = vadd.f32 %v973_v26, %v2383_v49  ;;  %vm1033_vm11 = vmor %vm1031_vm5, %vm1032_vm7 }
 0x43e   :  { %1953 = vrcp.f32 %v2638_v45  ;;  %v989_v51 = vmul.f32 %v1946_v32, %v988_v0  ;;  %v1037_v0 = vand.u32 2147483648, %v2633_v28  ;;  %vm1046_vm12 = vweird.f32 %v2638_v45 }
 0x43f   :  { %v1029_v48 = vmul.f32 %v2636_v33, %v1028_v9  ;;  %v1050_v41 = vand.u32 2147483647, %v2638_v45 }
 0x440   :  { %v990_v52 = vadd.f32 %v1946_v32, %v989_v51 }
 0x441   :  { %v1952_v21 = vpop.eup %1951  ;;  %vm1051_vm15 = vcmp.eq.f32.partialorder %v1050_v41, 8.507059e+37 }
 0x442   :  { %v1002_v8 = vmul.f32 %v1952_v21, %v985_v1  ;;  %v994_v4 = vsel %vm993_vm2, %v1946_v32, %v990_v52  ;;  %vm1007_vm4 = vweird.f32 %v1952_v21  ;;  %v1030_v32 = vadd.f32 %v2636_v33, %v1029_v48 }
 0x443   :  { %v999_v2 = vsel %vm996_vm3, %v998_v16, %v994_v4  ;;  %vm1008_vm8 = vmor %vm1006_vm6, %vm1007_vm4  ;;  %v1052_v1 = vand.u32 2147483648, %v2638_v45  ;;  %v1038_v52 = vor.u32 1.1754944e-38, %v1037_v0 }
 0x444   :  { %v1954_v34 = vpop.eup %1953  ;;  %v1003_v44 = vsub.f32 1.0, %v1002_v8  ;;  %v1058_v46 = vmul.f32 %v1056_v53, %v999_v2 }
 0x445   :  { %v1042_v17 = vmul.f32 %v1954_v34, %v2638_v45  ;;  %vm1047_vm10 = vweird.f32 %v1954_v34  ;;  %v1053_v8 = vor.u32 1.1754944e-38, %v1052_v1 }
 0x446   :  { %v1004_v22 = vmul.f32 %v1952_v21, %v1003_v44  ;;  %v1060_v27 = vadd.f32 %v1058_v46, %v930_v11  ;;  %vm1048_vm13 = vmor %vm1046_vm12, %vm1047_vm10 }
 0x447   :  { %v1043_v40 = vsub.f32 1.0, %v1042_v17 }
 0x448   :  { %v1005_v23 = vadd.f32 %v1952_v21, %v1004_v22  ;;  %1955 = vtanh.f32 %v1060_v27 }
 0x449   :  { %v1044_v42 = vmul.f32 %v1954_v34, %v1043_v40 }
 0x44a   :  { %v1009_v47 = vsel %vm1008_vm8, %v1952_v21, %v1005_v23  ;;  %v1034_v21 = vsel %vm1033_vm11, %v2636_v33, %v1030_v32 }
 0x44b   :  { %v1045_v51 = vadd.f32 %v1954_v34, %v1044_v42  ;;  %v1014_v35 = vsel %vm1011_vm9, %v1013_v43, %v1009_v47  ;;  %v1039_v4 = vsel %vm1036_vm14, %v1038_v52, %v1034_v21 }
 0x44c   :  { %v1059_v9 = vmul.f32 %v1057_v50, %v1014_v35  ;;  %v1064_v2 = vsub.f32 1.0, %v1039_v4  ;;  %v1068_v17 = vmul.f32 %v1039_v4, %v2594_v3 }
 0x44d   :  { %v1049_v16 = vsel %vm1048_vm13, %v1954_v34, %v1045_v51 }
 0x44e   :  { %v1061_v53 = vadd.f32 %v1059_v9, %v933_v54  ;;  %v1956_v28 = vpop.eup %1955  ;;  %v1054_v11 = vsel %vm1051_vm15, %v1053_v8, %v1049_v16 }
 0x44f   :  { %v1066_v5 = vmul.f32 %v1956_v28, %v1064_v2  ;;  %v1065_v44 = vsub.f32 1.0, %v1054_v11  ;;  %v1069_v33 = vmul.f32 %v1054_v11, %v2596_v15 }
 0x450   :  { %1957 = vtanh.f32 %v1061_v53 }
 0x451   :  { %v2660_v46 = vadd.f32 %v1068_v17, %v1066_v5 }
 0x456   :  { %v1958_v48 = vpop.eup %1957 }
 0x457   :  { %v1067_v45 = vmul.f32 %v1958_v48, %v1065_v44 }
 0x459   :  { %v2662_v29 = vadd.f32 %v1069_v33, %v1067_v45 }
 0x45b   :  { %v1072_v34 = vpack.c.bf16 %v2662_v29, %v2660_v46 }
 0x45c   :  { %2033 = dma.done.wait [#allocation3 + $0x1], 384 }
 0x45d   :  { %2034 = vsyncadd [#allocation3 + $0x1], 4294966912  ;;  %v1811_v22 = vld [vmem:[%s2861_s0 + $0x90] sm:$0xff]  ;;  %v1812_v3 = vld [vmem:[%s2861_s0 + $0x98] sm:$0xff] }
 0x45e   :  { %v1813_v15 = vld [vmem:[%s2861_s0 + $0xa0] sm:$0xff]  ;;  %1087 = vst [vmem:[#allocation2] sm:$0xff] %v1811_v22 }
 0x45f   :  { %1089 = vst [vmem:[#allocation2 + $0x8] sm:$0xff] %v1812_v3 }
 0x460   :  { %1091 = vst [vmem:[#allocation2 + $0x10] sm:$0xff] %v1813_v15 }
 0x461   :  { %1097 = vsyncadd [#allocation3], 384  ;;  %1108 = vmatpush.bf16.msrb.mxu3 %v2277_v55  ;;  %1122 = vmatpush.bf16.msra.mxu0 %v2279_v56  ;;  %v1098_v10 = vld [vmem:[#allocation2 + $0x18] sm:$0xff]  ;;  %v1100_v27 = vld [vmem:[#allocation2 + $0x24] sm:$0xff] }
 0x462   :  { %1136 = vmatpush.bf16.msra.mxu1 %v2287_v59  ;;  %v1103_v40 = vunpack.c.h.bf16 %v1098_v10  ;;  %v1102_v23 = vunpack.c.l.bf16 %v1098_v10  ;;  %v1106_v42 = vunpack.c.h.bf16 %v1100_v27  ;;  %v1105_v35 = vunpack.c.l.bf16 %v1100_v27  ;;  %v1099_v27 = vld [vmem:[#allocation2 + $0x20] sm:$0xf] }
 0x465   :  { %1109 = vmatpush.bf16.msrb.mxu3 %v2283_v57  ;;  %1123 = vmatpush.bf16.msra.mxu0 %v2285_v58 }
 0x466   :  { %1137 = vmatpush.bf16.msra.mxu1 %v2290_v60 }
 0x469   :  { %1110 = vmatpush.bf16.msrb.mxu3 %v2294_v61  ;;  %1124 = vmatpush.bf16.msra.mxu0 %v2296_v62 }
 0x46a   :  { %1138 = vmatpush.bf16.msra.mxu1 %v2299_v63 }
 0x46d   :  { %1111 = vmatpush.bf16.msrb.mxu3 %v2303_v36  ;;  %1125 = vmatpush.bf16.msra.mxu0 %v2305_v37 }
 0x46e   :  { %1139 = vmatpush.bf16.msra.mxu1 %v2308_v38 }
 0x471   :  { %1112 = vmatpush.bf16.msrb.mxu3 %v2314_v30  ;;  %1126 = vmatpush.bf16.msra.mxu0 %v2318_v31 }
 0x472   :  { %1140 = vmatpush.bf16.msra.mxu1 %v2323_v24 }
 0x475   :  { %1113 = vmatpush.bf16.msrb.mxu3 %v2329_v25  ;;  %1127 = vmatpush.bf16.msra.mxu0 %v2333_v19 }
 0x476   :  { %1141 = vmatpush.bf16.msra.mxu1 %v2338_v18 }
 0x479   :  { %1114 = vmatpush.bf16.msrb.mxu3 %v2344_v20  ;;  %1128 = vmatpush.bf16.msra.mxu0 %v2348_v13 }
 0x47a   :  { %1142 = vmatpush.bf16.msra.mxu1 %v2353_v12 }
 0x47d   :  { %1115 = vmatpush.bf16.msrb.mxu3 %v2359_v14  ;;  %1129 = vmatpush.bf16.msra.mxu0 %v2363_v7 }
 0x47e   :  { %1143 = vmatpush.bf16.msra.mxu1 %v2368_v6 }
 0x480   :  { %1116 = vmatmul.bf16.vlgmr.msrb.gmra.mxu3 %v1072_v34  ;;  %1130 = vmatmul.bf16.vlgmr.msra.gmra.mxu0 %v1072_v34 }
 0x481   :  { %1144 = vmatmul.bf16.vlgmr.msra.gmra.mxu1 %v1072_v34 }
 0x4fd   :  { %v1131_v54 = vpop.f32.mrf.mxu0 }
 0x4fe   :  { %v1190_v26 = vadd.f32 %v1131_v54, %v1103_v40  ;;  %v1145_v33 = vpop.f32.mrf.mxu1 }
 0x4ff   :  { %v1230_v40 = vadd.f32 %v1145_v33, %v2383_v49 }
 0x500   :  { %v1816_v32 = vmul.f32 -1.442695, %v1190_v26 }
 0x502   :  { %1959 = vpow2.f32 %v1816_v32 }
 0x503   :  { %v1117_v43 = vpop.f32.mrf.mxu3 }
 0x504   :  { %v1150_v0 = vadd.f32 %v1117_v43, %v1102_v23 }
 0x505   :  { %v1133_v47 = vpop.f32.mrf.mxu0 }
 0x506   :  { %v1814_v50 = vmul.f32 -1.442695, %v1150_v0  ;;  %v1191_v39 = vadd.f32 %v1133_v47, %v1106_v42  ;;  %v1104_v47 = vunpack.c.l.bf16 %v1099_v27 }
 0x508   :  { %1961 = vpow2.f32 %v1814_v50  ;;  %v1817_v51 = vmul.f32 -1.442695, %v1191_v39  ;;  %v1960_v1 = vpop.eup %1959 }
 0x509   :  { %v2699_v52 = vadd.f32 1.0, %v1960_v1 }
 0x50a   :  { %1963 = vpow2.f32 %v1817_v51 }
 0x50b   :  { %v1119_v9 = vpop.f32.mrf.mxu3  ;;  %vm1205_vm5 = vweird.f32 %v2699_v52 }
 0x50c   :  { %v1151_v41 = vadd.f32 %v1119_v9, %v1105_v35 }
 0x50e   :  { %v1962_v21 = vpop.eup %1961  ;;  %v1815_v53 = vmul.f32 -1.442695, %v1151_v41 }
 0x50f   :  { %v1158_v16 = vadd.f32 1.0, %v1962_v21  ;;  %v1101_v21 = vld [vmem:[#allocation2 + $0x2c] sm:$0xf] }
 0x510   :  { %v1964_v8 = vpop.eup %1963  ;;  %1965 = vpow2.f32 %v1815_v53  ;;  %v1147_v53 = vpop.f32.mrf.mxu1  ;;  %v1107_v33 = vunpack.c.l.bf16 %v1101_v21 }
 0x511   :  { %1967 = vrcp.f32 %v1158_v16  ;;  %v2701_v4 = vadd.f32 1.0, %v1964_v8  ;;  %v1171_v34 = vand.u32 2147483648, %v1158_v16  ;;  %v1169_v3 = vand.u32 2147483647, %v1158_v16 }
 0x512   :  { %1969 = vrcp.f32 %v2699_v52  ;;  %vm1165_vm1 = vweird.f32 %v1158_v16 }
 0x513   :  { %1971 = vrcp.f32 %v2701_v4  ;;  %v1172_v23 = vor.u32 1.1754944e-38, %v1171_v34  ;;  %vm1170_vm3 = vcmp.eq.f32.partialorder %v1169_v3, 8.507059e+37  ;;  %vm1220_vm11 = vweird.f32 %v2701_v4 }
 0x516   :  { %v1966_v28 = vpop.eup %1965 }
 0x517   :  { %v1968_v11 = vpop.eup %1967  ;;  %v1159_v2 = vadd.f32 1.0, %v1966_v28 }
 0x518   :  { %v2705_v5 = vpop.eup %1969  ;;  %v1161_v44 = vmul.f32 %v1968_v11, %v1158_v16  ;;  %vm1166_vm0 = vweird.f32 %v1968_v11  ;;  %v1211_v16 = vand.u32 2147483648, %v2699_v52 }
 0x519   :  { %1973 = vrcp.f32 %v1159_v2  ;;  %v2707_v48 = vpop.eup %1971  ;;  %v1201_v45 = vmul.f32 %v2705_v5, %v2699_v52  ;;  %vm1167_vm2 = vmor %vm1165_vm1, %vm1166_vm0  ;;  %v1186_v35 = vand.u32 2147483648, %v1159_v2  ;;  %v1184_v9 = vand.u32 2147483647, %v1159_v2 }
 0x51a   :  { %v1162_v17 = vsub.f32 1.0, %v1161_v44  ;;  %v1216_v15 = vmul.f32 %v2707_v48, %v2701_v4  ;;  %vm1206_vm6 = vweird.f32 %v2705_v5  ;;  %vm1180_vm7 = vweird.f32 %v1159_v2 }
 0x51b   :  { %v1202_v26 = vsub.f32 1.0, %v1201_v45  ;;  %v1209_v44 = vand.u32 2147483647, %v2699_v52  ;;  %vm2721_vm9 = vmor %vm1205_vm5, %vm1206_vm6  ;;  %vm1185_vm10 = vcmp.eq.f32.partialorder %v1184_v9, 8.507059e+37  ;;  %vm1221_vm12 = vweird.f32 %v2707_v48 }
 0x51c   :  { %v1163_v22 = vmul.f32 %v1968_v11, %v1162_v17  ;;  %v1217_v43 = vsub.f32 1.0, %v1216_v15  ;;  %v1187_v17 = vor.u32 1.1754944e-38, %v1186_v35  ;;  %v1212_v15 = vor.u32 1.1754944e-38, %v1211_v16  ;;  %vm1222_vm14 = vmor %vm1220_vm11, %vm1221_vm12 }
 0x51d   :  { %v1203_v51 = vmul.f32 %v2705_v5, %v1202_v26  ;;  %v1226_v52 = vand.u32 2147483648, %v2701_v4  ;;  %vm1210_vm13 = vcmp.eq.f32.partialorder %v1209_v44, 8.507059e+37 }
 0x51e   :  { %v1164_v10 = vadd.f32 %v1968_v11, %v1163_v22  ;;  %v1218_v41 = vmul.f32 %v2707_v48, %v1217_v43  ;;  %v1231_v22 = vadd.f32 %v1147_v53, %v2383_v49 }
 0x51f   :  { %v1974_v54 = vpop.eup %1973 }
 0x520   :  { %v1168_v32 = vsel %vm1167_vm2, %v1968_v11, %v1164_v10  ;;  %v1176_v42 = vmul.f32 %v1974_v54, %v1159_v2  ;;  %vm1181_vm4 = vweird.f32 %v1974_v54  ;;  %v1204_v11 = vadd.f32 %v2705_v5, %v1203_v51 }
 0x521   :  { %v1173_v0 = vsel %vm1170_vm3, %v1172_v23, %v1168_v32  ;;  %vm1182_vm8 = vmor %vm1180_vm7, %vm1181_vm4  ;;  %v1219_v3 = vadd.f32 %v2707_v48, %v1218_v41  ;;  %v1227_v23 = vor.u32 1.1754944e-38, %v1226_v52 }
 0x522   :  { %v1232_v50 = vmul.f32 %v1230_v40, %v1173_v0  ;;  %v1177_v39 = vsub.f32 1.0, %v1176_v42  ;;  %v1224_v40 = vand.u32 2147483647, %v2701_v4 }
 0x523   :  { %v1223_v27 = vsel %vm1222_vm14, %v2707_v48, %v1219_v3 }
 0x524   :  { %v1178_v1 = vmul.f32 %v1974_v54, %v1177_v39  ;;  %v1234_v8 = vadd.f32 %v1232_v50, %v1104_v47  ;;  %vm1225_vm15 = vcmp.eq.f32.partialorder %v1224_v40, 8.507059e+37 }
 0x525   :  { %v1228_v43 = vsel %vm1225_vm15, %v1227_v23, %v1223_v27 }
 0x526   :  { %v1179_v28 = vadd.f32 %v1974_v54, %v1178_v1  ;;  %1975 = vtanh.f32 %v1234_v8  ;;  %v1239_v50 = vsub.f32 1.0, %v1228_v43  ;;  %v1243_v35 = vmul.f32 %v1228_v43, %v2662_v29 }
 0x528   :  { %v1183_v34 = vsel %vm1182_vm8, %v1974_v54, %v1179_v28  ;;  %v1208_v54 = vsel %vm2721_vm9, %v2705_v5, %v1204_v11 }
 0x529   :  { %v1188_v2 = vsel %vm1185_vm10, %v1187_v17, %v1183_v34  ;;  %v1213_v32 = vsel %vm1210_vm13, %v1212_v15, %v1208_v54 }
 0x52a   :  { %v1233_v10 = vmul.f32 %v1231_v22, %v1188_v2  ;;  %v1238_v0 = vsub.f32 1.0, %v1213_v32  ;;  %v1242_v4 = vmul.f32 %v1213_v32, %v2660_v46 }
 0x52c   :  { %v1235_v26 = vadd.f32 %v1233_v10, %v1107_v33  ;;  %v1976_v42 = vpop.eup %1975 }
 0x52d   :  { %v1240_v47 = vmul.f32 %v1976_v42, %v1238_v0 }
 0x52e   :  { %1977 = vtanh.f32 %v1235_v26 }
 0x52f   :  { %v2737_v5 = vadd.f32 %v1242_v4, %v1240_v47 }
 0x534   :  { %v1978_v39 = vpop.eup %1977 }
 0x535   :  { %v1241_v51 = vmul.f32 %v1978_v39, %v1239_v50 }
 0x537   :  { %v2739_v1 = vadd.f32 %v1243_v35, %v1241_v51 }
 0x539   :  { %v1246_v48 = vpack.c.bf16 %v2739_v1, %v2737_v5 }
 0x53a   :  { %2035 = dma.done.wait [#allocation3], 384 }
 0x53b   :  { %2036 = vsyncadd [#allocation3], 4294966912  ;;  %v1818_v9 = vld [vmem:[%s2861_s0 + $0xa8] sm:$0xff]  ;;  %v1819_v46 = vld [vmem:[%s2861_s0 + $0xb0] sm:$0xff] }
 0x53c   :  { %v1820_v29 = vld [vmem:[%s2861_s0 + $0xb8] sm:$0xff]  ;;  %1261 = vst [vmem:[#allocation2 + $0x18] sm:$0xff] %v1818_v9 }
 0x53d   :  { %1263 = vst [vmem:[#allocation2 + $0x20] sm:$0xff] %v1819_v46 }
 0x53e   :  { %1265 = vst [vmem:[#allocation2 + $0x28] sm:$0xff] %v1820_v29 }
 0x53f   :  { %1271 = vsyncadd [#allocation3 + $0x1], 384  ;;  %1282 = vmatpush.bf16.msra.mxu2 %v2277_v55  ;;  %1296 = vmatpush.bf16.msra.mxu3 %v2279_v56  ;;  %v1272_v41 = vld [vmem:[#allocation2] sm:$0xff]  ;;  %v1274_v44 = vld [vmem:[#allocation2 + $0xc] sm:$0xff] }
 0x540   :  { %1310 = vmatpush.bf16.msrb.mxu0 %v2287_v59  ;;  %v1276_v21 = vunpack.c.l.bf16 %v1272_v41  ;;  %v1277_v53 = vunpack.c.h.bf16 %v1272_v41  ;;  %v1279_v33 = vunpack.c.l.bf16 %v1274_v44  ;;  %v1280_v34 = vunpack.c.h.bf16 %v1274_v44  ;;  %v1273_v41 = vld [vmem:[#allocation2 + $0x8] sm:$0xf] }
 0x541   :  { %v1278_v44 = vunpack.c.l.bf16 %v1273_v41 }
 0x543   :  { %1283 = vmatpush.bf16.msra.mxu2 %v2283_v57  ;;  %1297 = vmatpush.bf16.msra.mxu3 %v2285_v58 }
 0x544   :  { %1311 = vmatpush.bf16.msrb.mxu0 %v2290_v60 }
 0x547   :  { %1284 = vmatpush.bf16.msra.mxu2 %v2294_v61  ;;  %1298 = vmatpush.bf16.msra.mxu3 %v2296_v62 }
 0x548   :  { %1312 = vmatpush.bf16.msrb.mxu0 %v2299_v63 }
 0x54b   :  { %1285 = vmatpush.bf16.msra.mxu2 %v2303_v36  ;;  %1299 = vmatpush.bf16.msra.mxu3 %v2305_v37 }
 0x54c   :  { %1313 = vmatpush.bf16.msrb.mxu0 %v2308_v38 }
 0x54f   :  { %1286 = vmatpush.bf16.msra.mxu2 %v2314_v30  ;;  %1300 = vmatpush.bf16.msra.mxu3 %v2318_v31 }
 0x550   :  { %1314 = vmatpush.bf16.msrb.mxu0 %v2323_v24 }
 0x553   :  { %1287 = vmatpush.bf16.msra.mxu2 %v2329_v25  ;;  %1301 = vmatpush.bf16.msra.mxu3 %v2333_v19 }
 0x554   :  { %1315 = vmatpush.bf16.msrb.mxu0 %v2338_v18 }
 0x557   :  { %1288 = vmatpush.bf16.msra.mxu2 %v2344_v20  ;;  %1302 = vmatpush.bf16.msra.mxu3 %v2348_v13 }
 0x558   :  { %1316 = vmatpush.bf16.msrb.mxu0 %v2353_v12 }
 0x55b   :  { %1289 = vmatpush.bf16.msra.mxu2 %v2359_v14  ;;  %1303 = vmatpush.bf16.msra.mxu3 %v2363_v7 }
 0x55c   :  { %1317 = vmatpush.bf16.msrb.mxu0 %v2368_v6 }
 0x55e   :  { %1290 = vmatmul.bf16.vlgmr.msra.gmra.mxu2 %v1246_v48  ;;  %1304 = vmatmul.bf16.vlgmr.msra.gmra.mxu3 %v1246_v48 }
 0x55f   :  { %1318 = vmatmul.bf16.vlgmr.msrb.gmra.mxu0 %v1246_v48 }
 0x5dc   :  { %v1319_v0 = vpop.f32.mrf.mxu0 }
 0x5e1   :  { %v1291_v16 = vpop.f32.mrf.mxu2  ;;  %v1305_v8 = vpop.f32.mrf.mxu3 }
 0x5e2   :  { %v1324_v28 = vadd.f32 %v1291_v16, %v1276_v21  ;;  %v1364_v11 = vadd.f32 %v1305_v8, %v1277_v53  ;;  %v1404_v53 = vadd.f32 %v1319_v0, %v2383_v49 }
 0x5e4   :  { %v1821_v17 = vmul.f32 -1.442695, %v1324_v28  ;;  %v1823_v45 = vmul.f32 -1.442695, %v1364_v11 }
 0x5e6   :  { %1979 = vpow2.f32 %v1821_v17 }
 0x5e7   :  { %1981 = vpow2.f32 %v1823_v45  ;;  %v1321_v45 = vpop.f32.mrf.mxu0 }
 0x5e9   :  { %v1293_v22 = vpop.f32.mrf.mxu2  ;;  %v1307_v3 = vpop.f32.mrf.mxu3 }
 0x5ea   :  { %v1325_v2 = vadd.f32 %v1293_v22, %v1279_v33  ;;  %v1365_v15 = vadd.f32 %v1307_v3, %v1280_v34 }
 0x5ec   :  { %v1980_v52 = vpop.eup %1979  ;;  %v1822_v10 = vmul.f32 -1.442695, %v1325_v2  ;;  %v1824_v26 = vmul.f32 -1.442695, %v1365_v15 }
 0x5ed   :  { %v1982_v40 = vpop.eup %1981  ;;  %v1332_v54 = vadd.f32 1.0, %v1980_v52 }
 0x5ee   :  { %v2776_v27 = vadd.f32 1.0, %v1982_v40  ;;  %1983 = vpow2.f32 %v1822_v10  ;;  %v1275_v40 = vld [vmem:[#allocation2 + $0x14] sm:$0xf] }
 0x5ef   :  { %1985 = vrcp.f32 %v1332_v54  ;;  %v1345_v35 = vand.u32 2147483648, %v1332_v54  ;;  %v1343_v9 = vand.u32 2147483647, %v1332_v54  ;;  %vm1339_vm1 = vweird.f32 %v1332_v54 }
 0x5f0   :  { %1987 = vrcp.f32 %v2776_v27  ;;  %vm1379_vm5 = vweird.f32 %v2776_v27 }
 0x5f1   :  { %1989 = vpow2.f32 %v1824_v26  ;;  %v1346_v16 = vor.u32 1.1754944e-38, %v1345_v35  ;;  %vm1344_vm3 = vcmp.eq.f32.partialorder %v1343_v9, 8.507059e+37  ;;  %v1383_v35 = vand.u32 2147483647, %v2776_v27 }
 0x5f3   :  { %vm1384_vm14 = vcmp.eq.f32.partialorder %v1383_v35, 8.507059e+37 }
 0x5f4   :  { %v1984_v23 = vpop.eup %1983 }
 0x5f5   :  { %v1986_v32 = vpop.eup %1985  ;;  %v1333_v42 = vadd.f32 1.0, %v1984_v23 }
 0x5f6   :  { %v2779_v43 = vpop.eup %1987  ;;  %v1335_v47 = vmul.f32 %v1986_v32, %v1332_v54  ;;  %vm1340_vm0 = vweird.f32 %v1986_v32  ;;  %v1405_v54 = vadd.f32 %v1321_v45, %v2383_v49 }
 0x5f7   :  { %v1990_v50 = vpop.eup %1989  ;;  %1991 = vrcp.f32 %v1333_v42  ;;  %v1375_v51 = vmul.f32 %v2779_v43, %v2776_v27  ;;  %vm1341_vm2 = vmor %vm1339_vm1, %vm1340_vm0  ;;  %v1360_v2 = vand.u32 2147483648, %v1333_v42  ;;  %v1358_v52 = vand.u32 2147483647, %v1333_v42 }
 0x5f8   :  { %v2781_v39 = vadd.f32 1.0, %v1990_v50  ;;  %v1336_v4 = vsub.f32 1.0, %v1335_v47  ;;  %vm1354_vm6 = vweird.f32 %v1333_v42  ;;  %vm1380_vm7 = vweird.f32 %v2779_v43 }
 0x5f9   :  { %v1376_v29 = vsub.f32 1.0, %v1375_v51  ;;  %v1361_v47 = vor.u32 1.1754944e-38, %v1360_v2  ;;  %v1385_v50 = vand.u32 2147483648, %v2776_v27  ;;  %vm1359_vm9 = vcmp.eq.f32.partialorder %v1358_v52, 8.507059e+37  ;;  %vm1381_vm11 = vmor %vm1379_vm5, %vm1380_vm7 }
 0x5fa   :  { %1993 = vrcp.f32 %v2781_v39  ;;  %v1337_v48 = vmul.f32 %v1986_v32, %v1336_v4  ;;  %v1281_v4 = vunpack.c.l.bf16 %v1275_v40  ;;  %vm1394_vm12 = vweird.f32 %v2781_v39 }
 0x5fb   :  { %v1377_v34 = vmul.f32 %v2779_v43, %v1376_v29  ;;  %v1398_v41 = vand.u32 2147483647, %v2781_v39 }
 0x5fc   :  { %v1338_v21 = vadd.f32 %v1986_v32, %v1337_v48 }
 0x5fd   :  { %v1992_v46 = vpop.eup %1991  ;;  %vm1399_vm15 = vcmp.eq.f32.partialorder %v1398_v41, 8.507059e+37 }
 0x5fe   :  { %v1350_v8 = vmul.f32 %v1992_v46, %v1333_v42  ;;  %v1342_v28 = vsel %vm1341_vm2, %v1986_v32, %v1338_v21  ;;  %vm1355_vm4 = vweird.f32 %v1992_v46  ;;  %v1378_v32 = vadd.f32 %v2779_v43, %v1377_v34 }
 0x5ff   :  { %v1347_v17 = vsel %vm1344_vm3, %v1346_v16, %v1342_v28  ;;  %vm1356_vm8 = vmor %vm1354_vm6, %vm1355_vm4  ;;  %v1400_v42 = vand.u32 2147483648, %v2781_v39 }
 0x600   :  { %v1994_v11 = vpop.eup %1993  ;;  %v1351_v33 = vsub.f32 1.0, %v1350_v8  ;;  %v1406_v3 = vmul.f32 %v1404_v53, %v1347_v17  ;;  %v1382_v21 = vsel %vm1381_vm11, %v2779_v43, %v1378_v32 }
 0x601   :  { %v1390_v22 = vmul.f32 %v1994_v11, %v2781_v39  ;;  %vm1395_vm10 = vweird.f32 %v1994_v11  ;;  %v1401_v8 = vor.u32 1.1754944e-38, %v1400_v42 }
 0x602   :  { %v1352_v15 = vmul.f32 %v1992_v46, %v1351_v33  ;;  %v1408_v26 = vadd.f32 %v1406_v3, %v1278_v44  ;;  %vm1396_vm13 = vmor %vm1394_vm12, %vm1395_vm10 }
 0x603   :  { %v1391_v10 = vsub.f32 1.0, %v1390_v22 }
 0x604   :  { %v1353_v23 = vadd.f32 %v1992_v46, %v1352_v15  ;;  %1995 = vtanh.f32 %v1408_v26 }
 0x605   :  { %v1392_v0 = vmul.f32 %v1994_v11, %v1391_v10 }
 0x606   :  { %v1357_v51 = vsel %vm1356_vm8, %v1992_v46, %v1353_v23  ;;  %v1386_v46 = vor.u32 1.1754944e-38, %v1385_v50 }
 0x607   :  { %v1393_v48 = vadd.f32 %v1994_v11, %v1392_v0  ;;  %v1362_v9 = vsel %vm1359_vm9, %v1361_v47, %v1357_v51 }
 0x608   :  { %v1407_v29 = vmul.f32 %v1405_v54, %v1362_v9  ;;  %v1387_v28 = vsel %vm1384_vm14, %v1386_v46, %v1382_v21 }
 0x609   :  { %v1397_v16 = vsel %vm1396_vm13, %v1994_v11, %v1393_v48  ;;  %v1412_v17 = vsub.f32 1.0, %v1387_v28  ;;  %v1416_v22 = vmul.f32 %v1387_v28, %v2737_v5 }
 0x60a   :  { %v1409_v53 = vadd.f32 %v1407_v29, %v1281_v4  ;;  %v1996_v27 = vpop.eup %1995  ;;  %v1402_v44 = vsel %vm1399_vm15, %v1401_v8, %v1397_v16 }
 0x60b   :  { %v1414_v45 = vmul.f32 %v1996_v27, %v1412_v17  ;;  %v1413_v33 = vsub.f32 1.0, %v1402_v44  ;;  %v1417_v43 = vmul.f32 %v1402_v44, %v2739_v1 }
 0x60c   :  { %1997 = vtanh.f32 %v1409_v53 }
 0x60d   :  { %v2803_v3 = vadd.f32 %v1416_v22, %v1414_v45 }
 0x612   :  { %v1998_v34 = vpop.eup %1997 }
 0x613   :  { %v1415_v39 = vmul.f32 %v1998_v34, %v1413_v33 }
 0x615   :  { %v2805_v2 = vadd.f32 %v1417_v43, %v1415_v39 }
 0x617   :  { %v1420_v11 = vpack.c.bf16 %v2805_v2, %v2803_v3 }
 0x618   :  { %2037 = dma.done.wait [#allocation3 + $0x1], 384 }
 0x619   :  { %2038 = vsyncadd [#allocation3 + $0x1], 4294966912  ;;  %v1825_v15 = vld [vmem:[%s2861_s0 + $0xa8] sm:$0xff]  ;;  %v1826_v5 = vld [vmem:[%s2861_s0 + $0xb0] sm:$0xff] }
 0x61a   :  { %v1827_v1 = vld [vmem:[%s2861_s0 + $0xb8] sm:$0xff]  ;;  %1434 = vst [vmem:[#allocation2] sm:$0xff] %v1825_v15 }
 0x61b   :  { %1436 = vst [vmem:[#allocation2 + $0x8] sm:$0xff] %v1826_v5 }
 0x61c   :  { %1438 = vst [vmem:[#allocation2 + $0x10] sm:$0xff] %v1827_v1 }
 0x61d   :  { %1444 = vsyncadd [#allocation3], 384  ;;  %1455 = vmatpush.bf16.msrb.mxu1 %v2277_v55  ;;  %1469 = vmatpush.bf16.msrb.mxu2 %v2279_v56  ;;  %v1445_v55 = vld [vmem:[#allocation2 + $0x18] sm:$0xff]  ;;  %v1446_v4 = vld [vmem:[#allocation2 + $0x20] sm:$0xf] }
 0x61e   :  { %1483 = vmatpush.bf16.msrb.mxu3 %v2287_v59  ;;  %v1449_v56 = vunpack.c.l.bf16 %v1445_v55  ;;  %v1447_v59 = vld [vmem:[#allocation2 + $0x24] sm:$0xff]  ;;  %v1451_v41 = vunpack.c.l.bf16 %v1446_v4  ;;  %v1448_v5 = vld [vmem:[#allocation2 + $0x2c] sm:$0xf] }
 0x621   :  { %1456 = vmatpush.bf16.msrb.mxu1 %v2283_v57  ;;  %1470 = vmatpush.bf16.msrb.mxu2 %v2285_v58 }
 0x622   :  { %1484 = vmatpush.bf16.msrb.mxu3 %v2290_v60 }
 0x625   :  { %1457 = vmatpush.bf16.msrb.mxu1 %v2294_v61  ;;  %1471 = vmatpush.bf16.msrb.mxu2 %v2296_v62  ;;  %v1450_v61 = vunpack.c.h.bf16 %v1445_v55  ;;  %v1452_v62 = vunpack.c.l.bf16 %v1447_v59 }
 0x626   :  { %1485 = vmatpush.bf16.msrb.mxu3 %v2299_v63 }
 0x629   :  { %1458 = vmatpush.bf16.msrb.mxu1 %v2303_v36  ;;  %1472 = vmatpush.bf16.msrb.mxu2 %v2305_v37 }
 0x62a   :  { %1486 = vmatpush.bf16.msrb.mxu3 %v2308_v38 }
 0x62d   :  { %1459 = vmatpush.bf16.msrb.mxu1 %v2314_v30  ;;  %1473 = vmatpush.bf16.msrb.mxu2 %v2318_v31 }
 0x62e   :  { %1487 = vmatpush.bf16.msrb.mxu3 %v2323_v24 }
 0x631   :  { %1460 = vmatpush.bf16.msrb.mxu1 %v2329_v25  ;;  %1474 = vmatpush.bf16.msrb.mxu2 %v2333_v19  ;;  %v1453_v25 = vunpack.c.h.bf16 %v1447_v59  ;;  %v1454_v59 = vunpack.c.l.bf16 %v1448_v5 }
 0x632   :  { %1488 = vmatpush.bf16.msrb.mxu3 %v2338_v18 }
 0x635   :  { %1461 = vmatpush.bf16.msrb.mxu1 %v2344_v20  ;;  %1475 = vmatpush.bf16.msrb.mxu2 %v2348_v13 }
 0x636   :  { %1489 = vmatpush.bf16.msrb.mxu3 %v2353_v12 }
 0x639   :  { %1462 = vmatpush.bf16.msrb.mxu1 %v2359_v14  ;;  %1476 = vmatpush.bf16.msrb.mxu2 %v2363_v7 }
 0x63a   :  { %1490 = vmatpush.bf16.msrb.mxu3 %v2368_v6 }
 0x63c   :  { %1463 = vmatmul.bf16.vlgmr.msrb.gmra.mxu1 %v1420_v11  ;;  %1477 = vmatmul.bf16.vlgmr.msrb.gmra.mxu2 %v1420_v11 }
 0x63d   :  { %1491 = vmatmul.bf16.vlgmr.msrb.gmra.mxu3 %v1420_v11 }
 0x6b9   :  { %v1464_v57 = vpop.f32.mrf.mxu1 }
 0x6ba   :  { %v1497_v58 = vadd.f32 %v1464_v57, %v1449_v56 }
 0x6bc   :  { %v1828_v60 = vmul.f32 -1.442695, %v1497_v58 }
 0x6be   :  { %1999 = vpow2.f32 %v1828_v60 }
 0x6bf   :  { %v1478_v63 = vpop.f32.mrf.mxu2 }
 0x6c0   :  { %v1537_v36 = vadd.f32 %v1478_v63, %v1450_v61  ;;  %v1492_v23 = vpop.f32.mrf.mxu3 }
 0x6c1   :  { %v1466_v37 = vpop.f32.mrf.mxu1  ;;  %v1577_v48 = vadd.f32 %v1492_v23, %v2383_v49 }
 0x6c2   :  { %v1830_v38 = vmul.f32 -1.442695, %v1537_v36  ;;  %v1498_v30 = vadd.f32 %v1466_v37, %v1452_v62 }
 0x6c4   :  { %v2000_v31 = vpop.eup %1999  ;;  %2001 = vpow2.f32 %v1830_v38  ;;  %v1829_v24 = vmul.f32 -1.442695, %v1498_v30 }
 0x6c5   :  { %v1505_v19 = vadd.f32 1.0, %v2000_v31 }
 0x6c6   :  { %2003 = vpow2.f32 %v1829_v24 }
 0x6c7   :  { %2005 = vrcp.f32 %v1505_v19  ;;  %v1480_v18 = vpop.f32.mrf.mxu2  ;;  %v1518_v54 = vand.u32 2147483648, %v1505_v19  ;;  %v1516_v0 = vand.u32 2147483647, %v1505_v19  ;;  %vm1512_vm1 = vweird.f32 %v1505_v19 }
 0x6c8   :  { %v1538_v20 = vadd.f32 %v1480_v18, %v1453_v25  ;;  %v1494_v1 = vpop.f32.mrf.mxu3 }
 0x6c9   :  { %v1519_v9 = vor.u32 1.1754944e-38, %v1518_v54  ;;  %vm1517_vm3 = vcmp.eq.f32.partialorder %v1516_v0, 8.507059e+37  ;;  %v1578_v61 = vadd.f32 %v1494_v1, %v2383_v49 }
 0x6ca   :  { %v2002_v13 = vpop.eup %2001  ;;  %v1831_v12 = vmul.f32 -1.442695, %v1538_v20 }
 0x6cb   :  { %v1545_v14 = vadd.f32 1.0, %v2002_v13 }
 0x6cc   :  { %v2004_v7 = vpop.eup %2003  ;;  %2007 = vpow2.f32 %v1831_v12 }
 0x6cd   :  { %v2006_v6 = vpop.eup %2005  ;;  %2009 = vrcp.f32 %v1545_v14  ;;  %v1506_v52 = vadd.f32 1.0, %v2004_v7  ;;  %v1558_v8 = vand.u32 2147483648, %v1545_v14  ;;  %v1556_v27 = vand.u32 2147483647, %v1545_v14 }
 0x6ce   :  { %v1508_v10 = vmul.f32 %v2006_v6, %v1505_v19  ;;  %vm1513_vm0 = vweird.f32 %v2006_v6  ;;  %vm1552_vm5 = vweird.f32 %v1545_v14 }
 0x6cf   :  { %2011 = vrcp.f32 %v1506_v52  ;;  %vm1514_vm2 = vmor %vm1512_vm1, %vm1513_vm0  ;;  %v1533_v33 = vand.u32 2147483648, %v1506_v52  ;;  %v1531_v39 = vand.u32 2147483647, %v1506_v52  ;;  %v1559_v43 = vor.u32 1.1754944e-38, %v1558_v8 }
 0x6d0   :  { %v1509_v40 = vsub.f32 1.0, %v1508_v10  ;;  %vm1557_vm8 = vcmp.eq.f32.partialorder %v1556_v27, 8.507059e+37  ;;  %vm1527_vm9 = vweird.f32 %v1506_v52 }
 0x6d1   :  { %v1534_v58 = vor.u32 1.1754944e-38, %v1533_v33  ;;  %vm1532_vm11 = vcmp.eq.f32.partialorder %v1531_v39, 8.507059e+37 }
 0x6d2   :  { %v2008_v26 = vpop.eup %2007  ;;  %v1510_v32 = vmul.f32 %v2006_v6, %v1509_v40 }
 0x6d3   :  { %v2010_v47 = vpop.eup %2009  ;;  %v2842_v50 = vadd.f32 1.0, %v2008_v26 }
 0x6d4   :  { %v1548_v51 = vmul.f32 %v2010_v47, %v1545_v14  ;;  %v1511_v35 = vadd.f32 %v2006_v6, %v1510_v32  ;;  %vm1553_vm4 = vweird.f32 %v2010_v47 }
 0x6d5   :  { %2013 = vrcp.f32 %v2842_v50  ;;  %v2012_v42 = vpop.eup %2011  ;;  %vm1554_vm6 = vmor %vm1552_vm5, %vm1553_vm4  ;;  %v1573_v36 = vand.u32 2147483648, %v2842_v50  ;;  %vm1567_vm13 = vweird.f32 %v2842_v50  ;;  %v1571_v24 = vand.u32 2147483647, %v2842_v50 }
 0x6d6   :  { %v1549_v29 = vsub.f32 1.0, %v1548_v51  ;;  %v1515_v21 = vsel %vm1514_vm2, %v2006_v6, %v1511_v35  ;;  %v1523_v53 = vmul.f32 %v2012_v42, %v1506_v52  ;;  %vm1528_vm7 = vweird.f32 %v2012_v42 }
 0x6d7   :  { %v1520_v46 = vsel %vm1517_vm3, %v1519_v9, %v1515_v21  ;;  %vm1529_vm10 = vmor %vm1527_vm9, %vm1528_vm7  ;;  %v1574_v49 = vor.u32 1.1754944e-38, %v1573_v36  ;;  %vm1572_vm15 = vcmp.eq.f32.partialorder %v1571_v24, 8.507059e+37 }
 0x6d8   :  { %v1550_v16 = vmul.f32 %v2010_v47, %v1549_v29  ;;  %v1579_v28 = vmul.f32 %v1577_v48, %v1520_v46  ;;  %v1524_v44 = vsub.f32 1.0, %v1523_v53 }
 0x6da   :  { %v1551_v17 = vadd.f32 %v2010_v47, %v1550_v16  ;;  %v1581_v45 = vadd.f32 %v1579_v28, %v1451_v41  ;;  %v1525_v22 = vmul.f32 %v2012_v42, %v1524_v44 }
 0x6db   :  { %v2014_v34 = vpop.eup %2013 }
 0x6dc   :  { %v1563_v11 = vmul.f32 %v2014_v34, %v2842_v50  ;;  %v1555_v15 = vsel %vm1554_vm6, %v2010_v47, %v1551_v17  ;;  %2015 = vtanh.f32 %v1581_v45  ;;  %v1526_v55 = vadd.f32 %v2012_v42, %v1525_v22 }
 0x6dd   :  { %v1560_v57 = vsel %vm1557_vm8, %v1559_v43, %v1555_v15  ;;  %vm1568_vm12 = vweird.f32 %v2014_v34 }
 0x6de   :  { %v1564_v56 = vsub.f32 1.0, %v1563_v11  ;;  %v1530_v60 = vsel %vm1529_vm10, %v2012_v42, %v1526_v55  ;;  %v1585_v37 = vsub.f32 1.0, %v1560_v57  ;;  %vm1569_vm14 = vmor %vm1567_vm13, %vm1568_vm12  ;;  %v1589_v19 = vmul.f32 %v1560_v57, %v2803_v3 }
 0x6df   :  { %v1535_v63 = vsel %vm1532_vm11, %v1534_v58, %v1530_v60 }
 0x6e0   :  { %v1565_v62 = vmul.f32 %v2014_v34, %v1564_v56  ;;  %v1580_v38 = vmul.f32 %v1578_v61, %v1535_v63 }
 0x6e2   :  { %v2016_v30 = vpop.eup %2015  ;;  %v1566_v31 = vadd.f32 %v2014_v34, %v1565_v62  ;;  %v1582_v18 = vadd.f32 %v1580_v38, %v1454_v59 }
 0x6e3   :  { %v1587_v25 = vmul.f32 %v2016_v30, %v1585_v37 }
 0x6e4   :  { %v1570_v20 = vsel %vm1569_vm14, %v2014_v34, %v1566_v31  ;;  %2017 = vtanh.f32 %v1582_v18 }
 0x6e5   :  { %v1591_v13 = vadd.f32 %v1589_v19, %v1587_v25  ;;  %v1575_v12 = vsel %vm1572_vm15, %v1574_v49, %v1570_v20 }
 0x6e6   :  { %v1586_v14 = vsub.f32 1.0, %v1575_v12  ;;  %v1590_v52 = vmul.f32 %v1575_v12, %v2805_v2 }
 0x6e7   :  { %v1595_v40 = vmul.f32 %v1591_v13, %v1591_v13 }
 0x6ea   :  { %v2018_v7 = vpop.eup %2017 }
 0x6eb   :  { %v1588_v6 = vmul.f32 %v2018_v7, %v1586_v14 }
 0x6ed   :  { %v1592_v10 = vadd.f32 %v1590_v52, %v1588_v6 }
 0x6ee   :  { %2039 = dma.done.wait [#allocation3], 384 }
 0x6ef   :  { %2040 = vsyncadd [#allocation3], 4294966912  ;;  %1597 = vadd.xlane.f32.xlu0 %v1595_v40  ;;  %v1596_v54 = vmul.f32 %v1592_v10, %v1592_v10 }
 0x6f7   :  { %1599 = vadd.xlane.f32.xlu0 %v1596_v54 }
 0x762   :  { %v1598_v3 = vpop.xlane.xlu0 %1597 }
 0x763   :  { %v1601_v26 = vadd.f32 1e-12, %v1598_v3 }
 0x765   :  { %2019 = vrsqrt.f32 %v1601_v26  ;;  %vm1609_vm1 = vweird.f32 %v1601_v26 }
 0x76a   :  { %v1600_v23 = vpop.xlane.xlu0 %1599 }
 0x76b   :  { %v2020_v32 = vpop.eup %2019  ;;  %v1602_v0 = vadd.f32 1e-12, %v1600_v23 }
 0x76c   :  { %v1604_v47 = vmul.f32 %v2020_v32, %v1601_v26  ;;  %vm1610_vm0 = vweird.f32 %v2020_v32 }
 0x76d   :  { %2021 = vrsqrt.f32 %v1602_v0  ;;  %vm1611_vm2 = vmor %vm1609_vm1, %vm1610_vm0  ;;  %vm1619_vm4 = vweird.f32 %v1602_v0 }
 0x76e   :  { %v1605_v50 = vmul.f32 %v2020_v32, %v1604_v47 }
 0x770   :  { %v1606_v4 = vmul.f32 0.5, %v1605_v50 }
 0x772   :  { %v1607_v51 = vsub.f32 1.5, %v1606_v4 }
 0x773   :  { %v2022_v2 = vpop.eup %2021 }
 0x774   :  { %v1614_v35 = vmul.f32 %v2022_v2, %v1602_v0  ;;  %v1608_v48 = vmul.f32 %v2020_v32, %v1607_v51  ;;  %vm1620_vm3 = vweird.f32 %v2022_v2 }
 0x775   :  { %vm1621_vm5 = vmor %vm1619_vm4, %vm1620_vm3 }
 0x776   :  { %v1615_v9 = vmul.f32 %v2022_v2, %v1614_v35  ;;  %v1612_v42 = vsel %vm1611_vm2, %v2020_v32, %v1608_v48 }
 0x777   :  { %v1623_v29 = vmul.f32 %v1612_v42, %v1591_v13 }
 0x778   :  { %v1616_v41 = vmul.f32 0.5, %v1615_v9 }
 0x779   :  { %1625 = vst [vmem:[%s2860_s3] sm:$0xff] %v1623_v29 }
 0x77a   :  { %v1617_v21 = vsub.f32 1.5, %v1616_v41 }
 0x77c   :  { %v1618_v46 = vmul.f32 %v2022_v2, %v1617_v21 }
 0x77e   :  { %v1622_v53 = vsel %vm1621_vm5, %v2022_v2, %v1618_v46 }
 0x77f   :  { %v1624_v16 = vmul.f32 %v1622_v53, %v1592_v10 }
 0x781   :  { %1626 = vst [vmem:[%s2860_s3 + $0x8] sm:$0xff] %v1624_v16 }
 0x782   :  { %1631 = vsyncmov [#allocation3] }
 0x785   :  { %s1632_s28 = vpop.sfrf %1631 }
 0x786   :  { %p1832_p0 = scmp.ne.s32.totalorder %s1632_s28, 0 }
 0x788   :  { %1636 = shalt.err (%p1832_p0)  }
 0x789   :  { %1638 = vsyncmov [#allocation3 + $0x1] }
 0x78c   :  { %s1639_s29 = vpop.sfrf %1638 }
 0x78d   :  { %p1833_p1 = scmp.ne.s32.totalorder %s1639_s29, 0 }
 0x78f   :  { %1643 = shalt.err (%p1833_p1)  }

</bundles_post_ra>
